<compile_context>
chip_gen: v7x
topology: tpu7x:2x2x1
jax: 0.10.0
libtpu: 0.0.40
codegen_flags: <defaults>
</compile_context>

<pallas_src>
import functools

import jax
import jax.numpy as jnp
from jax.experimental import pallas as pl
from jax.experimental.pallas import tpu as pltpu

EPS = 1e-5


# --------------------------------------------------------------------- utils --
def _round_up(x, m):
    return (x + m - 1) // m * m


def _vmem_limit_bytes(per_step_bytes):
    """Scoped-VMEM limit from explicit per-step buffer accounting (+ headroom)."""
    try:
        cap = pltpu.get_tpu_info().vmem_capacity_bytes
    except Exception:  # conservative fallback if the query is unavailable
        cap = 64 * 1024 * 1024
    want = int(per_step_bytes * 1.5) + (8 << 20)
    return int(max(32 << 20, min(want, cap * 3 // 4)))


def _avgpool2d(a, s):
    """(Hd, Wd, C) -> (Hd//s, Wd//s, C): mean over s x s windows on the VPU."""
    if s == 1:
        return a
    Hd, Wd, C = a.shape
    t = a.reshape(Hd // s, s, Wd, C).sum(axis=1)
    t = t.reshape(Hd // s, Wd // s, s, C).sum(axis=2)
    return t * (1.0 / (s * s))


# --------------------------------------------------- fused conv1+conv2 body --
def _conv12_body(x_ref, w1_ref, b1_ref, w2c_ref, b2_ref, ypad_ref, ycat_ref,
                 H, W, PADW):
    """conv1(1x1)+bias+relu into a zero-haloed row layout, then conv2(3x3)+bias+relu.

    Returns the conv2 output as an (H*PADW, P) f32 array; only columns < W of each
    padded row are valid (the remaining columns are dropped / pooled away later).
    """
    P = w1_ref.shape[1]
    Cin = x_ref.shape[-1]
    cdt = w1_ref.dtype
    L = (H + 2) * PADW

    # ---- conv1 (BN scale folded into the weights) on real pixels only ----------
    x = x_ref[0].reshape(H * W, Cin).astype(cdt)
    y1 = jnp.maximum(
        jnp.dot(x, w1_ref[...], preferred_element_type=jnp.float32) + b1_ref[...],
        0.0).astype(ypad_ref.dtype).reshape(H, W, P)

    # ---- place into the flat zero-padded row layout (1-pixel halo) -------------
    ypad_ref[0:PADW, :] = jnp.zeros((PADW, P), ypad_ref.dtype)               # top
    ypad_ref[(H + 1) * PADW:(H + 3) * PADW, :] = jnp.zeros(
        (2 * PADW, P), ypad_ref.dtype)                                        # bottom + tail
    zl = jnp.zeros((H, 1, P), ypad_ref.dtype)
    zr = jnp.zeros((H, PADW - W - 1, P), ypad_ref.dtype)
    ypad_ref[PADW:(H + 1) * PADW, :] = jnp.concatenate(
        [zl, y1, zr], axis=1).reshape(H * PADW, P)

    # ---- pre-shifted (kw) copies: conv2 operands become aligned static windows --
    ycat_ref[:, 0 * P:1 * P] = ypad_ref[0:L, :]
    ycat_ref[:, 1 * P:2 * P] = ypad_ref[1:L + 1, :]
    ycat_ref[:, 2 * P:3 * P] = ypad_ref[2:L + 2, :]

    # ---- conv2 (3x3) as three wide-K (K = 3*P) matmuls --------------------------
    acc = jnp.dot(ycat_ref[0:H * PADW, :], w2c_ref[0],
                  preferred_element_type=jnp.float32)
    for kh in (1, 2):
        acc = acc + jnp.dot(ycat_ref[kh * PADW:kh * PADW + H * PADW, :],
                            w2c_ref[kh], preferred_element_type=jnp.float32)
    return jnp.maximum(acc + b2_ref[...], 0.0)                   # (H*PADW, P) f32


# ------------------------------------------------------------- full kernels --
def _bottleneck_ds_kernel(x_ref, w1_ref, b1_ref, w2c_ref, b2_ref,
                          w3wd_ref, b3d_ref, o_ref, ypad_ref, ycat_ref,
                          *, H, W, PADW, stride):
    """Bottleneck with downsample branch; conv3 and downsample conv are one matmul."""
    P = w1_ref.shape[1]
    Cin = x_ref.shape[-1]
    s = stride
    Hp, Wp = H // s, W // s

    y2 = _conv12_body(x_ref, w1_ref, b1_ref, w2c_ref, b2_ref,
                      ypad_ref, ycat_ref, H, W, PADW)            # (H*PADW, P) f32

    # average-pool the main branch (wrap columns >= W never reach pooled cols < Wp)
    if s > 1 and PADW % s == 0:
        yp = _avgpool2d(y2.reshape(H, PADW, P), s)[:, :Wp, :]
    else:
        yp = _avgpool2d(y2.reshape(H, PADW, P)[:, :W, :], s)
    yp = yp.reshape(Hp * Wp, P)

    # pooled identity for the downsample branch (pooling kept in f32)
    xp = _avgpool2d(x_ref[0], s).reshape(Hp * Wp, Cin)

    # merged conv3 + downsample 1x1 conv: one wide-K matmul + single bias
    op = jnp.concatenate([yp, xp], axis=1).astype(w3wd_ref.dtype)
    out = jnp.dot(op, w3wd_ref[...],
                  preferred_element_type=jnp.float32) + b3d_ref[...]
    o_ref[0] = jnp.maximum(out, 0.0).astype(o_ref.dtype)


def _bottleneck_id_kernel(x_ref, w1_ref, b1_ref, w2c_ref, b2_ref,
                          w3_ref, b3_ref, o_ref, ypad_ref, ycat_ref,
                          *, H, W, PADW):
    """Bottleneck without downsample (stride 1, inplanes == 4*planes): f32 identity add."""
    P = w1_ref.shape[1]
    Cin = x_ref.shape[-1]
    CoutP = w3_ref.shape[-1]

    y2 = _conv12_body(x_ref, w1_ref, b1_ref, w2c_ref, b2_ref,
                      ypad_ref, ycat_ref, H, W, PADW)            # (H*PADW, P) f32

    yp = y2.reshape(H, PADW, P)[:, :W, :].reshape(H * W, P)
    main = jnp.dot(yp.astype(w3_ref.dtype), w3_ref[...],
                   preferred_element_type=jnp.float32) + b3_ref[...]

    iden = x_ref[0].reshape(H * W, Cin)                          # f32 identity
    if CoutP > Cin:
        iden = jnp.concatenate(
            [iden, jnp.zeros((H * W, CoutP - Cin), jnp.float32)], axis=1)
    o_ref[0] = jnp.maximum(main + iden, 0.0).astype(o_ref.dtype)


# -------------------------------------------------------------- pallas_call --
def fused_bottleneck(xh, params, stride):
    """xh: (N, H, W, Cin) f32 NHWC -> (N, Hp*Wp, CoutP) f32 (channel-padded)."""
    N, H, W, Cin = xh.shape
    assert H % stride == 0 and W % stride == 0, "H/W must be divisible by stride"
    P, CoutP = params["P"], params["coutp"]
    PADW = _round_up(W + 2, 16)                 # bf16 sublane tile -> aligned windows
    Hp, Wp = H // stride, W // stride
    has_ds = params["w3wd"] is not None

    in_specs = [
        pl.BlockSpec((1, H, W, Cin), lambda n: (n, 0, 0, 0)),
        pl.BlockSpec((Cin, P), lambda n: (0, 0)),
        pl.BlockSpec((1, P), lambda n: (0, 0)),
        pl.BlockSpec((3, 3 * P, P), lambda n: (0, 0, 0)),
        pl.BlockSpec((1, P), lambda n: (0, 0)),
    ]
    args = [xh, params["w1"], params["b1"], params["w2c"], params["b2"]]
    if has_ds:
        kernel = functools.partial(_bottleneck_ds_kernel,
                                   H=H, W=W, PADW=PADW, stride=stride)
        in_specs += [pl.BlockSpec((P + Cin, CoutP), lambda n: (0, 0)),
                     pl.BlockSpec((1, CoutP), lambda n: (0, 0))]
        args += [params["w3wd"], params["b3d"]]
    else:
        assert stride == 1
        kernel = functools.partial(_bottleneck_id_kernel, H=H, W=W, PADW=PADW)
        in_specs += [pl.BlockSpec((P, CoutP), lambda n: (0, 0)),
                     pl.BlockSpec((1, CoutP), lambda n: (0, 0))]
        args += [params["w3"], params["b3"]]

    # explicit per-step VMEM accounting (double-buffered I/O + weights + scratch
    # + f32 intermediates), clamped to a safe fraction of physical capacity.
    bf, f4 = 2, 4
    per_step = (
        2 * (H * W * Cin * f4 + Hp * Wp * CoutP * f4)
        + (Cin * P + 9 * P * P + (P + Cin) * CoutP) * bf
        + (2 * P + CoutP) * f4
        + (H + 3) * PADW * P * bf
        + (H + 2) * PADW * 3 * P * bf
        + 3 * H * PADW * P * f4)

    return pl.pallas_call(
        kernel,
        grid=(N,),
        in_specs=in_specs,
        out_specs=pl.BlockSpec((1, Hp * Wp, CoutP), lambda n: (n, 0, 0)),
        out_shape=jax.ShapeDtypeStruct((N, Hp * Wp, CoutP), jnp.float32),
        scratch_shapes=[
            pltpu.VMEM(((H + 3) * PADW, P), jnp.bfloat16),       # padded y1 rows
            pltpu.VMEM(((H + 2) * PADW, 3 * P), jnp.bfloat16),   # kw-concat windows
        ],
        compiler_params=pltpu.CompilerParams(
            dimension_semantics=("parallel",),
            vmem_limit_bytes=_vmem_limit_bytes(per_step)),
    )(*args)


# --------------------------------------------------------------------- glue --
def bottleneck_forward(x_nchw, params, stride):
    N, Cin, H, W = x_nchw.shape
    xh = jnp.transpose(x_nchw, (0, 2, 3, 1)).astype(jnp.float32)     # NHWC f32
    out = fused_bottleneck(xh, params, stride)                       # (N, Hp*Wp, CoutP)
    Hp, Wp = H // stride, W // stride
    Cout = params["cout"]
    out = out[..., :Cout].reshape(N, Hp, Wp, Cout)
    return jnp.transpose(out, (0, 3, 1, 2))                          # NCHW f32


def fold_bn(gamma, beta, mean, var, eps=EPS):
    inv = gamma / jnp.sqrt(var + eps)
    return inv, beta - mean * inv


# ---------------------------------------------------------- params / reference --
def init_params(key, inplanes, planes, stride, compute_dtype=jnp.bfloat16):
    Cout = 4 * planes
    P = _round_up(planes, 128)          # lane-dense conv1/conv2 channel dim
    CoutP = _round_up(Cout, 128)        # lane-dense output channel dim
    ks = jax.random.split(key, 8)
    w1o = jax.random.normal(ks[0], (planes, inplanes, 1, 1), jnp.float32) * (2.0 / inplanes) ** 0.5
    w2o = jax.random.normal(ks[1], (planes, planes, 3, 3), jnp.float32) * (2.0 / (planes * 9)) ** 0.5
    w3o = jax.random.normal(ks[2], (Cout, planes, 1, 1), jnp.float32) * (2.0 / planes) ** 0.5

    def bn(k, C):
        k1, k2, k3, k4 = jax.random.split(k, 4)
        gamma = 1.0 + 0.1 * jax.random.normal(k1, (C,), jnp.float32)
        beta = 0.1 * jax.random.normal(k2, (C,), jnp.float32)
        mean = 0.1 * jax.random.normal(k3, (C,), jnp.float32)
        var = 0.5 + jax.random.uniform(k4, (C,), jnp.float32)
        return gamma, beta, mean, var

    bn1, bn2, bn3 = bn(ks[3], planes), bn(ks[4], planes), bn(ks[5], Cout)
    raw = {"w1o": w1o, "w2o": w2o, "w3o": w3o,
           "bn1": bn1, "bn2": bn2, "bn3": bn3, "wdo": None, "bnd": None}
    has_ds = stride > 1 or inplanes != Cout
    if has_ds:
        raw["wdo"] = jax.random.normal(ks[6], (Cout, inplanes, 1, 1), jnp.float32) * (2.0 / inplanes) ** 0.5
        raw["bnd"] = bn(ks[7], Cout)

    s1, b1 = fold_bn(*bn1)
    s2, b2 = fold_bn(*bn2)
    s3, b3 = fold_bn(*bn3)

    # conv1: BN scale folded into columns, zero-padded to P (padded out-channels
    # stay exactly zero through relu since the padded bias is zero).
    w1 = w1o[:, :, 0, 0].T * s1[None, :]                           # (Cin, planes)
    w1p = jnp.zeros((inplanes, P), jnp.float32).at[:, :planes].set(w1)
    b1p = jnp.zeros((1, P), jnp.float32).at[0, :planes].set(b1)

    # conv2: taps laid out as (kh, kw-stacked K, out) with BN scale folded in.
    w2 = jnp.transpose(w2o, (2, 3, 1, 0)) * s2[None, None, None, :]  # (3,3,in,out)
    w2c = jnp.zeros((3, 3 * P, P), jnp.float32)
    for kh in range(3):
        for kw in range(3):
            w2c = w2c.at[kh, kw * P:kw * P + planes, :planes].set(w2[kh, kw])
    b2p = jnp.zeros((1, P), jnp.float32).at[0, :planes].set(b2)

    # conv3 (+ optional downsample conv stacked along K for one merged matmul).
    w3 = w3o[:, :, 0, 0].T * s3[None, :]                           # (planes, Cout)
    w3p = jnp.zeros((P, CoutP), jnp.float32).at[:planes, :Cout].set(w3)
    b3p = jnp.zeros((1, CoutP), jnp.float32).at[0, :Cout].set(b3)

    params = {"w1": w1p.astype(compute_dtype), "b1": b1p,
              "w2c": w2c.astype(compute_dtype), "b2": b2p,
              "w3": None, "b3": None, "w3wd": None, "b3d": None,
              "planes": planes, "cout": Cout, "P": P, "coutp": CoutP}
    if has_ds:
        sd, bd = fold_bn(*raw["bnd"])
        wd = raw["wdo"][:, :, 0, 0].T * sd[None, :]                # (Cin, Cout)
        wdp = jnp.zeros((inplanes, CoutP), jnp.float32).at[:, :Cout].set(wd)
        bdp = jnp.zeros((1, CoutP), jnp.float32).at[0, :Cout].set(bd)
        params["w3wd"] = jnp.concatenate([w3p, wdp], axis=0).astype(compute_dtype)
        params["b3d"] = b3p + bdp
    else:
        params["w3"] = w3p.astype(compute_dtype)
        params["b3"] = b3p
    return params, raw


def reference_forward(x, raw, stride, eps=EPS):
    """Plain-JAX (XLA, f32) reference matching the PyTorch module in eval mode."""
    def conv(z, w, pad):
        return jax.lax.conv_general_dilated(
            z, w, (1, 1), ((pad, pad), (pad, pad)),
            dimension_numbers=("NCHW", "OIHW", "NCHW"))

    def bn(z, p):
        g, b, m, v = p
        inv = g / jnp.sqrt(v + eps)
        return z * inv[None, :, None, None] + (b - m * inv)[None, :, None, None]

    def avgpool(z, s):
        if s == 1:
            return z
        N, C, H, W = z.shape
        return z.reshape(N, C, H // s, s, W // s, s).mean(axis=(3, 5))

    out = jax.nn.relu(bn(conv(x, raw["w1o"], 0), raw["bn1"]))
    out = jax.nn.relu(bn(conv(out, raw["w2o"], 1), raw["bn2"]))
    out = avgpool(out, stride)
    out = bn(conv(out, raw["w3o"], 0), raw["bn3"])
    identity = x
    if raw["wdo"] is not None:
        identity = bn(conv(avgpool(x, stride), raw["wdo"], 0), raw["bnd"])
    return jax.nn.relu(out + identity)


# ---------------------------------------------------------------------- main --
if __name__ == "__main__":
    configs = [
        # (N, inplanes, planes, H, W, stride)
        (2, 8, 4, 16, 16, 2),    # stride-2 path: pooling + merged downsample branch
        (2, 16, 4, 16, 16, 1),   # stride-1 path: no pooling, f32 identity add
    ]
    key = jax.random.PRNGKey(0)
    for (N, inplanes, planes, H, W, stride) in configs:
        key, kx, kp = jax.random.split(key, 3)
        x = jax.random.normal(kx, (N, inplanes, H, W), jnp.float32)
        params, raw = init_params(kp, inplanes, planes, stride)

        out = jax.block_until_ready(bottleneck_forward(x, params, stride))
        ref = reference_forward(x, raw, stride)

        Cout = 4 * planes
        assert out.shape == (N, Cout, H // stride, W // stride), out.shape
        err = float(jnp.max(jnp.abs(out - ref)))
        # bf16 conv operands vs f32 reference -> relative tolerance.
        tol = 3e-2 * float(jnp.max(jnp.abs(ref))) + 1e-3
        assert err <= tol, f"stride={stride}: max abs err {err} > tol {tol}"
    print("KERNEL_OK")
</pallas_src>

<mosaic_0001>
module attributes {stable_mosaic.version = 11 : i64} {
  func.func @_bottleneck_ds_kernel(%arg0: i32, %arg1: memref<1x16x16x8xf32, #tpu.memory_space<vmem>>, %arg2: memref<8x128xbf16, #tpu.memory_space<vmem>>, %arg3: memref<1x128xf32, #tpu.memory_space<vmem>>, %arg4: memref<3x384x128xbf16, #tpu.memory_space<vmem>>, %arg5: memref<1x128xf32, #tpu.memory_space<vmem>>, %arg6: memref<136x128xbf16, #tpu.memory_space<vmem>>, %arg7: memref<1x128xf32, #tpu.memory_space<vmem>>, %arg8: memref<1x64x128xf32, #tpu.memory_space<vmem>>, %arg9: memref<608x128xbf16, #tpu.memory_space<vmem>>, %arg10: memref<576x384xbf16, #tpu.memory_space<vmem>>) attributes {dimension_semantics = [#tpu.dimension_semantics<parallel>], iteration_bounds = array<i64: 2>, scalar_prefetch = 0 : i64, scratch_operands = 2 : i64, tpu.core_type = #tpu.core_type<tc>, window_params = [{transform_indices = @transform_0, window_bounds = array<i64: 1, 16, 16, 8>}, {pipeline_mode = #tpu.pipeline_mode<synchronous>, transform_indices = @transform_1, window_bounds = array<i64: 8, 128>}, {pipeline_mode = #tpu.pipeline_mode<synchronous>, transform_indices = @transform_2, window_bounds = array<i64: 1, 128>}, {pipeline_mode = #tpu.pipeline_mode<synchronous>, transform_indices = @transform_3, window_bounds = array<i64: 3, 384, 128>}, {pipeline_mode = #tpu.pipeline_mode<synchronous>, transform_indices = @transform_4, window_bounds = array<i64: 1, 128>}, {pipeline_mode = #tpu.pipeline_mode<synchronous>, transform_indices = @transform_5, window_bounds = array<i64: 136, 128>}, {pipeline_mode = #tpu.pipeline_mode<synchronous>, transform_indices = @transform_6, window_bounds = array<i64: 1, 128>}, {transform_indices = @transform_7, window_bounds = array<i64: 1, 64, 128>}]} {
    %c0 = arith.constant 0 : index
    %c0_0 = arith.constant 0 : index
    %c0_1 = arith.constant 0 : index
    %c0_2 = arith.constant 0 : index
    %0 = vector.load %arg1[%c0, %c0_0, %c0_1, %c0_2] : memref<1x16x16x8xf32, #tpu.memory_space<vmem>>, vector<1x16x16x8xf32>
    %1 = vector.shape_cast %0 : vector<1x16x16x8xf32> to vector<16x16x8xf32>
    %2 = vector.shape_cast %1 : vector<16x16x8xf32> to vector<256x8xf32>
    %3 = arith.truncf %2 : vector<256x8xf32> to vector<256x8xbf16>
    %c0_3 = arith.constant 0 : index
    %c0_4 = arith.constant 0 : index
    %4 = vector.load %arg2[%c0_3, %c0_4] : memref<8x128xbf16, #tpu.memory_space<vmem>>, vector<8x128xbf16>
    %cst = arith.constant dense<0.000000e+00> : vector<256x128xf32>
    %5 = tpu.matmul %3, %4, %cst {dimension_numbers = #tpu.dot_dimension_numbers<[1], [0], [0], [1], [0, 0, 1, 1], [], []>} : vector<256x8xbf16>, vector<8x128xbf16>, vector<256x128xf32> -> vector<256x128xf32>
    %c0_5 = arith.constant 0 : index
    %c0_6 = arith.constant 0 : index
    %6 = vector.load %arg3[%c0_5, %c0_6] : memref<1x128xf32, #tpu.memory_space<vmem>>, vector<1x128xf32>
    %7 = vector.broadcast %6 : vector<1x128xf32> to vector<256x128xf32>
    %8 = arith.addf %5, %7 : vector<256x128xf32>
    %cst_7 = arith.constant 0.000000e+00 : f32
    %9 = vector.broadcast %cst_7 : f32 to vector<256x128xf32>
    %10 = arith.maximumf %8, %9 : vector<256x128xf32>
    %11 = arith.truncf %10 : vector<256x128xf32> to vector<256x128xbf16>
    %12 = vector.shape_cast %11 : vector<256x128xbf16> to vector<16x16x128xbf16>
    %cst_8 = arith.constant 0.000000e+00 : bf16
    %13 = vector.broadcast %cst_8 : bf16 to vector<32x128xbf16>
    %c0_9 = arith.constant 0 : index
    %c0_10 = arith.constant 0 : index
    %14 = vector.load %arg9[%c0_9, %c0_10] : memref<608x128xbf16, #tpu.memory_space<vmem>>, vector<32x128xbf16>
    tpu.vector_store %arg9[%c0_9, %c0_10], %13 {strides = array<i32>} : memref<608x128xbf16, #tpu.memory_space<vmem>>, vector<32x128xbf16>,
    %cst_11 = arith.constant 0.000000e+00 : bf16
    %15 = vector.broadcast %cst_11 : bf16 to vector<64x128xbf16>
    %c544 = arith.constant 544 : index
    %c0_12 = arith.constant 0 : index
    %16 = vector.load %arg9[%c544, %c0_12] : memref<608x128xbf16, #tpu.memory_space<vmem>>, vector<64x128xbf16>
    tpu.vector_store %arg9[%c544, %c0_12], %15 {strides = array<i32>} : memref<608x128xbf16, #tpu.memory_space<vmem>>, vector<64x128xbf16>,
    %cst_13 = arith.constant 0.000000e+00 : bf16
    %17 = vector.broadcast %cst_13 : bf16 to vector<16x1x128xbf16>
    %cst_14 = arith.constant 0.000000e+00 : bf16
    %18 = vector.broadcast %cst_14 : bf16 to vector<16x15x128xbf16>
    %19 = tpu.concatenate %17, %12, %18 in 1 : vector<16x1x128xbf16>, vector<16x16x128xbf16>, vector<16x15x128xbf16> -> vector<16x32x128xbf16>
    %20 = vector.shape_cast %19 : vector<16x32x128xbf16> to vector<512x128xbf16>
    %c32 = arith.constant 32 : index
    %c0_15 = arith.constant 0 : index
    %21 = vector.load %arg9[%c32, %c0_15] : memref<608x128xbf16, #tpu.memory_space<vmem>>, vector<512x128xbf16>
    tpu.vector_store %arg9[%c32, %c0_15], %20 {strides = array<i32>} : memref<608x128xbf16, #tpu.memory_space<vmem>>, vector<512x128xbf16>,
    %c0_16 = arith.constant 0 : index
    %c0_17 = arith.constant 0 : index
    %22 = vector.load %arg9[%c0_16, %c0_17] : memref<608x128xbf16, #tpu.memory_space<vmem>>, vector<576x128xbf16>
    %c0_18 = arith.constant 0 : index
    %c0_19 = arith.constant 0 : index
    %23 = vector.load %arg10[%c0_18, %c0_19] : memref<576x384xbf16, #tpu.memory_space<vmem>>, vector<576x128xbf16>
    tpu.vector_store %arg10[%c0_18, %c0_19], %22 {strides = array<i32>} : memref<576x384xbf16, #tpu.memory_space<vmem>>, vector<576x128xbf16>,
    %c1 = arith.constant 1 : index
    %c0_20 = arith.constant 0 : index
    %24 = vector.load %arg9[%c1, %c0_20] : memref<608x128xbf16, #tpu.memory_space<vmem>>, vector<576x128xbf16>
    %c0_21 = arith.constant 0 : index
    %c128 = arith.constant 128 : index
    %25 = vector.load %arg10[%c0_21, %c128] : memref<576x384xbf16, #tpu.memory_space<vmem>>, vector<576x128xbf16>
    tpu.vector_store %arg10[%c0_21, %c128], %24 {strides = array<i32>} : memref<576x384xbf16, #tpu.memory_space<vmem>>, vector<576x128xbf16>,
    %c2 = arith.constant 2 : index
    %c0_22 = arith.constant 0 : index
    %26 = vector.load %arg9[%c2, %c0_22] : memref<608x128xbf16, #tpu.memory_space<vmem>>, vector<576x128xbf16>
    %c0_23 = arith.constant 0 : index
    %c256 = arith.constant 256 : index
    %27 = vector.load %arg10[%c0_23, %c256] : memref<576x384xbf16, #tpu.memory_space<vmem>>, vector<576x128xbf16>
    tpu.vector_store %arg10[%c0_23, %c256], %26 {strides = array<i32>} : memref<576x384xbf16, #tpu.memory_space<vmem>>, vector<576x128xbf16>,
    %c0_24 = arith.constant 0 : index
    %c0_25 = arith.constant 0 : index
    %28 = vector.load %arg10[%c0_24, %c0_25] : memref<576x384xbf16, #tpu.memory_space<vmem>>, vector<512x384xbf16>
    %c0_26 = arith.constant 0 : index
    %c0_27 = arith.constant 0 : index
    %c0_28 = arith.constant 0 : index
    %29 = vector.load %arg4[%c0_26, %c0_27, %c0_28] : memref<3x384x128xbf16, #tpu.memory_space<vmem>>, vector<1x384x128xbf16>
    %30 = vector.shape_cast %29 : vector<1x384x128xbf16> to vector<384x128xbf16>
    %cst_29 = arith.constant dense<0.000000e+00> : vector<512x128xf32>
    %31 = tpu.matmul %28, %30, %cst_29 {dimension_numbers = #tpu.dot_dimension_numbers<[1], [0], [0], [1], [0, 0, 1, 1], [], []>} : vector<512x384xbf16>, vector<384x128xbf16>, vector<512x128xf32> -> vector<512x128xf32>
    %c32_30 = arith.constant 32 : index
    %c0_31 = arith.constant 0 : index
    %32 = vector.load %arg10[%c32_30, %c0_31] : memref<576x384xbf16, #tpu.memory_space<vmem>>, vector<512x384xbf16>
    %c1_32 = arith.constant 1 : index
    %c0_33 = arith.constant 0 : index
    %c0_34 = arith.constant 0 : index
    %33 = vector.load %arg4[%c1_32, %c0_33, %c0_34] : memref<3x384x128xbf16, #tpu.memory_space<vmem>>, vector<1x384x128xbf16>
    %34 = vector.shape_cast %33 : vector<1x384x128xbf16> to vector<384x128xbf16>
    %cst_35 = arith.constant dense<0.000000e+00> : vector<512x128xf32>
    %35 = tpu.matmul %32, %34, %cst_35 {dimension_numbers = #tpu.dot_dimension_numbers<[1], [0], [0], [1], [0, 0, 1, 1], [], []>} : vector<512x384xbf16>, vector<384x128xbf16>, vector<512x128xf32> -> vector<512x128xf32>
    %36 = arith.addf %31, %35 : vector<512x128xf32>
    %c64 = arith.constant 64 : index
    %c0_36 = arith.constant 0 : index
    %37 = vector.load %arg10[%c64, %c0_36] : memref<576x384xbf16, #tpu.memory_space<vmem>>, vector<512x384xbf16>
    %c2_37 = arith.constant 2 : index
    %c0_38 = arith.constant 0 : index
    %c0_39 = arith.constant 0 : index
    %38 = vector.load %arg4[%c2_37, %c0_38, %c0_39] : memref<3x384x128xbf16, #tpu.memory_space<vmem>>, vector<1x384x128xbf16>
    %39 = vector.shape_cast %38 : vector<1x384x128xbf16> to vector<384x128xbf16>
    %cst_40 = arith.constant dense<0.000000e+00> : vector<512x128xf32>
    %40 = tpu.matmul %37, %39, %cst_40 {dimension_numbers = #tpu.dot_dimension_numbers<[1], [0], [0], [1], [0, 0, 1, 1], [], []>} : vector<512x384xbf16>, vector<384x128xbf16>, vector<512x128xf32> -> vector<512x128xf32>
    %41 = arith.addf %36, %40 : vector<512x128xf32>
    %c0_41 = arith.constant 0 : index
    %c0_42 = arith.constant 0 : index
    %42 = vector.load %arg5[%c0_41, %c0_42] : memref<1x128xf32, #tpu.memory_space<vmem>>, vector<1x128xf32>
    %43 = vector.broadcast %42 : vector<1x128xf32> to vector<512x128xf32>
    %44 = arith.addf %41, %43 : vector<512x128xf32>
    %cst_43 = arith.constant 0.000000e+00 : f32
    %45 = vector.broadcast %cst_43 : f32 to vector<512x128xf32>
    %46 = arith.maximumf %44, %45 : vector<512x128xf32>
    %47 = vector.shape_cast %46 : vector<512x128xf32> to vector<16x32x128xf32>
    %48 = vector.shape_cast %47 : vector<16x32x128xf32> to vector<8x2x32x128xf32>
    %cst_44 = arith.constant dense<0.000000e+00> : vector<8x32x128xf32>
    %49 = vector.multi_reduction <add>, %48, %cst_44 [1] : vector<8x2x32x128xf32> to vector<8x32x128xf32>
    %50 = vector.shape_cast %49 : vector<8x32x128xf32> to vector<8x16x2x128xf32>
    %cst_45 = arith.constant dense<0.000000e+00> : vector<8x16x128xf32>
    %51 = vector.multi_reduction <add>, %50, %cst_45 [2] : vector<8x16x2x128xf32> to vector<8x16x128xf32>
    %cst_46 = arith.constant 2.500000e-01 : f32
    %52 = vector.broadcast %cst_46 : f32 to vector<8x16x128xf32>
    %53 = arith.mulf %51, %52 : vector<8x16x128xf32>
    %54 = vector.extract_strided_slice %53 {offsets = [0, 0, 0], sizes = [8, 8, 128], strides = [1, 1, 1]} : vector<8x16x128xf32> to vector<8x8x128xf32>
    %55 = vector.shape_cast %54 : vector<8x8x128xf32> to vector<64x128xf32>
    %c0_47 = arith.constant 0 : index
    %c0_48 = arith.constant 0 : index
    %c0_49 = arith.constant 0 : index
    %c0_50 = arith.constant 0 : index
    %56 = vector.load %arg1[%c0_47, %c0_48, %c0_49, %c0_50] : memref<1x16x16x8xf32, #tpu.memory_space<vmem>>, vector<1x16x16x8xf32>
    %57 = vector.shape_cast %56 : vector<1x16x16x8xf32> to vector<16x16x8xf32>
    %58 = vector.shape_cast %57 : vector<16x16x8xf32> to vector<8x2x16x8xf32>
    %cst_51 = arith.constant dense<0.000000e+00> : vector<8x16x8xf32>
    %59 = vector.multi_reduction <add>, %58, %cst_51 [1] : vector<8x2x16x8xf32> to vector<8x16x8xf32>
    %60 = vector.shape_cast %59 : vector<8x16x8xf32> to vector<8x8x2x8xf32>
    %cst_52 = arith.constant dense<0.000000e+00> : vector<8x8x8xf32>
    %61 = vector.multi_reduction <add>, %60, %cst_52 [2] : vector<8x8x2x8xf32> to vector<8x8x8xf32>
    %cst_53 = arith.constant 2.500000e-01 : f32
    %62 = vector.broadcast %cst_53 : f32 to vector<8x8x8xf32>
    %63 = arith.mulf %61, %62 : vector<8x8x8xf32>
    %64 = vector.shape_cast %63 : vector<8x8x8xf32> to vector<64x8xf32>
    %65 = tpu.concatenate %55, %64 in 1 : vector<64x128xf32>, vector<64x8xf32> -> vector<64x136xf32>
    %66 = arith.truncf %65 : vector<64x136xf32> to vector<64x136xbf16>
    %c0_54 = arith.constant 0 : index
    %c0_55 = arith.constant 0 : index
    %67 = vector.load %arg6[%c0_54, %c0_55] : memref<136x128xbf16, #tpu.memory_space<vmem>>, vector<136x128xbf16>
    %cst_56 = arith.constant dense<0.000000e+00> : vector<64x128xf32>
    %68 = tpu.matmul %66, %67, %cst_56 {dimension_numbers = #tpu.dot_dimension_numbers<[1], [0], [0], [1], [0, 0, 1, 1], [], []>} : vector<64x136xbf16>, vector<136x128xbf16>, vector<64x128xf32> -> vector<64x128xf32>
    %c0_57 = arith.constant 0 : index
    %c0_58 = arith.constant 0 : index
    %69 = vector.load %arg7[%c0_57, %c0_58] : memref<1x128xf32, #tpu.memory_space<vmem>>, vector<1x128xf32>
    %70 = vector.broadcast %69 : vector<1x128xf32> to vector<64x128xf32>
    %71 = arith.addf %68, %70 : vector<64x128xf32>
    %cst_59 = arith.constant 0.000000e+00 : f32
    %72 = vector.broadcast %cst_59 : f32 to vector<64x128xf32>
    %73 = arith.maximumf %71, %72 : vector<64x128xf32>
    %c0_60 = arith.constant 0 : index
    %c0_61 = arith.constant 0 : index
    %c0_62 = arith.constant 0 : index
    %74 = vector.load %arg8[%c0_60, %c0_61, %c0_62] : memref<1x64x128xf32, #tpu.memory_space<vmem>>, vector<1x64x128xf32>
    %75 = vector.shape_cast %74 : vector<1x64x128xf32> to vector<64x128xf32>
    %76 = vector.shape_cast %73 : vector<64x128xf32> to vector<1x64x128xf32>
    tpu.vector_store %arg8[%c0_60, %c0_61, %c0_62], %76 {strides = array<i32>} : memref<1x64x128xf32, #tpu.memory_space<vmem>>, vector<1x64x128xf32>,
    return
  }
  func.func @transform_0(%arg0: i32) -> (i32, i32, i32, i32) {
    %c0_i32 = arith.constant 0 : i32
    %c0_i32_0 = arith.constant 0 : i32
    %c0_i32_1 = arith.constant 0 : i32
    %c0_i32_2 = arith.constant 0 : i32
    return %arg0, %c0_i32, %c0_i32_0, %c0_i32_1 : i32, i32, i32, i32
  }
  func.func @transform_1(%arg0: i32) -> (i32, i32) {
    %c0_i32 = arith.constant 0 : i32
    %c0_i32_0 = arith.constant 0 : i32
    %c0_i32_1 = arith.constant 0 : i32
    return %c0_i32, %c0_i32_0 : i32, i32
  }
  func.func @transform_2(%arg0: i32) -> (i32, i32) {
    %c0_i32 = arith.constant 0 : i32
    %c0_i32_0 = arith.constant 0 : i32
    %c0_i32_1 = arith.constant 0 : i32
    return %c0_i32, %c0_i32_0 : i32, i32
  }
  func.func @transform_3(%arg0: i32) -> (i32, i32, i32) {
    %c0_i32 = arith.constant 0 : i32
    %c0_i32_0 = arith.constant 0 : i32
    %c0_i32_1 = arith.constant 0 : i32
    %c0_i32_2 = arith.constant 0 : i32
    return %c0_i32, %c0_i32_0, %c0_i32_1 : i32, i32, i32
  }
  func.func @transform_4(%arg0: i32) -> (i32, i32) {
    %c0_i32 = arith.constant 0 : i32
    %c0_i32_0 = arith.constant 0 : i32
    %c0_i32_1 = arith.constant 0 : i32
    return %c0_i32, %c0_i32_0 : i32, i32
  }
  func.func @transform_5(%arg0: i32) -> (i32, i32) {
    %c0_i32 = arith.constant 0 : i32
    %c0_i32_0 = arith.constant 0 : i32
    %c0_i32_1 = arith.constant 0 : i32
    return %c0_i32, %c0_i32_0 : i32, i32
  }
  func.func @transform_6(%arg0: i32) -> (i32, i32) {
    %c0_i32 = arith.constant 0 : i32
    %c0_i32_0 = arith.constant 0 : i32
    %c0_i32_1 = arith.constant 0 : i32
    return %c0_i32, %c0_i32_0 : i32, i32
  }
  func.func @transform_7(%arg0: i32) -> (i32, i32, i32) {
    %c0_i32 = arith.constant 0 : i32
    %c0_i32_0 = arith.constant 0 : i32
    %c0_i32_1 = arith.constant 0 : i32
    return %arg0, %c0_i32, %c0_i32_0 : i32, i32, i32
  }
}

</mosaic_0001>

<bundles_post_ra>
// kernel: tpu_custom_call.1
= control target key start
LH: loop header
LB: loop body
LE: loop exit
PB: predicated region body
PF: predicated region fallthrough
CT: control target
= control target key end

     0   :  { %12 = vsyncpa [#allocation5], 0  ;;  %s9930_s0 = inlined_call_operand.vmem [shape: f32[2,16,16,8], index: 0, kind: input, shape index: {}]   ;;  %s9931_s1 = inlined_call_operand.vmem [shape: bf16[8,128], index: 1, kind: input, shape index: {}]   ;;  %s9932_s2 = inlined_call_operand.vmem [shape: f32[1,128], index: 2, kind: input, shape index: {}]   ;;  %s9933_s3 = inlined_call_operand.vmem [shape: bf16[3,384,128], index: 3, kind: input, shape index: {}]   ;;  %s9934_s4 = inlined_call_operand.vmem [shape: f32[1,128], index: 4, kind: input, shape index: {}]   ;;  %s9935_s5 = inlined_call_operand.vmem [shape: bf16[136,128], index: 5, kind: input, shape index: {}]   ;;  %s9936_s6 = inlined_call_operand.vmem [shape: f32[1,128], index: 6, kind: input, shape index: {}]   ;;  %s9937_s7 = inlined_call_operand.hbm [shape: f32[2,64,128], index: 7, kind: output, shape index: {}]  }
   0x1   :  { %14 = vsyncpa [#allocation5 + $0x1], 0  ;;  %s7201_s24 = smov 0   ;;  %s7203_s25 = smov 0  }
   0x2   :  { %s7205_s26 = smov 0   ;;  %s7207_s27 = smov 0  }
   0x3 LB: > { %s7222_s28 = sadd.s32 4294967295, %s7154_s27   ;;  %s6272_s29 = sadd.s32 4294967294, %s7154_s27   ;;  %s7154_s27 = sphi %s7207_s27, %s10220_s27   ;;  %s7150_s26 = sphi %s7205_s26, %s10219_s26   ;;  %s7146_s25 = sphi %s7203_s25, %s10218_s25   ;;  %s7142_s24 = sphi %s7201_s24, %s10217_s24  }
   0x4   : > { %s7226_s30 = sadd.s32 1, %s7154_s27   ;;  %s179_s8 = sadd.s32 1, %s7150_s26 }
   0x5   : > { %s176_s9 = ssub.s32 %s7154_s27, %s7226_s30  ;;  %p189_p0 = scmp.ne.s32.totalorder %s7150_s26, %s7146_s25 }
   0x6   : > { %p177_p1 = scmp.eq.s32.totalorder %s176_s9, 0  ;;  %p190_p2 = scmp.eq.s32.totalorder %s7222_s28, 1 }
   0x7   : > { %p195_p3 = scmp.ne.s32.totalorder %s7146_s25, %s7142_s24  ;;  %p196_p4 = scmp.eq.s32.totalorder %s6272_s29, 1 }
   0x8   : > { %s7237_s10 = scalar_select %p177_p1, %s7150_s26, %s179_s8  }
   0x9   : > { %p7239_p5 = por %p190_p2, %p189_p0  ;;  %p7243_p6 = por %p196_p4, %p195_p3 }
   0xa   : > { %p6275_p7 = scmp.ge.s32.totalorder %s7154_s27, 1  ;;  %p240_p8 = scmp.lt.s32.totalorder %s7154_s27, 3 }
   0xc   : > { %p241_p9 = pnand %p6275_p7, %p240_p8 }
   0xe   : > { %244 = sbr.rel (%p241_p9) target bundleno = 1509 (0x5e5), region = 48 }
  0x15   : > { %v326_v0 = vld [vmem:[%s9931_s1] sm:$0xf]  ;;  %vm383_vm0 = vcmask 1043456   ;;  %p272_p10 = scmp.lt.s32.totalorder %s7222_s28, 1  ;;  %v7156_v2 = vmov 0   ;;  %v6974_v4 = vld [vmem:[%s9933_s3 + $0xc8] sm:$0xff]  }
  0x16   : > { %6929 = vmatprep.subr.msk.bf16.mxu0 %vm383_vm0, %v326_v0  ;;  %v385_v1 = vsel %vm383_vm0, %v326_v0, 0  ;;  %601 = vst [vmem:[#allocation2 + $0x128] sm:$0xff] %v7156_v2  ;;  %596 = vst [vmem:[#allocation2] sm:$0xff] %v7156_v2  ;;  %v6973_v3 = vld [vmem:[%s9933_s3 + $0xc0] sm:$0xff]   ;;  %6897 = vmatprep.subr.bf16.mxu1 %v7156_v2  ;;  %vm334_vm1 = vcmask 64512   ;;  %v6975_v14 = vld [vmem:[%s9933_s3 + $0xd0] sm:$0xff]  }
  0x17   : > { %600 = vst [vmem:[#allocation2 + $0x120] sm:$0xff] %v7156_v2  ;;  %6624 = vmatpush3.bf16.msra.mxu0 %v385_v1  ;;  %s273_s17 = scalar_select %p272_p10, %s7222_s28, 1  ;;  %6913 = vmatpush1.bf16.msra.mxu1 %v6973_v3  ;;  %v6976_v20 = vld [vmem:[%s9933_s3 + $0xd8] sm:$0xff]   ;;  %v6977_v22 = vld [vmem:[%s9933_s3 + $0xe0] sm:$0xff]   ;;  %v6978_v27 = vld [vmem:[%s9933_s3 + $0xe8] sm:$0xff]   ;;  %vm746_vm2 = vcmask 1040384  }
  0x18   : > { %1850 = vmatprep.subr.bf16.mxu0 %v7156_v2  ;;  %6898 = vmatprep.subr.bf16.mxu1 %v7156_v2  ;;  %v6979_v30 = vld [vmem:[%s9933_s3 + $0xf0] sm:$0xff]   ;;  %v6980_v35 = vld [vmem:[%s9933_s3 + $0xf8] sm:$0xff]   ;;  %v6981_v59 = vld [vmem:[%s9933_s3 + $0x100] sm:$0xff]   ;;  %vm747_vm3 = vsmask.f32 256  ;;  %vm1361_vm6 = vcmask 1046528  }
  0x19   : > { %s6484_s18 = sshll.u32 %s273_s17, 8  ;;  %v6982_v60 = vld [vmem:[%s9933_s3 + $0x108] sm:$0xff]   ;;  %v6983_v61 = vld [vmem:[%s9933_s3 + $0x110] sm:$0xff]   ;;  %v6984_v62 = vld [vmem:[%s9933_s3 + $0x118] sm:$0xff]   ;;  %vm922_vm5 = vsmask.f32 7424 }
  0x1a   : > { %s7268_s21 = scalar_lea.vmem %s9930_s0, %s6484_s18  ;;  %v6985_v63 = vld [vmem:[%s9933_s3 + $0x120] sm:$0xff]   ;;  %v6986_v0 = vld [vmem:[%s9933_s3 + $0x128] sm:$0xff]   ;;  %v6987_v1 = vld [vmem:[%s9933_s3 + $0x130] sm:$0xff]   ;;  %vm5241_vm7 = vcmask 58368   ;;  %vm4296_vm8 = vcmask 1041408   ;;  %vm5818_vm9 = vcmask 1041409  }
  0x1b   : > { %v278_v5 = vld [vmem:[%s7268_s21] sm:$0xff]  ;;  %v279_v6 = vld [vmem:[%s7268_s21 + $0x8] sm:$0xff]  ;;  %v280_v7 = vld [vmem:[%s7268_s21 + $0x10] sm:$0xff]  ;;  %6914 = vmatpush1.bf16.msra.mxu1 %v6974_v4  ;;  %vm5820_vm10 = vcmask 1042434   ;;  %vm5822_vm11 = vcmask 1043459   ;;  %vm5824_vm12 = vcmask 1044484  }
  0x1c   : > { %v310_v8 = vpack.c.bf16 %v279_v6, %v278_v5  ;;  %v281_v9 = vld [vmem:[%s7268_s21 + $0x18] sm:$0xff]  ;;  %v282_v10 = vld [vmem:[%s7268_s21 + $0x20] sm:$0xff]  ;;  %v283_v11 = vld [vmem:[%s7268_s21 + $0x28] sm:$0xff]  ;;  %6899 = vmatprep.subr.bf16.mxu1 %v7156_v2  ;;  %vm5826_vm13 = vcmask 1045509   ;;  %vm5828_vm14 = vcmask 1046534   ;;  %vm5830_vm15 = vcmask 1047559  }
  0x1d   : > { %v311_v12 = vpack.c.bf16 %v281_v9, %v280_v7  ;;  %v312_v13 = vpack.c.bf16 %v283_v11, %v282_v10  ;;  %v284_v15 = vld [vmem:[%s7268_s21 + $0x30] sm:$0xff]  ;;  %v285_v16 = vld [vmem:[%s7268_s21 + $0x38] sm:$0xff]  ;;  %v286_v17 = vld [vmem:[%s7268_s21 + $0x40] sm:$0xff]  ;;  %s6485_s8 = sshll.u32 %s7222_s28, 10  ;;  %s7158_s17 = smov [#allocation4]  }
  0x1e   : > { %6625 = vmatprep.mubr.msk.bf16.mxu0 %vm334_vm1, %v310_v8  ;;  %v287_v18 = vld [vmem:[%s7268_s21 + $0x48] sm:$0xff]  ;;  %v313_v19 = vpack.c.bf16 %v285_v16, %v284_v15  ;;  %v288_v23 = vld [vmem:[%s7268_s21 + $0x50] sm:$0xff]  ;;  %v289_v24 = vld [vmem:[%s7268_s21 + $0x58] sm:$0xff]  ;;  %s9881_s15 = scalar_lea.hbm %s9937_s7, %s6485_s8  ;;  %s7096_s18 = sshll.u32 %s7158_s17, 4  ;;  %s7097_s18 = int_to_ptr.vmem [resolvable:$false] %s7096_s18 }
  0x1f   : > { %6626 = vmatmul.mubr.msk.bf16.vlgmr.msra.gmra.mrb[0].mxu0 %vm334_vm1, %v311_v12  ;;  %6915 = vmatpush1.bf16.msra.mxu1 %v6975_v14  ;;  %v314_v21 = vpack.c.bf16 %v287_v18, %v286_v17  ;;  %v290_v25 = vld [vmem:[%s7268_s21 + $0x60] sm:$0xff]  ;;  %v291_v26 = vld [vmem:[%s7268_s21 + $0x68] sm:$0xff]  ;;  %v315_v28 = vpack.c.bf16 %v289_v24, %v288_v23  ;;  %v292_v31 = vld [vmem:[%s7268_s21 + $0x70] sm:$0xff]  ;;  %s7098_s19 = scalar_lea.vmem %s7097_s18, 2048 }
  0x20   : > { %6629 = vmatprep.mubr.msk.bf16.mxu0 %vm334_vm1, %v312_v13  ;;  %1851 = vmatpush1.bf16.msra.mxu0 %v6973_v3  ;;  %v316_v29 = vpack.c.bf16 %v291_v26, %v290_v25  ;;  %v293_v32 = vld [vmem:[%s7268_s21 + $0x78] sm:$0xff]  ;;  %v294_v33 = vld [vmem:[%s7268_s21 + $0x80] sm:$0xff]  ;;  %v295_v34 = vld [vmem:[%s7268_s21 + $0x88] sm:$0xff] }
  0x21   : > { %1852 = vmatprep.subr.bf16.mxu0 %v7156_v2  ;;  %6900 = vmatprep.subr.bf16.mxu1 %v7156_v2  ;;  %v317_v36 = vpack.c.bf16 %v293_v32, %v292_v31  ;;  %v318_v37 = vpack.c.bf16 %v295_v34, %v294_v33  ;;  %v296_v38 = vld [vmem:[%s7268_s21 + $0x90] sm:$0xff]  ;;  %v297_v39 = vld [vmem:[%s7268_s21 + $0x98] sm:$0xff]  ;;  %v298_v40 = vld [vmem:[%s7268_s21 + $0xa0] sm:$0xff] }
  0x22   : > { %v299_v41 = vld [vmem:[%s7268_s21 + $0xa8] sm:$0xff]  ;;  %v319_v42 = vpack.c.bf16 %v297_v39, %v296_v38  ;;  %v300_v44 = vld [vmem:[%s7268_s21 + $0xb0] sm:$0xff]  ;;  %v301_v45 = vld [vmem:[%s7268_s21 + $0xb8] sm:$0xff] }
  0x23   : > { %6916 = vmatpush1.bf16.msra.mxu1 %v6976_v20  ;;  %v320_v43 = vpack.c.bf16 %v299_v41, %v298_v40  ;;  %v302_v46 = vld [vmem:[%s7268_s21 + $0xc0] sm:$0xff]  ;;  %v303_v47 = vld [vmem:[%s7268_s21 + $0xc8] sm:$0xff]  ;;  %v321_v48 = vpack.c.bf16 %v301_v45, %v300_v44  ;;  %v304_v50 = vld [vmem:[%s7268_s21 + $0xd0] sm:$0xff] }
  0x24   : > { %1853 = vmatpush1.bf16.msra.mxu0 %v6974_v4  ;;  %6901 = vmatprep.subr.bf16.mxu1 %v7156_v2  ;;  %v322_v49 = vpack.c.bf16 %v303_v47, %v302_v46  ;;  %v305_v51 = vld [vmem:[%s7268_s21 + $0xd8] sm:$0xff]  ;;  %v306_v52 = vld [vmem:[%s7268_s21 + $0xe0] sm:$0xff]  ;;  %v307_v53 = vld [vmem:[%s7268_s21 + $0xe8] sm:$0xff] }
  0x25   : > { %1854 = vmatprep.subr.bf16.mxu0 %v7156_v2  ;;  %v323_v54 = vpack.c.bf16 %v305_v51, %v304_v50  ;;  %v324_v55 = vpack.c.bf16 %v307_v53, %v306_v52  ;;  %v308_v56 = vld [vmem:[%s7268_s21 + $0xf0] sm:$0xff]  ;;  %v309_v57 = vld [vmem:[%s7268_s21 + $0xf8] sm:$0xff]  ;;  %v7395_v4 = vld [vmem:[%s9933_s3 + $0x140] sm:$0xff]  }
  0x26   : > { %v325_v58 = vpack.c.bf16 %v309_v57, %v308_v56  ;;  %v6988_v3 = vld [vmem:[%s9933_s3 + $0x138] sm:$0xff]   ;;  %v7400_v5 = vld [vmem:[%s9933_s3 + $0x80] sm:$0xff]   ;;  %vm7414_vm4 = vmand %vm746_vm2, %vm747_vm3 }
  0x27   : > { %6630 = vmatmul.mubr.msk.bf16.gmra.mrb[4].mxu0 %vm334_vm1, %v313_v19  ;;  %6917 = vmatpush1.bf16.msra.mxu1 %v6977_v22 }
  0x28   : > { %6633 = vmatprep.mubr.msk.bf16.mxu0 %vm334_vm1, %v314_v21  ;;  %1855 = vmatpush1.bf16.msra.mxu0 %v6975_v14 }
  0x29   : > { %1856 = vmatprep.subr.bf16.mxu0 %v7156_v2  ;;  %6902 = vmatprep.subr.bf16.mxu1 %v7156_v2 }
  0x2b   : > { %6918 = vmatpush1.bf16.msra.mxu1 %v6978_v27 }
  0x2c   : > { %1857 = vmatpush1.bf16.msra.mxu0 %v6976_v20  ;;  %6903 = vmatprep.subr.bf16.mxu1 %v7156_v2 }
  0x2d   : > { %1858 = vmatprep.subr.bf16.mxu0 %v7156_v2 }
  0x2f   : > { %6634 = vmatmul.mubr.msk.bf16.gmra.mrb[8].mxu0 %vm334_vm1, %v315_v28  ;;  %6919 = vmatpush1.bf16.msra.mxu1 %v6979_v30 }
  0x30   : > { %6637 = vmatprep.mubr.msk.bf16.mxu0 %vm334_vm1, %v316_v29  ;;  %1859 = vmatpush1.bf16.msra.mxu0 %v6977_v22 }
  0x31   : > { %1860 = vmatprep.subr.bf16.mxu0 %v7156_v2  ;;  %6904 = vmatprep.subr.bf16.mxu1 %v7156_v2 }
  0x33   : > { %6920 = vmatpush1.bf16.msra.mxu1 %v6980_v35 }
  0x34   : > { %1861 = vmatpush1.bf16.msra.mxu0 %v6978_v27  ;;  %6905 = vmatprep.subr.bf16.mxu1 %v7156_v2 }
  0x35   : > { %1862 = vmatprep.subr.bf16.mxu0 %v7156_v2 }
  0x37   : > { %6638 = vmatmul.mubr.msk.bf16.gmra.mrb[12].mxu0 %vm334_vm1, %v317_v36  ;;  %6921 = vmatpush1.bf16.msra.mxu1 %v6981_v59 }
  0x38   : > { %6641 = vmatprep.mubr.msk.bf16.mxu0 %vm334_vm1, %v318_v37  ;;  %1863 = vmatpush1.bf16.msra.mxu0 %v6979_v30 }
  0x39   : > { %1864 = vmatprep.subr.bf16.mxu0 %v7156_v2  ;;  %6906 = vmatprep.subr.bf16.mxu1 %v7156_v2 }
  0x3b   : > { %6922 = vmatpush1.bf16.msra.mxu1 %v6982_v60 }
  0x3c   : > { %1865 = vmatpush1.bf16.msra.mxu0 %v6980_v35  ;;  %6907 = vmatprep.subr.bf16.mxu1 %v7156_v2 }
  0x3d   : > { %1866 = vmatprep.subr.bf16.mxu0 %v7156_v2 }
  0x3f   : > { %6642 = vmatmul.mubr.msk.bf16.gmra.mrb[16].mxu0 %vm334_vm1, %v319_v42  ;;  %6923 = vmatpush1.bf16.msra.mxu1 %v6983_v61 }
  0x40   : > { %6645 = vmatprep.mubr.msk.bf16.mxu0 %vm334_vm1, %v320_v43  ;;  %1867 = vmatpush1.bf16.msra.mxu0 %v6981_v59 }
  0x41   : > { %1868 = vmatprep.subr.bf16.mxu0 %v7156_v2  ;;  %6908 = vmatprep.subr.bf16.mxu1 %v7156_v2 }
  0x43   : > { %6924 = vmatpush1.bf16.msra.mxu1 %v6984_v62 }
  0x44   : > { %1869 = vmatpush1.bf16.msra.mxu0 %v6982_v60  ;;  %6909 = vmatprep.subr.bf16.mxu1 %v7156_v2 }
  0x45   : > { %1870 = vmatprep.subr.bf16.mxu0 %v7156_v2 }
  0x47   : > { %6646 = vmatmul.mubr.msk.bf16.gmra.mrb[20].mxu0 %vm334_vm1, %v321_v48  ;;  %6925 = vmatpush1.bf16.msra.mxu1 %v6985_v63 }
  0x48   : > { %6649 = vmatprep.mubr.msk.bf16.mxu0 %vm334_vm1, %v322_v49  ;;  %1871 = vmatpush1.bf16.msra.mxu0 %v6983_v61 }
  0x49   : > { %1872 = vmatprep.subr.bf16.mxu0 %v7156_v2  ;;  %6910 = vmatprep.subr.bf16.mxu1 %v7156_v2 }
  0x4b   : > { %6926 = vmatpush1.bf16.msra.mxu1 %v6986_v0 }
  0x4c   : > { %1873 = vmatpush1.bf16.msra.mxu0 %v6984_v62  ;;  %6911 = vmatprep.subr.bf16.mxu1 %v7156_v2 }
  0x4d   : > { %1874 = vmatprep.subr.bf16.mxu0 %v7156_v2 }
  0x4f   : > { %6650 = vmatmul.mubr.msk.bf16.gmra.mrb[24].mxu0 %vm334_vm1, %v323_v54  ;;  %6927 = vmatpush1.bf16.msra.mxu1 %v6987_v1 }
  0x50   : > { %6653 = vmatprep.mubr.msk.bf16.mxu0 %vm334_vm1, %v324_v55  ;;  %1875 = vmatpush1.bf16.msra.mxu0 %v6985_v63 }
  0x51   : > { %1876 = vmatprep.subr.bf16.mxu0 %v7156_v2  ;;  %6912 = vmatprep.subr.bf16.mxu1 %v7156_v2 }
  0x53   : > { %6928 = vmatpush1.bf16.msra.mxu1 %v6988_v3 }
  0x54   : > { %1877 = vmatpush1.bf16.msra.mxu0 %v6986_v0  ;;  %6737 = vmatprep.subr.bf16.mxu1 %v7400_v5 }
  0x55   : > { %1878 = vmatprep.subr.bf16.mxu0 %v7156_v2 }
  0x57   : > { %6654 = vmatmul.mubr.msk.bf16.gmra.mrb[28].mxu0 %vm334_vm1, %v325_v58 }
  0x58   : > { %1879 = vmatpush1.bf16.msra.mxu0 %v6987_v1 }
  0x59   : > { %1880 = vmatprep.subr.bf16.mxu0 %v7156_v2  ;;  %v7407_v2 = vld [vmem:[%s9932_s2] ss:$0 sm:$0xff] }
  0x5c   : > { %1881 = vmatpush1.bf16.msra.mxu0 %v6988_v3 }
  0x5d   : > { %6657 = vmatprep.subr.bf16.mxu0 %v7395_v4 }
  0xf2   : > { %v6627_v6 = vpop.f32.mrb[0].mxu0 }
  0xf3   : > { %v430_v7 = vadd.f32 %v6627_v6, %v7407_v2  ;;  %v421_v8 = vpop.f32.mrb[1].mxu0 }
  0xf4   : > { %v422_v9 = vadd.f32 %v7407_v2, %v421_v8  ;;  %v6628_v10 = vpop.f32.mrb[2].mxu0 }
  0xf5   : > { %v433_v11 = vadd.f32 %v6628_v10, %v7407_v2  ;;  %v424_v12 = vpop.f32.mrb[3].mxu0  ;;  %v550_v14 = vmax.f32 %v430_v7, 0.0 }
  0xf6   : > { %v425_v13 = vadd.f32 %v7407_v2, %v424_v12  ;;  %v548_v16 = vmax.f32 %v422_v9, 0.0 }
  0xf7   : > { %v551_v15 = vmax.f32 %v433_v11, 0.0 }
  0xf8   : > { %v549_v17 = vmax.f32 %v425_v13, 0.0 }
  0xf9   : > { %v581_v18 = vpack.c.bf16 %v551_v15, %v550_v14 }
  0xfa   : > { %v580_v19 = vpack.c.bf16 %v549_v17, %v548_v16  ;;  %v6631_v20 = vpop.f32.mrb[4].mxu0 }
  0xfb   : > { %v610_v21 = vshrl.u32 %v581_v18, 16  ;;  %v446_v22 = vadd.f32 %v6631_v20, %v7407_v2  ;;  %v437_v23 = vpop.f32.mrb[5].mxu0  ;;  %v613_v29 = vshll.u32 %v581_v18, 16 }
  0xfc   : > { %v603_v25 = vshrl.u32 %v580_v19, 16  ;;  %v438_v26 = vadd.f32 %v7407_v2, %v437_v23  ;;  %v6632_v27 = vpop.f32.mrb[6].mxu0  ;;  %v606_v33 = vshll.u32 %v580_v19, 16  ;;  %v6991_v23 = vld [vmem:[%s9933_s3 + $0x148] sm:$0xff]  }
  0xfd   : > { %v612_v28 = vrot.slane %v610_v21, 7  ;;  %v449_v30 = vadd.f32 %v6632_v27, %v7407_v2  ;;  %v440_v31 = vpop.f32.mrb[7].mxu0  ;;  %v554_v34 = vmax.f32 %v446_v22, 0.0 }
  0xfe   : > { %v605_v32 = vrot.slane %v603_v25, 7  ;;  %v441_v35 = vadd.f32 %v7407_v2, %v440_v31  ;;  %v552_v38 = vmax.f32 %v438_v26, 0.0 }
  0xff   : > { %v615_v36 = vor.u32 %v613_v29, %v612_v28  ;;  %v7423_v37 = vsel %vm7414_vm4, %v612_v28, 0  ;;  %v555_v39 = vmax.f32 %v449_v30, 0.0 }
 0x100   : > { %784 = vst [vmem:[#allocation2 + $0x28] sm:$0xff] %v7423_v37  ;;  %v608_v40 = vor.u32 %v606_v33, %v605_v32  ;;  %v7428_v41 = vsel %vm7414_vm4, %v605_v32, 0  ;;  %v553_v42 = vmax.f32 %v441_v35, 0.0  ;;  %v963_v43 = vshll.u32 %v7423_v37, 16 }
 0x101   : > { %v7433_v44 = vsel %vm7414_vm4, 0, %v615_v36  ;;  %782 = vst [vmem:[#allocation2 + $0x18] sm:$0xff] %v7428_v41  ;;  %v583_v45 = vpack.c.bf16 %v555_v39, %v554_v34  ;;  %v947_v46 = vshll.u32 %v7428_v41, 16  ;;  %v951_v47 = vshrl.u32 %v7428_v41, 16 }
 0x102   : > { %783 = vst [vmem:[#allocation2 + $0x20] sm:$0xff] %v7433_v44  ;;  %v7441_v48 = vsel %vm7414_vm4, 0, %v608_v40  ;;  %v582_v49 = vpack.c.bf16 %v553_v42, %v552_v38  ;;  %v6635_v50 = vpop.f32.mrb[8].mxu0  ;;  %v955_v51 = vshll.u32 %v7433_v44, 16  ;;  %v959_v52 = vshrl.u32 %v7433_v44, 16 }
 0x103   : > { %781 = vst [vmem:[#allocation2 + $0x10] sm:$0xff] %v7441_v48  ;;  %v624_v53 = vshrl.u32 %v583_v45, 16  ;;  %v627_v54 = vshll.u32 %v583_v45, 16  ;;  %v462_v55 = vadd.f32 %v6635_v50, %v7407_v2  ;;  %v453_v56 = vpop.f32.mrb[9].mxu0  ;;  %v939_v57 = vshll.u32 %v7441_v48, 16  ;;  %v6992_v50 = vld [vmem:[%s9933_s3 + $0x150] sm:$0xff]  }
 0x104   : > { %v617_v58 = vshrl.u32 %v582_v49, 16  ;;  %v620_v59 = vshll.u32 %v582_v49, 16  ;;  %v454_v60 = vadd.f32 %v7407_v2, %v453_v56  ;;  %v6636_v61 = vpop.f32.mrb[10].mxu0  ;;  %v943_v62 = vshrl.u32 %v7441_v48, 16 }
 0x105   : > { %v626_v63 = vrot.slane %v624_v53, 7  ;;  %v558_v0 = vmax.f32 %v462_v55, 0.0  ;;  %v465_v1 = vadd.f32 %v6636_v61, %v7407_v2  ;;  %v456_v3 = vpop.f32.mrb[11].mxu0  ;;  %v7451_v6 = vrot.slane %v939_v57, 1 }
 0x106   : > { %v619_v7 = vrot.slane %v617_v58, 7  ;;  %v556_v8 = vmax.f32 %v454_v60, 0.0  ;;  %v457_v9 = vadd.f32 %v7407_v2, %v456_v3  ;;  %v949_v10 = vrot.slane %v947_v46, 1 }
 0x107   : > { %v629_v11 = vor.u32 %v627_v54, %v626_v63  ;;  %v7456_v12 = vsel %vm7414_vm4, %v626_v63, 0  ;;  %v559_v13 = vmax.f32 %v465_v1, 0.0  ;;  %v945_v14 = vor.u32 %v943_v62, %v7451_v6 }
 0x108   : > { %788 = vst [vmem:[#allocation2 + $0x48] sm:$0xff] %v7456_v12  ;;  %v622_v15 = vor.u32 %v620_v59, %v619_v7  ;;  %v7462_v16 = vsel %vm7414_vm4, %v619_v7, 0  ;;  %v557_v17 = vmax.f32 %v457_v9, 0.0  ;;  %v953_v18 = vor.u32 %v951_v47, %v949_v10  ;;  %v6993_v7 = vld [vmem:[%s9933_s3 + $0x158] sm:$0xff]  }
 0x109   : > { %v7466_v19 = vsel %vm7414_vm4, 0, %v629_v11  ;;  %786 = vst [vmem:[#allocation2 + $0x38] sm:$0xff] %v7462_v16  ;;  %v585_v20 = vpack.c.bf16 %v559_v13, %v558_v0  ;;  %v7470_v21 = vsel %vm922_vm5, %v945_v14, %v949_v10  ;;  %v957_v22 = vrot.slane %v955_v51, 1 }
 0x10a   : > { %787 = vst [vmem:[#allocation2 + $0x40] sm:$0xff] %v7466_v19  ;;  %v7478_v25 = vsel %vm7414_vm4, 0, %v622_v15  ;;  %v584_v26 = vpack.c.bf16 %v557_v17, %v556_v8  ;;  %v6639_v27 = vpop.f32.mrb[12].mxu0  ;;  %1882 = vmatprep.mubr.bf16.mxu0 %v7470_v21  ;;  %v979_v28 = vshll.u32 %v7462_v16, 16  ;;  %v983_v29 = vshrl.u32 %v7462_v16, 16  ;;  %v6997_v8 = vld [vmem:[%s9933_s3 + $0x88] sm:$0xff]  }
 0x10b   : > { %785 = vst [vmem:[#allocation2 + $0x30] sm:$0xff] %v7478_v25  ;;  %v638_v30 = vshrl.u32 %v585_v20, 16  ;;  %v641_v31 = vshll.u32 %v585_v20, 16  ;;  %v478_v32 = vadd.f32 %v6639_v27, %v7407_v2  ;;  %v469_v33 = vpop.f32.mrb[13].mxu0  ;;  %1883 = vmatmul.mubr.bf16.vlgmr.msra.gmra.mrb[32].mxu0 %v7441_v48  ;;  %v7487_v34 = vsel %vm922_vm5, %v953_v18, %v957_v22 }
 0x10c   : > { %v631_v35 = vshrl.u32 %v584_v26, 16  ;;  %v634_v36 = vshll.u32 %v584_v26, 16  ;;  %v470_v38 = vadd.f32 %v7407_v2, %v469_v33  ;;  %v6640_v39 = vpop.f32.mrb[14].mxu0  ;;  %1890 = vmatprep.mubr.bf16.mxu0 %v7487_v34  ;;  %v7491_v40 = vrot.slane %v979_v28, 1  ;;  %6658 = vmatpush3.bf16.msra.mxu0 %v7395_v4 }
 0x10d   : > { %v640_v42 = vrot.slane %v638_v30, 7  ;;  %v562_v45 = vmax.f32 %v478_v32, 0.0  ;;  %v481_v46 = vadd.f32 %v6640_v39, %v7407_v2  ;;  %v472_v47 = vpop.f32.mrb[15].mxu0  ;;  %v987_v49 = vshll.u32 %v7466_v19, 16  ;;  %6659 = vmatprep.subr.bf16.mxu0 %v6991_v23  ;;  %v6994_v32 = vld [vmem:[%s9933_s3 + $0x160] sm:$0xff]  }
 0x10e   : > { %v633_v51 = vrot.slane %v631_v35, 7  ;;  %v560_v53 = vmax.f32 %v470_v38, 0.0  ;;  %v473_v54 = vadd.f32 %v7407_v2, %v472_v47  ;;  %v985_v55 = vor.u32 %v983_v29, %v7491_v40 }
 0x10f   : > { %v643_v56 = vor.u32 %v641_v31, %v640_v42  ;;  %v7503_v4 = vsel %vm7414_vm4, %v640_v42, 0  ;;  %v563_v57 = vmax.f32 %v481_v46, 0.0  ;;  %v989_v58 = vrot.slane %v987_v49, 1 }
 0x110   : > { %792 = vst [vmem:[#allocation2 + $0x68] sm:$0xff] %v7503_v4  ;;  %v636_v59 = vor.u32 %v634_v36, %v633_v51  ;;  %v7508_v60 = vsel %vm7414_vm4, %v633_v51, 0  ;;  %v561_v61 = vmax.f32 %v473_v54, 0.0  ;;  %v991_v62 = vshrl.u32 %v7466_v19, 16  ;;  %6660 = vmatpush3.bf16.msra.mxu0 %v6991_v23 }
 0x111   : > { %v7513_v63 = vsel %vm7414_vm4, 0, %v643_v56  ;;  %790 = vst [vmem:[#allocation2 + $0x58] sm:$0xff] %v7508_v60  ;;  %v587_v0 = vpack.c.bf16 %v563_v57, %v562_v45  ;;  %v7517_v1 = vsel %vm922_vm5, %v985_v55, %v989_v58  ;;  %v995_v3 = vshll.u32 %v7456_v12, 16  ;;  %6661 = vmatprep.subr.bf16.mxu0 %v6992_v50 }
 0x112   : > { %791 = vst [vmem:[#allocation2 + $0x60] sm:$0xff] %v7513_v63  ;;  %v7529_v9 = vsel %vm7414_vm4, 0, %v636_v59  ;;  %v586_v10 = vpack.c.bf16 %v561_v61, %v560_v53  ;;  %1918 = vmatprep.mubr.bf16.mxu1 %v7517_v1  ;;  %v993_v11 = vor.u32 %v991_v62, %v989_v58  ;;  %v961_v13 = vor.u32 %v959_v52, %v957_v22  ;;  %v6643_v14 = vpop.f32.mrb[16].mxu0  ;;  %v6995_v61 = vld [vmem:[%s9933_s3 + $0x168] sm:$0xff]  }
 0x113   : > { %789 = vst [vmem:[#allocation2 + $0x50] sm:$0xff] %v7529_v9  ;;  %v652_v15 = vshrl.u32 %v587_v0, 16  ;;  %v655_v17 = vshll.u32 %v587_v0, 16  ;;  %1919 = vmatmul.mubr.bf16.vlgmr.msra.gmra.mrb[0].mxu1 %v7462_v16  ;;  %v997_v18 = vrot.slane %v995_v3, 1  ;;  %1891 = vmatmul.mubr.bf16.gmra.mrb[36].mxu0 %v7428_v41  ;;  %v965_v20 = vrot.slane %v963_v43, 1  ;;  %v485_v23 = vpop.f32.mrb[17].mxu0 }
 0x114   : > { %v645_v26 = vshrl.u32 %v586_v10, 16  ;;  %v648_v27 = vshll.u32 %v586_v10, 16  ;;  %6738 = vmatpush3.bf16.msra.mxu1 %v7400_v5  ;;  %v1003_v52 = vshll.u32 %v7529_v9, 16  ;;  %6662 = vmatpush3.bf16.msra.mxu0 %v6992_v50  ;;  %v6644_v22 = vpop.f32.mrb[18].mxu0  ;;  %v999_v31 = vshrl.u32 %v7456_v12, 16  ;;  %v6999_v5 = vld [vmem:[%s9933_s3 + $0x90] sm:$0xff]  }
 0x115   : > { %v654_v28 = vrot.slane %v652_v15, 7  ;;  %v7542_v29 = vsel %vm922_vm5, %v993_v11, %v997_v18  ;;  %v7545_v30 = vsel %vm922_vm5, %v961_v13, %v965_v20  ;;  %6663 = vmatprep.subr.bf16.mxu0 %v6993_v7  ;;  %v488_v43 = vpop.f32.mrb[19].mxu0  ;;  %6739 = vmatprep.subr.bf16.mxu1 %v6997_v8  ;;  %v967_v36 = vshrl.u32 %v7423_v37, 16  ;;  %v7001_v0 = vld [vmem:[%s9933_s3 + $0x98] sm:$0xff]  }
 0x116   : > { %v647_v33 = vrot.slane %v645_v26, 7  ;;  %1924 = vmatprep.mubr.bf16.mxu1 %v7542_v29  ;;  %1896 = vmatprep.mubr.bf16.mxu0 %v7545_v30  ;;  %v1005_v35 = vrot.slane %v1003_v52, 1  ;;  %v971_v38 = vshll.u32 %v7478_v25, 16  ;;  %v1001_v45 = vor.u32 %v999_v31, %v997_v18  ;;  %v6996_v26 = vld [vmem:[%s9933_s3 + $0x170] sm:$0xff]  }
 0x117   : > { %v657_v39 = vor.u32 %v655_v17, %v654_v28  ;;  %v7560_v42 = vsel %vm7414_vm4, %v654_v28, 0  ;;  %v494_v46 = vadd.f32 %v6643_v14, %v7407_v2  ;;  %v969_v50 = vor.u32 %v967_v36, %v965_v20 }
 0x118   : > { %796 = vst [vmem:[#allocation2 + $0x88] sm:$0xff] %v7560_v42  ;;  %v650_v47 = vor.u32 %v648_v27, %v647_v33  ;;  %v7566_v49 = vsel %vm7414_vm4, %v647_v33, 0  ;;  %v973_v51 = vrot.slane %v971_v38, 1  ;;  %6664 = vmatpush3.bf16.msra.mxu0 %v6993_v7  ;;  %6740 = vmatpush3.bf16.msra.mxu1 %v6997_v8  ;;  %v486_v55 = vadd.f32 %v7407_v2, %v485_v23  ;;  %v7005_v27 = vld [vmem:[%s9933_s3 + $0xa0] sm:$0xff]  }
 0x119   : > { %v7570_v53 = vsel %vm7414_vm4, 0, %v657_v39  ;;  %794 = vst [vmem:[#allocation2 + $0x78] sm:$0xff] %v7566_v49  ;;  %v566_v54 = vmax.f32 %v494_v46, 0.0  ;;  %v497_v56 = vadd.f32 %v6644_v22, %v7407_v2  ;;  %6665 = vmatprep.subr.bf16.mxu0 %v6994_v32  ;;  %6741 = vmatprep.subr.bf16.mxu1 %v6999_v5  ;;  %v7581_v58 = vsel %vm922_vm5, %v1001_v45, %v1005_v35  ;;  %v6998_v39 = vld [vmem:[%s9933_s3 + $0x178] sm:$0xff]  }
 0x11a   : > { %795 = vst [vmem:[#allocation2 + $0x80] sm:$0xff] %v7570_v53  ;;  %v7578_v57 = vsel %vm7414_vm4, 0, %v650_v47  ;;  %v489_v59 = vadd.f32 %v7407_v2, %v488_v43  ;;  %v7587_v62 = vpop.f32.mrb[20].mxu0  ;;  %v7596_v3 = vsel %vm922_vm5, %v969_v50, %v973_v51  ;;  %v564_v7 = vmax.f32 %v486_v55, 0.0 }
 0x11b   : > { %793 = vst [vmem:[#allocation2 + $0x70] sm:$0xff] %v7578_v57  ;;  %1925 = vmatmul.mubr.bf16.gmra.mrb[4].mxu1 %v7466_v19  ;;  %1897 = vmatmul.mubr.bf16.gmra.mrb[40].mxu0 %v7433_v44  ;;  %v567_v8 = vmax.f32 %v497_v56, 0.0  ;;  %v1007_v10 = vshrl.u32 %v7529_v9, 16  ;;  %v501_v11 = vpop.f32.mrb[21].mxu0  ;;  %v1011_v17 = vshll.u32 %v7508_v60, 16  ;;  %v975_v18 = vshrl.u32 %v7478_v25, 16 }
 0x11c   : > { %1932 = vmatprep.mubr.bf16.mxu1 %v7581_v58  ;;  %1904 = vmatprep.mubr.bf16.mxu0 %v7596_v3  ;;  %v565_v13 = vmax.f32 %v489_v59, 0.0  ;;  %v6648_v14 = vpop.f32.mrb[22].mxu0  ;;  %v1015_v38 = vshrl.u32 %v7508_v60, 16 }
 0x11d   : > { %v589_v15 = vpack.c.bf16 %v567_v8, %v566_v54  ;;  %6666 = vmatpush3.bf16.msra.mxu0 %v6994_v32  ;;  %v504_v20 = vpop.f32.mrb[23].mxu0  ;;  %6742 = vmatpush3.bf16.msra.mxu1 %v6999_v5  ;;  %v1009_v28 = vor.u32 %v1007_v10, %v1005_v35  ;;  %v977_v31 = vor.u32 %v975_v18, %v973_v51  ;;  %v1013_v36 = vrot.slane %v1011_v17, 1  ;;  %v7011_v35 = vld [vmem:[%s9933_s3 + $0xa8] sm:$0xff]  }
 0x11e   : > { %v588_v23 = vpack.c.bf16 %v565_v13, %v564_v7  ;;  %6667 = vmatprep.subr.bf16.mxu0 %v6995_v61  ;;  %6743 = vmatprep.subr.bf16.mxu1 %v7001_v0  ;;  %v9938_v8 = vrot.slane %v7441_v48, 1  ;;  %v510_v10 = vadd.f32 %v7587_v62, %v7407_v2  ;;  %v513_v17 = vadd.f32 %v6648_v14, %v7407_v2 }
 0x11f   : > { %v666_v52 = vshrl.u32 %v589_v15, 16  ;;  %v669_v22 = vshll.u32 %v589_v15, 16  ;;  %v7624_v50 = vsel %vm922_vm5, %v1009_v28, %v1013_v36  ;;  %v7629_v51 = vsel %vm922_vm5, %v977_v31, %v7491_v40  ;;  %v7668_v31 = vld [vmem:[#allocation2 + $0x128] sm:$0xff] }
 0x120   : > { %v659_v43 = vshrl.u32 %v588_v23, 16  ;;  %v662_v33 = vshll.u32 %v588_v23, 16  ;;  %v1019_v40 = vshll.u32 %v7513_v63, 16  ;;  %v1017_v13 = vor.u32 %v1015_v38, %v1013_v36 }
 0x121   : > { %v668_v32 = vrot.slane %v666_v52, 7  ;;  %6668 = vmatpush3.bf16.msra.mxu0 %v6995_v61  ;;  %6744 = vmatpush3.bf16.msra.mxu1 %v7001_v0  ;;  %v502_v15 = vadd.f32 %v7407_v2, %v501_v11  ;;  %v505_v18 = vadd.f32 %v7407_v2, %v504_v20  ;;  %v1367_v23 = vrot.slane %v7428_v41, 1 }
 0x122   : > { %v661_v5 = vrot.slane %v659_v43, 7  ;;  %6669 = vmatprep.subr.bf16.mxu0 %v6996_v26  ;;  %v7613_v45 = vpop.f32.mrb[24].mxu0  ;;  %6745 = vmatprep.subr.bf16.mxu1 %v7005_v27  ;;  %v1023_v14 = vshrl.u32 %v7513_v63, 16 }
 0x123   : > { %v671_v46 = vor.u32 %v669_v22, %v668_v32  ;;  %v7620_v47 = vsel %vm7414_vm4, %v668_v32, 0  ;;  %1933 = vmatmul.mubr.bf16.gmra.mrb[8].mxu1 %v7456_v12  ;;  %1905 = vmatmul.mubr.bf16.gmra.mrb[44].mxu0 %v7423_v37  ;;  %v7631_v54 = vpop.f32.mrb[25].mxu0  ;;  %v568_v52 = vmax.f32 %v502_v15, 0.0  ;;  %v571_v22 = vmax.f32 %v513_v17, 0.0 }
 0x124   : > { %800 = vst [vmem:[#allocation2 + $0xa8] sm:$0xff] %v7620_v47  ;;  %v664_v55 = vor.u32 %v662_v33, %v661_v5  ;;  %v7636_v56 = vsel %vm7414_vm4, %v661_v5, 0  ;;  %1938 = vmatprep.mubr.bf16.mxu1 %v7624_v50  ;;  %1910 = vmatprep.mubr.bf16.mxu0 %v7629_v51  ;;  %v7640_v59 = vpop.f32.mrb[26].mxu0  ;;  %v569_v28 = vmax.f32 %v505_v18, 0.0  ;;  %v7666_v62 = vsel %vm1361_vm6, %v9938_v8, %v1367_v23 }
 0x125   : > { %v7644_v61 = vsel %vm7414_vm4, 0, %v671_v46  ;;  %798 = vst [vmem:[#allocation2 + $0x98] sm:$0xff] %v7636_v56  ;;  %6670 = vmatpush3.bf16.msra.mxu0 %v6996_v26  ;;  %v7648_v0 = vpop.f32.mrb[27].mxu0  ;;  %6746 = vmatpush3.bf16.msra.mxu1 %v7005_v27  ;;  %v570_v26 = vmax.f32 %v510_v10, 0.0  ;;  %v1021_v27 = vrot.slane %v1019_v40, 1  ;;  %v1027_v32 = vshll.u32 %v7503_v4, 16 }
 0x126   : > { %799 = vst [vmem:[#allocation2 + $0xa0] sm:$0xff] %v7644_v61  ;;  %v7653_v7 = vsel %vm7414_vm4, 0, %v664_v55  ;;  %6671 = vmatprep.subr.bf16.mxu0 %v6998_v39  ;;  %6747 = vmatprep.subr.bf16.mxu1 %v7011_v35  ;;  %v590_v43 = vpack.c.bf16 %v569_v28, %v568_v52  ;;  %v1369_v55 = vrot.slane %v7433_v44, 1  ;;  %v1371_v17 = vrot.slane %v7423_v37, 1  ;;  %v7000_v44 = vld [vmem:[%s9933_s3] sm:$0xff]  }
 0x127   : > { %797 = vst [vmem:[#allocation2 + $0x90] sm:$0xff] %v7653_v7  ;;  %v7675_v41 = vsel %vm922_vm5, %v1017_v13, %v1021_v27  ;;  %v591_v20 = vpack.c.bf16 %v571_v22, %v570_v26  ;;  %v1025_v40 = vor.u32 %v1023_v14, %v1021_v27  ;;  %v1029_v15 = vrot.slane %v1027_v32, 1 }
 0x128   : > { %v7702_v27 = vsel %vm1361_vm6, %v1367_v23, %v1369_v55  ;;  %v1035_v28 = vshll.u32 %v7578_v57, 16  ;;  %v7713_v14 = vsel %vm1361_vm6, %v1369_v55, %v1371_v17  ;;  %v526_v32 = vadd.f32 %v7613_v45, %v7407_v2 }
 0x129   : > { %6672 = vmatpush3.bf16.msra.mxu0 %v6998_v39  ;;  %6748 = vmatpush3.bf16.msra.mxu1 %v7011_v35  ;;  %v680_v5 = vshrl.u32 %v591_v20, 16  ;;  %v683_v38 = vshll.u32 %v591_v20, 16  ;;  %v673_v39 = vshrl.u32 %v590_v43, 16  ;;  %v676_v35 = vshll.u32 %v590_v43, 16  ;;  %10011 = vst [vmem:[#allocation7_spill] sm:$0xff] %v7713_v14 }
 0x12a   : > { %2508 = vmatprep.subr.bf16.mxu0 %v7668_v31  ;;  %v7671_v11 = vpop.f32.mrb[28].mxu0  ;;  %v7709_v37 = vsel %vm922_vm5, %v1025_v40, %v1029_v15  ;;  %v1031_v43 = vshrl.u32 %v7503_v4, 16  ;;  %v1037_v55 = vrot.slane %v1035_v28, 1  ;;  %v1373_v40 = vrot.slane %v7478_v25, 1 }
 0x12b   : > { %1939 = vmatmul.mubr.bf16.gmra.mrb[12].mxu1 %v7529_v9  ;;  %1911 = vmatmul.mubr.bf16.gmra.mrb[48].mxu0 %v7478_v25  ;;  %v7679_v33 = vpop.f32.mrb[29].mxu0  ;;  %v682_v10 = vrot.slane %v680_v5, 7  ;;  %v675_v13 = vrot.slane %v673_v39, 7  ;;  %v7019_v5 = vld [vmem:[%s9933_s3 + $0xb0] sm:$0xff]   ;;  %v529_v39 = vadd.f32 %v7640_v59, %v7407_v2  ;;  %v521_v45 = vadd.f32 %v7407_v2, %v7648_v0 }
 0x12c   : > { %1946 = vmatprep.mubr.bf16.mxu1 %v7675_v41  ;;  %6673 = vmatprep.mubr.bf16.mxu0 %v7666_v62  ;;  %v7684_v36 = vpop.f32.mrb[30].mxu0  ;;  %v7003_v25 = vld [vmem:[%s9933_s3 + $0x10] sm:$0xff]   ;;  %v7752_v0 = vsel %vm1361_vm6, %v1371_v17, %v1373_v40 }
 0x12d   : > { %v7686_v46 = vpop.f32.mrb[31].mxu0  ;;  %v685_v18 = vor.u32 %v683_v38, %v682_v10  ;;  %v7692_v26 = vsel %vm7414_vm4, %v682_v10, 0  ;;  %v678_v52 = vor.u32 %v676_v35, %v675_v13  ;;  %v7696_v22 = vsel %vm7414_vm4, %v675_v13, 0  ;;  %v7002_v35 = vld [vmem:[%s9933_s3 + $0x8] sm:$0xff]   ;;  %6749 = vmatprep.subr.bf16.mxu1 %v7019_v5  ;;  %10012 = vst [vmem:[#allocation8_spill] sm:$0xff] %v7752_v0 }
 0x12e   : > { %804 = vst [vmem:[#allocation2 + $0xc8] sm:$0xff] %v7692_v26  ;;  %802 = vst [vmem:[#allocation2 + $0xb8] sm:$0xff] %v7696_v22  ;;  %v518_v38 = vadd.f32 %v7407_v2, %v7631_v54  ;;  %v574_v10 = vmax.f32 %v526_v32, 0.0  ;;  %v575_v54 = vmax.f32 %v529_v39, 0.0  ;;  %6750 = vmatpush3.bf16.msra.mxu1 %v7019_v5  ;;  %v573_v59 = vmax.f32 %v521_v45, 0.0 }
 0x12f   : > { %v7717_v23 = vsel %vm7414_vm4, 0, %v685_v18  ;;  %v7721_v20 = vsel %vm7414_vm4, 0, %v678_v52  ;;  %v1033_v18 = vor.u32 %v1031_v43, %v1029_v15  ;;  %v1375_v52 = vrot.slane %v7462_v16, 1 }
 0x130   : > { %803 = vst [vmem:[#allocation2 + $0xc0] sm:$0xff] %v7717_v23  ;;  %801 = vst [vmem:[#allocation2 + $0xb0] sm:$0xff] %v7721_v20  ;;  %v572_v13 = vmax.f32 %v518_v38, 0.0  ;;  %v1039_v15 = vshrl.u32 %v7578_v57, 16  ;;  %v1043_v39 = vshll.u32 %v7566_v49, 16 }
 0x131   : > { %v7749_v28 = vsel %vm922_vm5, %v1033_v18, %v1037_v55  ;;  %v7758_v16 = vsel %vm1361_vm6, %v1373_v40, %v1375_v52  ;;  %v1377_v40 = vrot.slane %v7466_v19, 1 }
 0x132   : > { %v592_v32 = vpack.c.bf16 %v573_v59, %v572_v13  ;;  %10013 = vst [vmem:[#allocation9_spill] sm:$0xff] %v7758_v16  ;;  %v1041_v13 = vor.u32 %v1039_v15, %v1037_v55  ;;  %v7006_v55 = vld [vmem:[%s9933_s3 + $0x20] sm:$0xff]  }
 0x133   : > { %1947 = vmatmul.mubr.bf16.gmra.mrb[16].mxu1 %v7508_v60  ;;  %6674 = vmatmul.mubr.bf16.vlgmr.msra.gmra.mrb[52].mxu0 %v7702_v27  ;;  %v7788_v15 = vsel %vm1361_vm6, %v1375_v52, %v1377_v40 }
 0x134   : > { %1952 = vmatprep.mubr.bf16.mxu1 %v7709_v37  ;;  %6677 = vmatprep.mubr.bf16.mxu0 %v7713_v14  ;;  %v687_v17 = vshrl.u32 %v592_v32, 16  ;;  %v690_v38 = vshll.u32 %v592_v32, 16  ;;  %v1379_v32 = vrot.slane %v7456_v12, 1  ;;  %10014 = vst [vmem:[#allocation10_spill] sm:$0xff] %v7788_v15 }
 0x135   : > { %2509 = vmatpush1.bf16.msra.mxu0 %v7000_v44  ;;  %v593_v44 = vpack.c.bf16 %v575_v54, %v574_v10  ;;  %v7004_v10 = vld [vmem:[%s9933_s3 + $0x18] sm:$0xff]  }
 0x136   : > { %2510 = vmatprep.subr.bf16.mxu0 %v7668_v31  ;;  %v689_v45 = vrot.slane %v687_v17, 7  ;;  %v7803_v52 = vsel %vm1361_vm6, %v1377_v40, %v1379_v32  ;;  %v542_v17 = vadd.f32 %v7671_v11, %v7407_v2  ;;  %v537_v40 = vadd.f32 %v7407_v2, %v7686_v46  ;;  %v7007_v11 = vld [vmem:[%s9933_s3 + $0x28] sm:$0xff]  }
 0x137   : > { %v694_v43 = vshrl.u32 %v593_v44, 16  ;;  %v697_v5 = vshll.u32 %v593_v44, 16  ;;  %10016 = vst [vmem:[#allocation12_spill] sm:$0xff] %v7803_v52 }
 0x138   : > { %v692_v59 = vor.u32 %v690_v38, %v689_v45  ;;  %v7776_v44 = vsel %vm7414_vm4, %v689_v45, 0  ;;  %v1051_v38 = vshll.u32 %v7570_v53, 16 }
 0x139   : > { %2511 = vmatpush1.bf16.msra.mxu0 %v7002_v35  ;;  %v696_v35 = vrot.slane %v694_v43, 7  ;;  %806 = vst [vmem:[#allocation2 + $0xd8] sm:$0xff] %v7776_v44  ;;  %v1047_v43 = vshrl.u32 %v7566_v49, 16 }
 0x13a   : > { %2512 = vmatprep.subr.bf16.mxu0 %v7668_v31  ;;  %v7794_v12 = vsel %vm7414_vm4, 0, %v692_v59  ;;  %v1053_v8 = vrot.slane %v1051_v38, 1 }
 0x13b   : > { %1953 = vmatmul.mubr.bf16.gmra.mrb[20].mxu1 %v7513_v63  ;;  %6678 = vmatmul.mubr.bf16.gmra.mrb[56].mxu0 %v7752_v0  ;;  %v699_v54 = vor.u32 %v697_v5, %v696_v35  ;;  %v7771_v18 = vsel %vm7414_vm4, %v696_v35, 0  ;;  %805 = vst [vmem:[#allocation2 + $0xd0] sm:$0xff] %v7794_v12  ;;  %v578_v35 = vmax.f32 %v542_v17, 0.0  ;;  %v577_v17 = vmax.f32 %v537_v40, 0.0 }
 0x13c   : > { %1960 = vmatprep.mubr.bf16.mxu1 %v7749_v28  ;;  %6681 = vmatprep.mubr.bf16.mxu0 %v7758_v16  ;;  %808 = vst [vmem:[#allocation2 + $0xe8] sm:$0xff] %v7771_v18 }
 0x13d   : > { %2513 = vmatpush1.bf16.msra.mxu0 %v7003_v25  ;;  %v1045_v25 = vrot.slane %v1043_v39, 1  ;;  %v7781_v19 = vsel %vm7414_vm4, 0, %v699_v54  ;;  %v534_v39 = vadd.f32 %v7407_v2, %v7679_v33  ;;  %v1383_v54 = vrot.slane %v7508_v60, 1 }
 0x13e   : > { %2514 = vmatprep.subr.bf16.mxu0 %v7668_v31  ;;  %807 = vst [vmem:[#allocation2 + $0xe0] sm:$0xff] %v7781_v19 }
 0x13f   : > { %v7799_v5 = vsel %vm922_vm5, %v1041_v13, %v1045_v25  ;;  %v1049_v45 = vor.u32 %v1047_v43, %v1045_v25  ;;  %v1381_v13 = vrot.slane %v7529_v9, 1  ;;  %v576_v59 = vmax.f32 %v534_v39, 0.0 }
 0x140   : > { %10015 = vst [vmem:[#allocation11_spill] sm:$0xff] %v7799_v5  ;;  %v1055_v25 = vshrl.u32 %v7570_v53, 16 }
 0x141   : > { %2515 = vmatpush1.bf16.msra.mxu0 %v7004_v10  ;;  %v545_v10 = vadd.f32 %v7684_v36, %v7407_v2  ;;  %v7008_v2 = vld [vmem:[%s9933_s3 + $0x30] sm:$0xff]   ;;  %v7827_v46 = vsel %vm922_vm5, %v1049_v45, %v1053_v8  ;;  %v7830_v9 = vsel %vm1361_vm6, %v1379_v32, %v1381_v13  ;;  %v7833_v60 = vsel %vm1361_vm6, %v1381_v13, %v1383_v54  ;;  %v7020_v32 = vld [vmem:[%s9933_s3 + $0xb8] sm:$0xff]  }
 0x142   : > { %2516 = vmatprep.subr.bf16.mxu0 %v7668_v31  ;;  %10017 = vst [vmem:[#allocation13_spill] sm:$0xff] %v7827_v46  ;;  %10018 = vst [vmem:[#allocation14_spill] sm:$0xff] %v7830_v9  ;;  %v1057_v45 = vor.u32 %v1055_v25, %v1053_v8  ;;  %v1387_v13 = vrot.slane %v7503_v4, 1  ;;  %6751 = vmatprep.subr.bf16.mxu1 %v7020_v32 }
 0x143   : > { %1961 = vmatmul.mubr.bf16.gmra.mrb[24].mxu1 %v7503_v4  ;;  %6682 = vmatmul.mubr.bf16.gmra.mrb[60].mxu0 %v7788_v15  ;;  %v579_v33 = vmax.f32 %v545_v10, 0.0  ;;  %10019 = vst [vmem:[#allocation15_spill] sm:$0xff] %v7833_v60 }
 0x144   : > { %1966 = vmatprep.mubr.bf16.mxu1 %v7799_v5  ;;  %6685 = vmatprep.mubr.bf16.mxu0 %v7803_v52  ;;  %v594_v5 = vpack.c.bf16 %v577_v17, %v576_v59 }
 0x145   : > { %2517 = vmatpush1.bf16.msra.mxu0 %v7006_v55  ;;  %v595_v36 = vpack.c.bf16 %v579_v33, %v578_v35  ;;  %v1059_v35 = vshll.u32 %v7560_v42, 16  ;;  %6752 = vmatpush3.bf16.msra.mxu1 %v7020_v32 }
 0x146   : > { %2518 = vmatprep.subr.bf16.mxu0 %v7668_v31  ;;  %v701_v38 = vshrl.u32 %v594_v5, 16  ;;  %v704_v39 = vshll.u32 %v594_v5, 16  ;;  %v1385_v5 = vrot.slane %v7513_v63, 1  ;;  %3311 = vmatprep.subr.bf16.mxu1 %v7668_v31 }
 0x147   : > { %v708_v55 = vshrl.u32 %v595_v36, 16  ;;  %v711_v43 = vshll.u32 %v595_v36, 16  ;;  %v1061_v4 = vrot.slane %v1059_v35, 1 }
 0x148   : > { %v703_v40 = vrot.slane %v701_v38, 7  ;;  %v7874_v25 = vsel %vm1361_vm6, %v1383_v54, %v1385_v5  ;;  %v1067_v54 = vshll.u32 %v7653_v7, 16  ;;  %v7012_v38 = vld [vmem:[%s9933_s3 + $0x48] sm:$0xff]  }
 0x149   : > { %2519 = vmatpush1.bf16.msra.mxu0 %v7007_v11  ;;  %v710_v10 = vrot.slane %v708_v55, 7  ;;  %v7009_v11 = vld [vmem:[%s9933_s3 + $0x38] sm:$0xff]   ;;  %10020 = vst [vmem:[#allocation16_spill] sm:$0xff] %v7874_v25  ;;  %v7881_v24 = vsel %vm922_vm5, %v1057_v45, %v1061_v4  ;;  %v7885_v55 = vsel %vm1361_vm6, %v1385_v5, %v1387_v13  ;;  %v1075_v5 = vshll.u32 %v7636_v56, 16 }
 0x14a   : > { %2520 = vmatprep.subr.bf16.mxu0 %v7668_v31  ;;  %v706_v17 = vor.u32 %v704_v39, %v703_v40  ;;  %v7857_v36 = vsel %vm7414_vm4, %v703_v40, 0  ;;  %10021 = vst [vmem:[#allocation17_spill] sm:$0xff] %v7885_v55  ;;  %v1389_v39 = vrot.slane %v7578_v57, 1  ;;  %v1069_v35 = vrot.slane %v1067_v54, 1  ;;  %v7013_v40 = vld [vmem:[%s9933_s3 + $0x50] sm:$0xff]  }
 0x14b   : > { %1967 = vmatmul.mubr.bf16.gmra.mrb[28].mxu1 %v7578_v57  ;;  %6686 = vmatmul.mubr.bf16.gmra.mrb[64].mxu0 %v7830_v9  ;;  %v713_v59 = vor.u32 %v711_v43, %v710_v10  ;;  %v7853_v33 = vsel %vm7414_vm4, %v710_v10, 0  ;;  %810 = vst [vmem:[#allocation2 + $0xf8] sm:$0xff] %v7857_v36  ;;  %v1063_v43 = vshrl.u32 %v7560_v42, 16  ;;  %v1391_v10 = vrot.slane %v7566_v49, 1 }
 0x14c   : > { %1974 = vmatprep.mubr.bf16.mxu1 %v7827_v46  ;;  %6689 = vmatprep.mubr.bf16.mxu0 %v7833_v60  ;;  %812 = vst [vmem:[#allocation2 + $0x108] sm:$0xff] %v7853_v33  ;;  %v7868_v8 = vsel %vm7414_vm4, 0, %v706_v17 }
 0x14d   : > { %2521 = vmatpush1.bf16.msra.mxu0 %v7008_v2  ;;  %v7864_v63 = vsel %vm7414_vm4, 0, %v713_v59  ;;  %v7010_v2 = vld [vmem:[%s9933_s3 + $0x40] sm:$0xff]   ;;  %809 = vst [vmem:[#allocation2 + $0xf0] sm:$0xff] %v7868_v8  ;;  %v1065_v32 = vor.u32 %v1063_v43, %v1061_v4  ;;  %v7910_v45 = vsel %vm1361_vm6, %v1389_v39, %v1391_v10  ;;  %v1393_v59 = vrot.slane %v7570_v53, 1 }
 0x14e   : > { %2522 = vmatprep.subr.bf16.mxu0 %v7668_v31  ;;  %811 = vst [vmem:[#allocation2 + $0x100] sm:$0xff] %v7864_v63  ;;  %10023 = vst [vmem:[#allocation19_spill] sm:$0xff] %v7910_v45  ;;  %v1395_v4 = vrot.slane %v7560_v42, 1  ;;  %v7015_v43 = vld [vmem:[%s9933_s3 + $0x60] sm:$0xff]  }
 0x14f   : > { %v7906_v57 = vsel %vm922_vm5, %v1065_v32, %v1069_v35  ;;  %v7926_v54 = vsel %vm1361_vm6, %v1391_v10, %v1393_v59  ;;  %v1083_v32 = vshll.u32 %v7644_v61, 16 }
 0x150   : > { %10024 = vst [vmem:[#allocation20_spill] sm:$0xff] %v7926_v54 }
 0x151   : > { %2523 = vmatpush1.bf16.msra.mxu0 %v7009_v11  ;;  %v7901_v11 = vsel %vm1361_vm6, %v1387_v13, %v1389_v39  ;;  %v7014_v13 = vld [vmem:[%s9933_s3 + $0x58] sm:$0xff]   ;;  %v1079_v39 = vshrl.u32 %v7636_v56, 16 }
 0x152   : > { %2524 = vmatprep.subr.bf16.mxu0 %v7668_v31  ;;  %10022 = vst [vmem:[#allocation18_spill] sm:$0xff] %v7901_v11 }
 0x153   : > { %1975 = vmatmul.mubr.bf16.gmra.mrb[32].mxu1 %v7566_v49  ;;  %6690 = vmatmul.mubr.bf16.gmra.mrb[68].mxu0 %v7874_v25  ;;  %v1071_v49 = vshrl.u32 %v7653_v7, 16 }
 0x154   : > { %1980 = vmatprep.mubr.bf16.mxu1 %v7881_v24  ;;  %6693 = vmatprep.mubr.bf16.mxu0 %v7885_v55 }
 0x155   : > { %2525 = vmatpush1.bf16.msra.mxu0 %v7010_v2  ;;  %v1073_v17 = vor.u32 %v1071_v49, %v1069_v35  ;;  %v1077_v2 = vrot.slane %v1075_v5, 1  ;;  %v1397_v35 = vrot.slane %v7653_v7, 1  ;;  %v1085_v49 = vrot.slane %v1083_v32, 1  ;;  %v7017_v5 = vld [vmem:[%s9933_s3 + $0x70] sm:$0xff]  }
 0x156   : > { %2526 = vmatprep.subr.bf16.mxu0 %v7668_v31 }
 0x157   : > { %v1081_v10 = vor.u32 %v1079_v39, %v1077_v2  ;;  %v7974_v39 = vld [vmem:[%s9933_s3 + $0x200] sm:$0xff]  }
 0x159   : > { %2527 = vmatpush1.bf16.msra.mxu0 %v7012_v38  ;;  %v7935_v38 = vsel %vm1361_vm6, %v1393_v59, %v1395_v4  ;;  %v7956_v59 = vsel %vm922_vm5, %v1081_v10, %v1085_v49 }
 0x15a   : > { %2528 = vmatprep.subr.bf16.mxu0 %v7668_v31  ;;  %10026 = vst [vmem:[#allocation22_spill] sm:$0xff] %v7935_v38  ;;  %10028 = vst [vmem:[#allocation24_spill] sm:$0xff] %v7956_v59 }
 0x15b   : > { %1981 = vmatmul.mubr.bf16.gmra.mrb[36].mxu1 %v7570_v53  ;;  %6694 = vmatmul.mubr.bf16.gmra.mrb[72].mxu0 %v7901_v11  ;;  %v7931_v53 = vsel %vm922_vm5, %v1073_v17, %v1077_v2  ;;  %v1087_v2 = vshrl.u32 %v7644_v61, 16 }
 0x15c   : > { %1988 = vmatprep.mubr.bf16.mxu1 %v7906_v57  ;;  %6697 = vmatprep.mubr.bf16.mxu0 %v7910_v45  ;;  %10025 = vst [vmem:[#allocation21_spill] sm:$0xff] %v7931_v53 }
 0x15d   : > { %2529 = vmatpush1.bf16.msra.mxu0 %v7013_v40  ;;  %v1399_v40 = vrot.slane %v7636_v56, 1  ;;  %v1089_v32 = vor.u32 %v1087_v2, %v1085_v49  ;;  %v1095_v49 = vshrl.u32 %v7620_v47, 16  ;;  %v1099_v2 = vshll.u32 %v7721_v20, 16 }
 0x15e   : > { %2530 = vmatprep.subr.bf16.mxu0 %v7668_v31 }
 0x15f   : > { %v7960_v17 = vsel %vm1361_vm6, %v1397_v35, %v1399_v40 }
 0x160   : > { %10029 = vst [vmem:[#allocation25_spill] sm:$0xff] %v7960_v17 }
 0x161   : > { %2531 = vmatpush1.bf16.msra.mxu0 %v7014_v13  ;;  %v7951_v13 = vsel %vm1361_vm6, %v1395_v4, %v1397_v35  ;;  %v1091_v4 = vshll.u32 %v7620_v47, 16 }
 0x162   : > { %2532 = vmatprep.subr.bf16.mxu0 %v7668_v31  ;;  %10027 = vst [vmem:[#allocation23_spill] sm:$0xff] %v7951_v13 }
 0x163   : > { %1989 = vmatmul.mubr.bf16.gmra.mrb[40].mxu1 %v7560_v42  ;;  %6698 = vmatmul.mubr.bf16.gmra.mrb[76].mxu0 %v7926_v54  ;;  %v7016_v42 = vld [vmem:[%s9933_s3 + $0x68] sm:$0xff]   ;;  %v1093_v35 = vrot.slane %v1091_v4, 1 }
 0x164   : > { %1994 = vmatprep.mubr.bf16.mxu1 %v7931_v53  ;;  %6701 = vmatprep.mubr.bf16.mxu0 %v7935_v38  ;;  %v1103_v53 = vshrl.u32 %v7721_v20, 16 }
 0x165   : > { %2533 = vmatpush1.bf16.msra.mxu0 %v7015_v43  ;;  %v1401_v43 = vrot.slane %v7644_v61, 1  ;;  %v1097_v4 = vor.u32 %v1095_v49, %v1093_v35 }
 0x166   : > { %2534 = vmatprep.subr.bf16.mxu0 %v7668_v31 }
 0x167   : > { %v7978_v10 = vsel %vm1361_vm6, %v1399_v40, %v1401_v43  ;;  %v1405_v40 = vrot.slane %v7721_v20, 1 }
 0x168   : > { %10030 = vst [vmem:[#allocation26_spill] sm:$0xff] %v7978_v10 }
 0x169   : > { %2535 = vmatpush1.bf16.msra.mxu0 %v7016_v42  ;;  %v1403_v42 = vrot.slane %v7620_v47, 1 }
 0x16a   : > { %2536 = vmatprep.subr.bf16.mxu0 %v7668_v31 }
 0x16b   : > { %1995 = vmatmul.mubr.bf16.gmra.mrb[44].mxu1 %v7653_v7  ;;  %6702 = vmatmul.mubr.bf16.gmra.mrb[80].mxu0 %v7951_v13  ;;  %v7018_v7 = vld [vmem:[%s9933_s3 + $0x78] sm:$0xff]  }
 0x16c   : > { %2002 = vmatprep.mubr.bf16.mxu1 %v7956_v59  ;;  %6705 = vmatprep.mubr.bf16.mxu0 %v7960_v17  ;;  %v7987_v59 = vsel %vm1361_vm6, %v1401_v43, %v1403_v42 }
 0x16d   : > { %2537 = vmatpush1.bf16.msra.mxu0 %v7017_v5  ;;  %v7983_v5 = vsel %vm922_vm5, %v1089_v32, %v1093_v35  ;;  %10032 = vst [vmem:[#allocation28_spill] sm:$0xff] %v7987_v59  ;;  %v7996_v32 = vsel %vm1361_vm6, %v1403_v42, %v1405_v40  ;;  %v1107_v35 = vshll.u32 %v7696_v22, 16  ;;  %v1409_v42 = vrot.slane %v7717_v23, 1 }
 0x16e   : > { %2538 = vmatprep.subr.bf16.mxu0 %v7668_v31  ;;  %10031 = vst [vmem:[#allocation27_spill] sm:$0xff] %v7983_v5  ;;  %10033 = vst [vmem:[#allocation29_spill] sm:$0xff] %v7996_v32 }
 0x171   : > { %2539 = vmatpush1.bf16.msra.mxu0 %v7018_v7  ;;  %v1407_v7 = vrot.slane %v7696_v22, 1 }
 0x172   : > { %6817 = vmatprep.subr.bf16.mxu0 %v7974_v39 }
 0x173   : > { %2003 = vmatmul.mubr.bf16.gmra.mrb[48].mxu1 %v7636_v56  ;;  %6706 = vmatmul.mubr.bf16.gmra.mrb[84].mxu0 %v7978_v10  ;;  %v1101_v56 = vrot.slane %v1099_v2, 1  ;;  %v1109_v2 = vrot.slane %v1107_v35, 1 }
 0x174   : > { %2008 = vmatprep.mubr.bf16.mxu1 %v7983_v5  ;;  %6709 = vmatprep.mubr.bf16.mxu0 %v7987_v59  ;;  %v8004_v5 = vsel %vm1361_vm6, %v1405_v40, %v1407_v7 }
 0x175   : > { %v8000_v43 = vsel %vm922_vm5, %v1097_v4, %v1101_v56  ;;  %10035 = vst [vmem:[#allocation31_spill] sm:$0xff] %v8004_v5  ;;  %v1105_v49 = vor.u32 %v1103_v53, %v1101_v56  ;;  %v8013_v4 = vsel %vm1361_vm6, %v1407_v7, %v1409_v42  ;;  %v1115_v53 = vshll.u32 %v7717_v23, 16 }
 0x176   : > { %10034 = vst [vmem:[#allocation30_spill] sm:$0xff] %v8000_v43  ;;  %10036 = vst [vmem:[#allocation32_spill] sm:$0xff] %v8013_v4  ;;  %v1415_v56 = vrot.slane %v7776_v44, 1 }
 0x177   : > { %v8017_v40 = vsel %vm922_vm5, %v1105_v49, %v1109_v2  ;;  %v1117_v35 = vrot.slane %v1115_v53, 1 }
 0x178   : > { %10037 = vst [vmem:[#allocation33_spill] sm:$0xff] %v8017_v40 }
 0x17b   : > { %2009 = vmatmul.mubr.bf16.gmra.mrb[52].mxu1 %v7644_v61  ;;  %6710 = vmatmul.mubr.bf16.gmra.mrb[88].mxu0 %v7996_v32  ;;  %v1411_v61 = vrot.slane %v7692_v26, 1 }
 0x17c   : > { %2016 = vmatprep.mubr.bf16.mxu1 %v8000_v43  ;;  %6713 = vmatprep.mubr.bf16.mxu0 %v8004_v5  ;;  %v1111_v5 = vshrl.u32 %v7696_v22, 16 }
 0x17d   : > { %v8021_v43 = vsel %vm1361_vm6, %v1409_v42, %v1411_v61 }
 0x17e   : > { %10038 = vst [vmem:[#allocation34_spill] sm:$0xff] %v8021_v43  ;;  %v1113_v7 = vor.u32 %v1111_v5, %v1109_v2  ;;  %v1417_v5 = vrot.slane %v7781_v19, 1  ;;  %v1123_v2 = vshll.u32 %v7692_v26, 16 }
 0x183   : > { %2017 = vmatmul.mubr.bf16.gmra.mrb[56].mxu1 %v7620_v47  ;;  %6714 = vmatmul.mubr.bf16.gmra.mrb[92].mxu0 %v8013_v4  ;;  %v1413_v47 = vrot.slane %v7794_v12, 1 }
 0x184   : > { %2022 = vmatprep.mubr.bf16.mxu1 %v8017_v40  ;;  %6717 = vmatprep.mubr.bf16.mxu0 %v8021_v43  ;;  %v8037_v40 = vsel %vm922_vm5, %v1113_v7, %v1117_v35  ;;  %v1119_v43 = vshrl.u32 %v7717_v23, 16 }
 0x185   : > { %v8030_v49 = vsel %vm1361_vm6, %v1413_v47, %v1415_v56  ;;  %v8033_v42 = vsel %vm1361_vm6, %v1411_v61, %v1413_v47  ;;  %10041 = vst [vmem:[#allocation37_spill] sm:$0xff] %v8037_v40  ;;  %v1419_v61 = vrot.slane %v7771_v18, 1  ;;  %v1125_v47 = vrot.slane %v1123_v2, 1 }
 0x186   : > { %10039 = vst [vmem:[#allocation35_spill] sm:$0xff] %v8030_v49  ;;  %10040 = vst [vmem:[#allocation36_spill] sm:$0xff] %v8033_v42  ;;  %v1121_v53 = vor.u32 %v1119_v43, %v1117_v35  ;;  %v1423_v43 = vrot.slane %v7857_v36, 1 }
 0x187   : > { %v8050_v7 = vsel %vm1361_vm6, %v1417_v5, %v1419_v61 }
 0x188   : > { %10043 = vst [vmem:[#allocation39_spill] sm:$0xff] %v8050_v7 }
 0x18b   : > { %2023 = vmatmul.mubr.bf16.gmra.mrb[60].mxu1 %v7721_v20  ;;  %6718 = vmatmul.mubr.bf16.gmra.mrb[96].mxu0 %v8033_v42  ;;  %v8047_v20 = vsel %vm1361_vm6, %v1415_v56, %v1417_v5  ;;  %v1131_v42 = vshll.u32 %v7794_v12, 16  ;;  %v1421_v56 = vrot.slane %v7868_v8, 1 }
 0x18c   : > { %2030 = vmatprep.mubr.bf16.mxu1 %v8037_v40  ;;  %6721 = vmatprep.mubr.bf16.mxu0 %v8030_v49  ;;  %10042 = vst [vmem:[#allocation38_spill] sm:$0xff] %v8047_v20  ;;  %v8054_v40 = vsel %vm922_vm5, %v1121_v53, %v1125_v47  ;;  %v1127_v49 = vshrl.u32 %v7692_v26, 16 }
 0x18d   : > { %10044 = vst [vmem:[#allocation40_spill] sm:$0xff] %v8054_v40  ;;  %v1133_v5 = vrot.slane %v1131_v42, 1  ;;  %v8067_v2 = vsel %vm1361_vm6, %v1419_v61, %v1421_v56  ;;  %v1139_v42 = vshll.u32 %v7776_v44, 16  ;;  %v1427_v61 = vrot.slane %v7853_v33, 1 }
 0x18e   : > { %v1129_v35 = vor.u32 %v1127_v49, %v1125_v47  ;;  %10046 = vst [vmem:[#allocation42_spill] sm:$0xff] %v8067_v2  ;;  %v1425_v49 = vrot.slane %v7864_v63, 1 }
 0x190   : > { %v8071_v53 = vsel %vm922_vm5, %v1129_v35, %v1133_v5  ;;  %v1141_v35 = vrot.slane %v1139_v42, 1 }
 0x191   : > { %10047 = vst [vmem:[#allocation43_spill] sm:$0xff] %v8071_v53 }
 0x193   : > { %2031 = vmatmul.mubr.bf16.gmra.mrb[64].mxu1 %v7696_v22  ;;  %6722 = vmatmul.mubr.bf16.gmra.mrb[100].mxu0 %v8047_v20  ;;  %v8064_v22 = vsel %vm1361_vm6, %v1421_v56, %v1423_v43  ;;  %v8082_v56 = vsel %vm1361_vm6, %v1423_v43, %v1425_v49  ;;  %v1147_v43 = vshll.u32 %v7781_v19, 16 }
 0x194   : > { %2036 = vmatprep.mubr.bf16.mxu1 %v8054_v40  ;;  %6725 = vmatprep.mubr.bf16.mxu0 %v8050_v7  ;;  %10045 = vst [vmem:[#allocation41_spill] sm:$0xff] %v8064_v22  ;;  %v1135_v40 = vshrl.u32 %v7794_v12, 16  ;;  %10048 = vst [vmem:[#allocation44_spill] sm:$0xff] %v8082_v56 }
 0x196   : > { %v1137_v47 = vor.u32 %v1135_v40, %v1133_v5  ;;  %v924_v40 = vshrl.u32 %v7668_v31, 16 }
 0x19b   : > { %2037 = vmatmul.mubr.bf16.gmra.mrb[68].mxu1 %v7717_v23  ;;  %6726 = vmatmul.mubr.bf16.gmra.mrb[104].mxu0 %v8067_v2  ;;  %v926_v23 = vshll.u32 %v7668_v31, 16  ;;  %v8085_v2 = vsel %vm1361_vm6, %v1425_v49, %v1427_v61 }
 0x19c   : > { %2044 = vmatprep.mubr.bf16.mxu1 %v8071_v53  ;;  %6729 = vmatprep.mubr.bf16.mxu0 %v8064_v22  ;;  %10049 = vst [vmem:[#allocation45_spill] sm:$0xff] %v8085_v2  ;;  %v8089_v53 = vsel %vm922_vm5, %v1137_v47, %v1141_v35  ;;  %v1143_v22 = vshrl.u32 %v7776_v44, 16 }
 0x19d   : > { %v8094_v5 = vrot.slane %v926_v23, 1 }
 0x19e   : > { %v1145_v42 = vor.u32 %v1143_v22, %v1141_v35  ;;  %v1155_v22 = vshll.u32 %v7771_v18, 16 }
 0x19f   : > { %10050 = vst [vmem:[#allocation46_spill] sm:$0xff] %v8094_v5  ;;  %v929_v49 = vor.u32 %v8094_v5, %v924_v40  ;;  %v1151_v40 = vshrl.u32 %v7781_v19, 16 }
 0x1a0   : > { %v1157_v35 = vrot.slane %v1155_v22, 1 }
 0x1a1   : > { %v934_v23 = vsel %vm922_vm5, %v929_v49, %v8094_v5 }
 0x1a3   : > { %2045 = vmatmul.mubr.bf16.gmra.mrb[72].mxu1 %v7692_v26  ;;  %6730 = vmatmul.mubr.bf16.gmra.mrb[108].mxu0 %v8082_v56  ;;  %v8101_v26 = vrot.slane %v7668_v31, 1  ;;  %v1149_v56 = vrot.slane %v1147_v43, 1  ;;  %v7025_v43 = vld [vmem:[%s9933_s3 + $0x208] sm:$0xff]  }
 0x1a4   : > { %2050 = vmatprep.mubr.bf16.mxu1 %v8089_v53  ;;  %6733 = vmatprep.mubr.bf16.mxu0 %v8085_v2 }
 0x1a5   : > { %10051 = vst [vmem:[#allocation47_spill] sm:$0xff] %v8101_v26  ;;  %v8105_v47 = vsel %vm1361_vm6, %v1427_v61, %v8101_v26  ;;  %v8111_v2 = vsel %vm922_vm5, %v1145_v42, %v1149_v56  ;;  %v1153_v61 = vor.u32 %v1151_v40, %v1149_v56  ;;  %v942_v42 = vsel %vm922_vm5, %v929_v49, %v7451_v6 }
 0x1a6   : > { %10052 = vst [vmem:[#allocation48_spill] sm:$0xff] %v8105_v47  ;;  %v1167_v49 = vshrl.u32 %v7868_v8, 16 }
 0x1ab   : > { %2051 = vmatmul.mubr.bf16.gmra.mrb[76].mxu1 %v7794_v12  ;;  %6734 = vmatmul.mubr.bf16.gmra.mrb[112].mxu0 %v8105_v47  ;;  %v8122_v12 = vsel %vm922_vm5, %v1153_v61, %v1157_v35  ;;  %v1163_v47 = vshll.u32 %v7868_v8, 16 }
 0x1ac   : > { %2058 = vmatprep.mubr.bf16.mxu1 %v8111_v2  ;;  %2540 = vmatprep.mubr.bf16.mxu0 %v934_v23  ;;  %v1159_v23 = vshrl.u32 %v7771_v18, 16 }
 0x1ad   : > { %v1165_v40 = vrot.slane %v1163_v47, 1 }
 0x1ae   : > { %v1161_v56 = vor.u32 %v1159_v23, %v1157_v35  ;;  %v7055_v35 = vld [vmem:[#allocation2 + $0x10] sm:$0xff] }
 0x1af   : > { %v1169_v22 = vor.u32 %v1167_v49, %v1165_v40 }
 0x1b0   : > { %v8136_v6 = vsel %vm922_vm5, %v1161_v56, %v1165_v40  ;;  %v1183_v56 = vshrl.u32 %v7864_v63, 16 }
 0x1b3   : > { %2059 = vmatmul.mubr.bf16.gmra.mrb[80].mxu1 %v7776_v44  ;;  %2541 = vmatmul.mubr.bf16.vlgmr.msra.gmra.mrb[116].mxu0 %v7668_v31  ;;  %v7030_v44 = vld [vmem:[%s9933_s3 + $0x210] sm:$0xff]  }
 0x1b4   : > { %2064 = vmatprep.mubr.bf16.mxu1 %v8122_v12  ;;  %2548 = vmatprep.mubr.bf16.mxu0 %v942_v42 }
 0x1b5   : > { %6818 = vmatpush3.bf16.msra.mxu0 %v7974_v39  ;;  %v1171_v39 = vshll.u32 %v7857_v36, 16 }
 0x1b6   : > { %6819 = vmatprep.subr.bf16.mxu0 %v7025_v43 }
 0x1b7   : > { %v1173_v47 = vrot.slane %v1171_v39, 1 }
 0x1b9   : > { %6820 = vmatpush3.bf16.msra.mxu0 %v7025_v43  ;;  %v8148_v61 = vsel %vm922_vm5, %v1169_v22, %v1173_v47  ;;  %v1175_v43 = vshrl.u32 %v7857_v36, 16  ;;  %v1191_v22 = vshrl.u32 %v7853_v33, 16 }
 0x1ba   : > { %6821 = vmatprep.subr.bf16.mxu0 %v7030_v44 }
 0x1bb   : > { %2065 = vmatmul.mubr.bf16.gmra.mrb[84].mxu1 %v7781_v19  ;;  %2549 = vmatmul.mubr.bf16.gmra.mrb[120].mxu0 %v7668_v31  ;;  %v7035_v19 = vld [vmem:[%s9933_s3 + $0x218] sm:$0xff]   ;;  %v1177_v42 = vor.u32 %v1175_v43, %v1173_v47 }
 0x1bc   : > { %2072 = vmatprep.mubr.bf16.mxu1 %v8136_v6  ;;  %2554 = vmatprep.mubr.bf16.mxu0 %v7470_v21  ;;  %v1179_v21 = vshll.u32 %v7864_v63, 16 }
 0x1bd   : > { %6822 = vmatpush3.bf16.msra.mxu0 %v7030_v44  ;;  %v7056_v44 = vld [vmem:[#allocation2 + $0x18] sm:$0xff] }
 0x1be   : > { %6823 = vmatprep.subr.bf16.mxu0 %v7035_v19  ;;  %v1181_v23 = vrot.slane %v1179_v21, 1 }
 0x1c0   : > { %v1185_v40 = vor.u32 %v1183_v56, %v1181_v23  ;;  %v7040_v56 = vld [vmem:[%s9933_s3 + $0x220] sm:$0xff]  }
 0x1c1   : > { %6824 = vmatpush3.bf16.msra.mxu0 %v7035_v19  ;;  %v1287_v19 = vld [vmem:[#allocation2] sm:$0xfe] }
 0x1c2   : > { %v1362_v43 = vrot.slane %v1287_v19, 1  ;;  %6825 = vmatprep.subr.bf16.mxu0 %v7040_v56 }
 0x1c3   : > { %2073 = vmatmul.mubr.bf16.gmra.mrb[88].mxu1 %v7771_v18  ;;  %2555 = vmatmul.mubr.bf16.gmra.mrb[124].mxu0 %v7055_v35  ;;  %v8156_v18 = vsel %vm922_vm5, %v1177_v42, %v1181_v23  ;;  %v8177_v35 = vld [vmem:[#allocation2 + $0x28] sm:$0xff] }
 0x1c4   : > { %2078 = vmatprep.mubr.bf16.mxu1 %v8148_v61  ;;  %2562 = vmatprep.mubr.bf16.mxu0 %v7487_v34  ;;  %10053 = vst [vmem:[#allocation49_spill] sm:$0xff] %v8156_v18  ;;  %v1187_v34 = vshll.u32 %v7853_v33, 16 }
 0x1c5   : > { %6826 = vmatpush3.bf16.msra.mxu0 %v7040_v56  ;;  %v7023_v56 = vld [vmem:[%s9933_s3 + $0x188] sm:$0xff]  }
 0x1c6   : > { %v1189_v49 = vrot.slane %v1187_v34, 1  ;;  %v8192_v34 = vld [vmem:[#allocation2 + $0x30] sm:$0xff] }
 0x1c8   : > { %v8164_v39 = vsel %vm922_vm5, %v1185_v40, %v1189_v49  ;;  %v1193_v47 = vor.u32 %v1191_v22, %v1189_v49 }
 0x1c9   : > { %10054 = vst [vmem:[#allocation50_spill] sm:$0xff] %v8164_v39 }
 0x1cb   : > { %2079 = vmatmul.mubr.bf16.gmra.mrb[92].mxu1 %v7868_v8  ;;  %2563 = vmatmul.mubr.bf16.gmra.mrb[128].mxu0 %v7056_v44  ;;  %v8166_v8 = vld [vmem:[#allocation2 + $0x20] sm:$0xff] }
 0x1cc   : > { %2086 = vmatprep.mubr.bf16.mxu1 %v8156_v18  ;;  %2568 = vmatprep.mubr.bf16.mxu0 %v7545_v30 }
 0x1d3   : > { %2087 = vmatmul.mubr.bf16.gmra.mrb[96].mxu1 %v7857_v36  ;;  %2569 = vmatmul.mubr.bf16.gmra.mrb[132].mxu0 %v8166_v8  ;;  %v8175_v36 = vsel %vm922_vm5, %v1193_v47, %v8094_v5  ;;  %v10056_v5 = vrot.slane %v7441_v48, 1 }
 0x1d4   : > { %2092 = vmatprep.mubr.bf16.mxu1 %v8164_v39  ;;  %2576 = vmatprep.mubr.bf16.mxu0 %v7596_v3  ;;  %10055 = vst [vmem:[#allocation51_spill] sm:$0xff] %v8175_v36  ;;  %v7027_v39 = vld [vmem:[%s9933_s3 + $0x1a0] sm:$0xff]  }
 0x1db   : > { %2093 = vmatmul.mubr.bf16.gmra.mrb[100].mxu1 %v7864_v63  ;;  %2577 = vmatmul.mubr.bf16.gmra.mrb[136].mxu0 %v8177_v35  ;;  %v1364_v63 = vsel %vm1361_vm6, %v1362_v43, %v8101_v26 }
 0x1dc   : > { %2100 = vmatprep.mubr.bf16.mxu1 %v8175_v36  ;;  %2582 = vmatprep.mubr.bf16.mxu0 %v7629_v51  ;;  %v1366_v36 = vsel %vm1361_vm6, %v8101_v26, %v10056_v5  ;;  %v7042_v26 = vld [vmem:[%s9933_s3 + $0x228] sm:$0xff]  }
 0x1dd   : > { %6827 = vmatprep.subr.bf16.mxu0 %v7042_v26 }
 0x1de   : > { %v8182_v21 = vpop.f32.mrb[32].mxu0  ;;  %6828 = vmatpush3.bf16.msra.mxu0 %v7042_v26  ;;  %v8284_v26 = vld [vmem:[#allocation2 + $0x58] sm:$0xff] }
 0x1df   : > { %v1886_v42 = vpop.f32.mrb[33].mxu0 }
 0x1e0   : > { %v8184_v23 = vpop.f32.mrb[34].mxu0  ;;  %v7022_v42 = vld [vmem:[%s9933_s3 + $0x180] sm:$0xff]  }
 0x1e1   : > { %v1889_v44 = vpop.f32.mrb[35].mxu0 }
 0x1e3   : > { %2101 = vmatmul.mubr.bf16.gmra.mrb[104].mxu1 %v7853_v33  ;;  %2583 = vmatmul.mubr.bf16.gmra.mrb[140].mxu0 %v8192_v34 }
 0x1e4   : > { %2590 = vmatprep.mubr.bf16.mxu0 %v7517_v1  ;;  %6753 = vmatprep.mubr.bf16.mxu1 %v1364_v63  ;;  %v8203_v63 = vld [vmem:[#allocation2 + $0x38] sm:$0xff] }
 0x1e6   : > { %v1920_v40 = vpop.f32.mrb[0].mxu1  ;;  %v1892_v49 = vpop.f32.mrb[36].mxu0 }
 0x1e7   : > { %v1921_v22 = vpop.f32.mrb[1].mxu1  ;;  %v1893_v47 = vpop.f32.mrb[37].mxu0 }
 0x1e8   : > { %v1922_v19 = vpop.f32.mrb[2].mxu1  ;;  %v1894_v43 = vpop.f32.mrb[38].mxu0 }
 0x1e9   : > { %v1923_v33 = vpop.f32.mrb[3].mxu1  ;;  %v1895_v44 = vpop.f32.mrb[39].mxu0  ;;  %v7024_v19 = vld [vmem:[%s9933_s3 + $0x190] sm:$0xff]   ;;  %v8225_v43 = vld [vmem:[#allocation2 + $0x40] sm:$0xff] }
 0x1eb   : > { %6754 = vmatmul.mubr.bf16.vlgmr.msra.gmra.mrb[108].mxu1 %v1366_v36  ;;  %2591 = vmatmul.mubr.bf16.gmra.mrb[144].mxu0 %v8203_v63 }
 0x1ec   : > { %3312 = vmatpush1.bf16.msra.mxu1 %v7022_v42  ;;  %6757 = vmatprep.mubr.bf16.mxu1 %v7666_v62  ;;  %v7026_v42 = vld [vmem:[%s9933_s3 + $0x198] sm:$0xff]  }
 0x1ed   : > { %2596 = vmatprep.mubr.bf16.mxu0 %v7542_v29  ;;  %3313 = vmatprep.subr.bf16.mxu1 %v7668_v31 }
 0x1ee   : > { %v8212_v48 = vpop.f32.mrb[4].mxu1  ;;  %v8214_v40 = vpop.f32.mrb[40].mxu0 }
 0x1ef   : > { %v1928_v5 = vpop.f32.mrb[5].mxu1  ;;  %v1900_v36 = vpop.f32.mrb[41].mxu0 }
 0x1f0   : > { %v8216_v49 = vpop.f32.mrb[6].mxu1  ;;  %v8218_v22 = vpop.f32.mrb[42].mxu0  ;;  %3314 = vmatpush1.bf16.msra.mxu1 %v7023_v56 }
 0x1f1   : > { %v1931_v62 = vpop.f32.mrb[7].mxu1  ;;  %v1903_v47 = vpop.f32.mrb[43].mxu0  ;;  %3315 = vmatprep.subr.bf16.mxu1 %v7668_v31 }
 0x1f3   : > { %6758 = vmatmul.mubr.bf16.gmra.mrb[112].mxu1 %v7702_v27  ;;  %2597 = vmatmul.mubr.bf16.gmra.mrb[148].mxu0 %v8225_v43 }
 0x1f4   : > { %6761 = vmatprep.mubr.bf16.mxu1 %v7713_v14  ;;  %2604 = vmatprep.mubr.bf16.mxu0 %v7581_v58 }
 0x1f5   : > { %3316 = vmatpush1.bf16.msra.mxu1 %v7024_v19  ;;  %v8239_v19 = vld [vmem:[#allocation2 + $0x48] sm:$0xff] }
 0x1f6   : > { %v1934_v33 = vpop.f32.mrb[8].mxu1  ;;  %v1906_v44 = vpop.f32.mrb[44].mxu0  ;;  %3317 = vmatprep.subr.bf16.mxu1 %v7668_v31 }
 0x1f7   : > { %v1935_v56 = vpop.f32.mrb[9].mxu1  ;;  %v1907_v5 = vpop.f32.mrb[45].mxu0 }
 0x1f8   : > { %v1936_v27 = vpop.f32.mrb[10].mxu1  ;;  %v1908_v36 = vpop.f32.mrb[46].mxu0 }
 0x1f9   : > { %v1937_v62 = vpop.f32.mrb[11].mxu1  ;;  %v1909_v47 = vpop.f32.mrb[47].mxu0  ;;  %3318 = vmatpush1.bf16.msra.mxu1 %v7026_v42  ;;  %v7028_v42 = vld [vmem:[%s9933_s3 + $0x1a8] sm:$0xff]  }
 0x1fa   : > { %3319 = vmatprep.subr.bf16.mxu1 %v7668_v31 }
 0x1fb   : > { %6762 = vmatmul.mubr.bf16.gmra.mrb[116].mxu1 %v7752_v0  ;;  %2605 = vmatmul.mubr.bf16.gmra.mrb[152].mxu0 %v8239_v19 }
 0x1fc   : > { %6765 = vmatprep.mubr.bf16.mxu1 %v7758_v16  ;;  %2610 = vmatprep.mubr.bf16.mxu0 %v7624_v50 }
 0x1fd   : > { %3320 = vmatpush1.bf16.msra.mxu1 %v7027_v39  ;;  %v7029_v39 = vld [vmem:[%s9933_s3 + $0x1b0] sm:$0xff]  }
 0x1fe   : > { %v8247_v33 = vpop.f32.mrb[12].mxu1  ;;  %v8249_v44 = vpop.f32.mrb[48].mxu0  ;;  %3321 = vmatprep.subr.bf16.mxu1 %v7668_v31 }
 0x1ff   : > { %v1942_v56 = vpop.f32.mrb[13].mxu1  ;;  %v1914_v5 = vpop.f32.mrb[49].mxu0 }
 0x200   : > { %v8252_v27 = vpop.f32.mrb[14].mxu1  ;;  %v8254_v36 = vpop.f32.mrb[50].mxu0  ;;  %v8264_v56 = vld [vmem:[#allocation2 + $0x50] sm:$0xff] }
 0x201   : > { %v1945_v62 = vpop.f32.mrb[15].mxu1  ;;  %v1917_v47 = vpop.f32.mrb[51].mxu0  ;;  %3322 = vmatpush1.bf16.msra.mxu1 %v7028_v42  ;;  %v7031_v42 = vld [vmem:[%s9933_s3 + $0x1b8] sm:$0xff]  }
 0x202   : > { %3323 = vmatprep.subr.bf16.mxu1 %v7668_v31 }
 0x203   : > { %6766 = vmatmul.mubr.bf16.gmra.mrb[120].mxu1 %v7788_v15  ;;  %2611 = vmatmul.mubr.bf16.gmra.mrb[156].mxu0 %v8264_v56 }
 0x204   : > { %6769 = vmatprep.mubr.bf16.mxu1 %v7803_v52  ;;  %2618 = vmatprep.mubr.bf16.mxu0 %v7675_v41 }
 0x205   : > { %3324 = vmatpush1.bf16.msra.mxu1 %v7029_v39  ;;  %v7032_v39 = vld [vmem:[%s9933_s3 + $0x1c0] sm:$0xff]  }
 0x206   : > { %v1948_v5 = vpop.f32.mrb[16].mxu1  ;;  %v6675_v62 = vpop.f32.mrb[52].mxu0  ;;  %3325 = vmatprep.subr.bf16.mxu1 %v7668_v31 }
 0x207   : > { %v1949_v47 = vpop.f32.mrb[17].mxu1  ;;  %v2141_v15 = vpop.f32.mrb[53].mxu0 }
 0x208   : > { %v1950_v16 = vpop.f32.mrb[18].mxu1  ;;  %v6676_v0 = vpop.f32.mrb[54].mxu0  ;;  %v8274_v14 = vadd.f32 %v2141_v15, %v8182_v21  ;;  %v8294_v15 = vld [vmem:[#allocation2 + $0x128] sm:$0xff] }
 0x209   : > { %v1951_v52 = vpop.f32.mrb[19].mxu1  ;;  %v2144_v18 = vpop.f32.mrb[55].mxu0  ;;  %3326 = vmatpush1.bf16.msra.mxu1 %v7031_v42  ;;  %v7033_v0 = vld [vmem:[%s9933_s3 + $0x1c8] sm:$0xff]   ;;  %10057 = vst [vmem:[#allocation52_spill] sm:$0xff] %v8294_v15 }
 0x20a   : > { %3327 = vmatprep.subr.bf16.mxu1 %v7668_v31  ;;  %v8281_v5 = vadd.f32 %v2144_v18, %v8184_v23 }
 0x20b   : > { %6770 = vmatmul.mubr.bf16.gmra.mrb[124].mxu1 %v7830_v9  ;;  %2619 = vmatmul.mubr.bf16.gmra.mrb[160].mxu0 %v8284_v26 }
 0x20c   : > { %6773 = vmatprep.mubr.bf16.mxu1 %v7833_v60  ;;  %2624 = vmatprep.mubr.bf16.mxu0 %v7709_v37 }
 0x20d   : > { %3328 = vmatpush1.bf16.msra.mxu1 %v7032_v39  ;;  %v7034_v39 = vld [vmem:[%s9933_s3 + $0x1d0] sm:$0xff]  }
 0x20e   : > { %v8292_v16 = vpop.f32.mrb[20].mxu1  ;;  %v6679_v31 = vpop.f32.mrb[56].mxu0  ;;  %3329 = vmatprep.subr.bf16.mxu1 %v8294_v15 }
 0x20f   : > { %v1956_v52 = vpop.f32.mrb[21].mxu1  ;;  %v2155_v18 = vpop.f32.mrb[57].mxu0 }
 0x210   : > { %v8297_v21 = vpop.f32.mrb[22].mxu1  ;;  %v6680_v23 = vpop.f32.mrb[58].mxu0  ;;  %v8300_v42 = vadd.f32 %v2155_v18, %v8214_v40  ;;  %v8310_v52 = vld [vmem:[#allocation2 + $0x60] sm:$0xff]  ;;  %v7036_v40 = vld [vmem:[%s9933_s3 + $0x1d8] sm:$0xff]  }
 0x211   : > { %v1959_v62 = vpop.f32.mrb[23].mxu1  ;;  %v2158_v47 = vpop.f32.mrb[59].mxu0  ;;  %3330 = vmatpush1.bf16.msra.mxu1 %v7033_v0 }
 0x212   : > { %3331 = vmatprep.subr.bf16.mxu1 %v8294_v15  ;;  %v8307_v31 = vadd.f32 %v2158_v47, %v8218_v22 }
 0x213   : > { %6774 = vmatmul.mubr.bf16.gmra.mrb[128].mxu1 %v7874_v25  ;;  %2625 = vmatmul.mubr.bf16.gmra.mrb[164].mxu0 %v8310_v52 }
 0x214   : > { %6777 = vmatprep.mubr.bf16.mxu1 %v7885_v55  ;;  %2632 = vmatprep.mubr.bf16.mxu0 %v7749_v28 }
 0x215   : > { %3332 = vmatpush1.bf16.msra.mxu1 %v7034_v39  ;;  %v7037_v39 = vld [vmem:[%s9933_s3 + $0x1e0] sm:$0xff]  }
 0x216   : > { %v1962_v0 = vpop.f32.mrb[24].mxu1  ;;  %v6683_v18 = vpop.f32.mrb[60].mxu0  ;;  %3333 = vmatprep.subr.bf16.mxu1 %v8294_v15 }
 0x217   : > { %v1963_v22 = vpop.f32.mrb[25].mxu1  ;;  %v2169_v23 = vpop.f32.mrb[61].mxu0  ;;  %v8330_v18 = vld [vmem:[#allocation2 + $0x68] sm:$0xff] }
 0x218   : > { %v1964_v62 = vpop.f32.mrb[26].mxu1  ;;  %v6684_v47 = vpop.f32.mrb[62].mxu0  ;;  %v8320_v25 = vadd.f32 %v2169_v23, %v8249_v44  ;;  %v7038_v44 = vld [vmem:[%s9933_s3 + $0x1e8] sm:$0xff]  }
 0x219   : > { %v1965_v60 = vpop.f32.mrb[27].mxu1  ;;  %v2172_v55 = vpop.f32.mrb[63].mxu0  ;;  %3334 = vmatpush1.bf16.msra.mxu1 %v7036_v40 }
 0x21a   : > { %3335 = vmatprep.subr.bf16.mxu1 %v8294_v15  ;;  %v8327_v0 = vadd.f32 %v2172_v55, %v8254_v36  ;;  %v10058_v60 = vld [vmem:[#allocation11_spill] sm:$0xff] }
 0x21b   : > { %6778 = vmatmul.mubr.bf16.gmra.mrb[132].mxu1 %v7901_v11  ;;  %2633 = vmatmul.mubr.bf16.gmra.mrb[168].mxu0 %v8330_v18 }
 0x21c   : > { %6781 = vmatprep.mubr.bf16.mxu1 %v7910_v45  ;;  %2638 = vmatprep.mubr.bf16.mxu0 %v10058_v60 }
 0x21d   : > { %3336 = vmatpush1.bf16.msra.mxu1 %v7037_v39  ;;  %v7039_v39 = vld [vmem:[%s9933_s3 + $0x1f0] sm:$0xff]  }
 0x21e   : > { %v8338_v40 = vpop.f32.mrb[28].mxu1  ;;  %v6687_v22 = vpop.f32.mrb[64].mxu0  ;;  %3337 = vmatprep.subr.bf16.mxu1 %v8294_v15 }
 0x21f   : > { %v1970_v55 = vpop.f32.mrb[29].mxu1  ;;  %v2183_v36 = vpop.f32.mrb[65].mxu0  ;;  %v7043_v22 = vld [vmem:[%s9933_s3 + $0x230] sm:$0xff]  }
 0x220   : > { %v8341_v23 = vpop.f32.mrb[30].mxu1  ;;  %v6688_v62 = vpop.f32.mrb[66].mxu0  ;;  %v8344_v47 = vadd.f32 %v2183_v36, %v8212_v48  ;;  %v8357_v48 = vld [vmem:[#allocation2 + $0x70] sm:$0xff]  ;;  %6829 = vmatprep.subr.bf16.mxu0 %v7043_v22 }
 0x221   : > { %v1973_v45 = vpop.f32.mrb[31].mxu1  ;;  %v2186_v11 = vpop.f32.mrb[67].mxu0  ;;  %3338 = vmatpush1.bf16.msra.mxu1 %v7038_v44  ;;  %6830 = vmatpush3.bf16.msra.mxu0 %v7043_v22 }
 0x222   : > { %3339 = vmatprep.subr.bf16.mxu1 %v8294_v15  ;;  %v8354_v55 = vadd.f32 %v2186_v11, %v8216_v49  ;;  %v7041_v45 = vld [vmem:[%s9933_s3 + $0x1f8] sm:$0xff]  }
 0x223   : > { %6782 = vmatmul.mubr.bf16.gmra.mrb[136].mxu1 %v7926_v54  ;;  %2639 = vmatmul.mubr.bf16.gmra.mrb[172].mxu0 %v8357_v48 }
 0x224   : > { %6785 = vmatprep.mubr.bf16.mxu1 %v7935_v38  ;;  %2646 = vmatprep.mubr.bf16.mxu0 %v7827_v46 }
 0x225   : > { %3340 = vmatpush1.bf16.msra.mxu1 %v7039_v39 }
 0x226   : > { %v1976_v44 = vpop.f32.mrb[32].mxu1  ;;  %v6691_v36 = vpop.f32.mrb[68].mxu0  ;;  %3341 = vmatprep.subr.bf16.mxu1 %v8294_v15 }
 0x227   : > { %v1977_v11 = vpop.f32.mrb[33].mxu1  ;;  %v2197_v49 = vpop.f32.mrb[69].mxu0  ;;  %v8373_v44 = vld [vmem:[#allocation2 + $0x78] sm:$0xff] }
 0x228   : > { %v1978_v62 = vpop.f32.mrb[34].mxu1  ;;  %v8367_v54 = vadd.f32 %v2197_v49, %v8247_v33  ;;  %v6692_v38 = vpop.f32.mrb[70].mxu0  ;;  %v7044_v49 = vld [vmem:[%s9933_s3 + $0x238] sm:$0xff]  }
 0x229   : > { %v1979_v9 = vpop.f32.mrb[35].mxu1  ;;  %v2200_v46 = vpop.f32.mrb[71].mxu0  ;;  %3342 = vmatpush1.bf16.msra.mxu1 %v7041_v45  ;;  %6831 = vmatprep.subr.bf16.mxu0 %v7044_v49 }
 0x22a   : > { %v8370_v39 = vadd.f32 %v2200_v46, %v8252_v27  ;;  %6832 = vmatpush3.bf16.msra.mxu0 %v7044_v49  ;;  %v10061_v49 = vld [vmem:[#allocation31_spill] sm:$0xff] }
 0x22b   : > { %6786 = vmatmul.mubr.bf16.gmra.mrb[140].mxu1 %v7951_v13  ;;  %2647 = vmatmul.mubr.bf16.gmra.mrb[176].mxu0 %v8373_v44 }
 0x22c   : > { %6789 = vmatprep.mubr.bf16.mxu1 %v7960_v17  ;;  %2652 = vmatprep.mubr.bf16.mxu0 %v7881_v24  ;;  %v8388_v17 = vld [vmem:[#allocation2 + $0x80] sm:$0xff] }
 0x22d   : > { %6115 = vmatprep.subr.bf16.mxu0 %v8294_v15 }
 0x22e   : > { %v1982_v22 = vpop.f32.mrb[36].mxu1  ;;  %v6695_v33 = vpop.f32.mrb[72].mxu0 }
 0x22f   : > { %v1984_v36 = vpop.f32.mrb[37].mxu1  ;;  %v2211_v38 = vpop.f32.mrb[73].mxu0 }
 0x230   : > { %v1985_v9 = vpop.f32.mrb[38].mxu1  ;;  %v8379_v45 = vadd.f32 %v2211_v38, %v8292_v16  ;;  %v6696_v46 = vpop.f32.mrb[74].mxu0 }
 0x231   : > { %v1987_v27 = vpop.f32.mrb[39].mxu1  ;;  %v2214_v11 = vpop.f32.mrb[75].mxu0 }
 0x232   : > { %v8385_v62 = vadd.f32 %v2214_v11, %v8297_v21 }
 0x233   : > { %6790 = vmatmul.mubr.bf16.gmra.mrb[144].mxu1 %v7978_v10  ;;  %2653 = vmatmul.mubr.bf16.gmra.mrb[180].mxu0 %v8388_v17 }
 0x234   : > { %6793 = vmatprep.mubr.bf16.mxu1 %v7987_v59  ;;  %2660 = vmatprep.mubr.bf16.mxu0 %v7906_v57  ;;  %v8401_v59 = vld [vmem:[#allocation2 + $0x88] sm:$0xff] }
 0x236   : > { %v1990_v16 = vpop.f32.mrb[40].mxu1  ;;  %v6699_v33 = vpop.f32.mrb[76].mxu0 }
 0x237   : > { %v1991_v36 = vpop.f32.mrb[41].mxu1  ;;  %v2225_v38 = vpop.f32.mrb[77].mxu0  ;;  %v10062_v16 = vld [vmem:[#allocation21_spill] sm:$0xff] }
 0x238   : > { %v1992_v21 = vpop.f32.mrb[42].mxu1  ;;  %v8395_v46 = vadd.f32 %v2225_v38, %v8338_v40  ;;  %v6700_v27 = vpop.f32.mrb[78].mxu0 }
 0x239   : > { %v1993_v11 = vpop.f32.mrb[43].mxu1  ;;  %v2228_v10 = vpop.f32.mrb[79].mxu0 }
 0x23a   : > { %10059 = vst [vmem:[#allocation11_spill] sm:$0xff] %v8395_v46  ;;  %v8398_v13 = vadd.f32 %v2228_v10, %v8341_v23 }
 0x23b   : > { %6794 = vmatmul.mubr.bf16.gmra.mrb[148].mxu1 %v7996_v32  ;;  %2661 = vmatmul.mubr.bf16.gmra.mrb[184].mxu0 %v8401_v59  ;;  %v8411_v32 = vld [vmem:[#allocation2 + $0x90] sm:$0xff] }
 0x23c   : > { %10060 = vst [vmem:[#allocation53_spill] sm:$0xff] %v8398_v13  ;;  %6797 = vmatprep.mubr.bf16.mxu1 %v10061_v49  ;;  %2666 = vmatprep.mubr.bf16.mxu0 %v10062_v16  ;;  %v10065_v49 = vld [vmem:[#allocation34_spill] sm:$0xff]  ;;  %v10066_v13 = vld [vmem:[#allocation24_spill] sm:$0xff] }
 0x23e   : > { %v1996_v33 = vpop.f32.mrb[44].mxu1  ;;  %v6703_v36 = vpop.f32.mrb[80].mxu0 }
 0x23f   : > { %v1998_v40 = vpop.f32.mrb[45].mxu1  ;;  %v2239_v38 = vpop.f32.mrb[81].mxu0 }
 0x240   : > { %v1999_v21 = vpop.f32.mrb[46].mxu1  ;;  %v8406_v27 = vadd.f32 %v2239_v38, %v1982_v22  ;;  %v6704_v11 = vpop.f32.mrb[82].mxu0 }
 0x241   : > { %v2001_v10 = vpop.f32.mrb[47].mxu1  ;;  %v2242_v23 = vpop.f32.mrb[83].mxu0 }
 0x242   : > { %10063 = vst [vmem:[#allocation21_spill] sm:$0xff] %v8406_v27  ;;  %v8408_v15 = vadd.f32 %v2242_v23, %v1985_v9  ;;  %v8421_v27 = vld [vmem:[#allocation2 + $0x98] sm:$0xff] }
 0x243   : > { %6798 = vmatmul.mubr.bf16.gmra.mrb[152].mxu1 %v8013_v4  ;;  %2667 = vmatmul.mubr.bf16.gmra.mrb[188].mxu0 %v8411_v32  ;;  %v10069_v4 = vld [vmem:[#allocation36_spill] sm:$0xff]  ;;  %10070 = vst [vmem:[#allocation56_spill] sm:$0xff] %v8421_v27 }
 0x244   : > { %10064 = vst [vmem:[#allocation54_spill] sm:$0xff] %v8408_v15  ;;  %6801 = vmatprep.mubr.bf16.mxu1 %v10065_v49  ;;  %2674 = vmatprep.mubr.bf16.mxu0 %v10066_v13  ;;  %v10071_v49 = vld [vmem:[#allocation35_spill] sm:$0xff] }
 0x246   : > { %v2004_v36 = vpop.f32.mrb[48].mxu1  ;;  %v6707_v40 = vpop.f32.mrb[84].mxu0 }
 0x247   : > { %v2005_v46 = vpop.f32.mrb[49].mxu1  ;;  %v2253_v22 = vpop.f32.mrb[85].mxu0  ;;  %v10072_v36 = vld [vmem:[#allocation27_spill] sm:$0xff] }
 0x248   : > { %v2006_v38 = vpop.f32.mrb[50].mxu1  ;;  %v8416_v11 = vadd.f32 %v2253_v22, %v1996_v33  ;;  %v6708_v10 = vpop.f32.mrb[86].mxu0 }
 0x249   : > { %v2007_v9 = vpop.f32.mrb[51].mxu1  ;;  %v2256_v23 = vpop.f32.mrb[87].mxu0 }
 0x24a   : > { %10067 = vst [vmem:[#allocation24_spill] sm:$0xff] %v8416_v11  ;;  %v8418_v15 = vadd.f32 %v2256_v23, %v1999_v21  ;;  %v8431_v11 = vld [vmem:[#allocation2 + $0xa0] sm:$0xff] }
 0x24b   : > { %6802 = vmatmul.mubr.bf16.gmra.mrb[156].mxu1 %v10069_v4  ;;  %2675 = vmatmul.mubr.bf16.gmra.mrb[192].mxu0 %v8421_v27  ;;  %10075 = vst [vmem:[#allocation59_spill] sm:$0xff] %v8431_v11  ;;  %v8447_v27 = vld [vmem:[#allocation2 + $0xb0] sm:$0xff] }
 0x24c   : > { %10068 = vst [vmem:[#allocation55_spill] sm:$0xff] %v8418_v15  ;;  %6805 = vmatprep.mubr.bf16.mxu1 %v10071_v49  ;;  %2680 = vmatprep.mubr.bf16.mxu0 %v10072_v36  ;;  %v10076_v49 = vld [vmem:[#allocation30_spill] sm:$0xff]  ;;  %v10082_v36 = vld [vmem:[#allocation44_spill] sm:$0xff]  ;;  %10083 = vst [vmem:[#allocation61_spill] sm:$0xff] %v8447_v27 }
 0x24e   : > { %v2010_v46 = vpop.f32.mrb[52].mxu1  ;;  %v6711_v40 = vpop.f32.mrb[88].mxu0 }
 0x24f   : > { %v2012_v38 = vpop.f32.mrb[53].mxu1  ;;  %v2267_v33 = vpop.f32.mrb[89].mxu0 }
 0x250   : > { %v2013_v22 = vpop.f32.mrb[54].mxu1  ;;  %v8426_v10 = vadd.f32 %v2267_v33, %v2010_v46  ;;  %v6712_v9 = vpop.f32.mrb[90].mxu0 }
 0x251   : > { %v2015_v21 = vpop.f32.mrb[55].mxu1  ;;  %v2270_v23 = vpop.f32.mrb[91].mxu0 }
 0x252   : > { %10073 = vst [vmem:[#allocation57_spill] sm:$0xff] %v8426_v10  ;;  %v8428_v15 = vadd.f32 %v2270_v23, %v2013_v22  ;;  %v10077_v22 = vld [vmem:[#allocation42_spill] sm:$0xff] }
 0x253   : > { %6806 = vmatmul.mubr.bf16.gmra.mrb[160].mxu1 %v8047_v20  ;;  %2681 = vmatmul.mubr.bf16.gmra.mrb[196].mxu0 %v8431_v11  ;;  %v8437_v23 = vld [vmem:[#allocation2 + $0xa8] sm:$0xff]  ;;  %v10079_v20 = vld [vmem:[#allocation33_spill] sm:$0xff] }
 0x254   : > { %10074 = vst [vmem:[#allocation58_spill] sm:$0xff] %v8428_v15  ;;  %6809 = vmatprep.mubr.bf16.mxu1 %v8050_v7  ;;  %2688 = vmatprep.mubr.bf16.mxu0 %v10076_v49  ;;  %v10078_v15 = vld [vmem:[#allocation41_spill] sm:$0xff] }
 0x256   : > { %v2018_v40 = vpop.f32.mrb[56].mxu1  ;;  %v6715_v38 = vpop.f32.mrb[92].mxu0 }
 0x257   : > { %v2019_v4 = vpop.f32.mrb[57].mxu1  ;;  %v2281_v46 = vpop.f32.mrb[93].mxu0 }
 0x258   : > { %v2020_v33 = vpop.f32.mrb[58].mxu1  ;;  %v6716_v9 = vpop.f32.mrb[94].mxu0 }
 0x259   : > { %v2021_v21 = vpop.f32.mrb[59].mxu1  ;;  %v2284_v10 = vpop.f32.mrb[95].mxu0 }
 0x25b   : > { %6810 = vmatmul.mubr.bf16.gmra.mrb[164].mxu1 %v10077_v22  ;;  %2689 = vmatmul.mubr.bf16.gmra.mrb[200].mxu0 %v8437_v23 }
 0x25c   : > { %6813 = vmatprep.mubr.bf16.mxu1 %v10078_v15  ;;  %2694 = vmatprep.mubr.bf16.mxu0 %v10079_v20  ;;  %v10084_v15 = vld [vmem:[#allocation37_spill] sm:$0xff] }
 0x25e   : > { %v2024_v7 = vpop.f32.mrb[60].mxu1  ;;  %v6719_v49 = vpop.f32.mrb[96].mxu0 }
 0x25f   : > { %v8442_v40 = vadd.f32 %v2281_v46, %v2024_v7  ;;  %v2026_v4 = vpop.f32.mrb[61].mxu1  ;;  %v2295_v38 = vpop.f32.mrb[97].mxu0 }
 0x260   : > { %v2027_v33 = vpop.f32.mrb[62].mxu1  ;;  %v6720_v9 = vpop.f32.mrb[98].mxu0 }
 0x261   : > { %10080 = vst [vmem:[#allocation33_spill] sm:$0xff] %v8442_v40  ;;  %v8444_v21 = vadd.f32 %v2284_v10, %v2027_v33  ;;  %v2029_v11 = vpop.f32.mrb[63].mxu1  ;;  %v2298_v22 = vpop.f32.mrb[99].mxu0 }
 0x262   : > { %v8453_v11 = vld [vmem:[#allocation2 + $0xb8] sm:$0xff] }
 0x263   : > { %10081 = vst [vmem:[#allocation60_spill] sm:$0xff] %v8444_v21  ;;  %6814 = vmatmul.mubr.bf16.gmra.mrb[168].mxu1 %v10082_v36  ;;  %2695 = vmatmul.mubr.bf16.gmra.mrb[204].mxu0 %v8447_v27  ;;  %v10085_v21 = vld [vmem:[#allocation40_spill] sm:$0xff]  ;;  %v8463_v27 = vld [vmem:[#allocation2 + $0xc0] sm:$0xff] }
 0x264   : > { %3343 = vmatprep.mubr.bf16.mxu1 %v7545_v30  ;;  %2702 = vmatprep.mubr.bf16.mxu0 %v10084_v15 }
 0x266   : > { %v2032_v7 = vpop.f32.mrb[64].mxu1  ;;  %v6723_v49 = vpop.f32.mrb[100].mxu0 }
 0x267   : > { %v2033_v46 = vpop.f32.mrb[65].mxu1  ;;  %v2309_v4 = vpop.f32.mrb[101].mxu0 }
 0x268   : > { %v2034_v40 = vpop.f32.mrb[66].mxu1  ;;  %v6724_v9 = vpop.f32.mrb[102].mxu0 }
 0x269   : > { %v2035_v10 = vpop.f32.mrb[67].mxu1  ;;  %v2312_v33 = vpop.f32.mrb[103].mxu0 }
 0x26b   : > { %3344 = vmatmul.mubr.bf16.vlgmr.msra.gmra.mrb[172].mxu1 %v8166_v8  ;;  %2703 = vmatmul.mubr.bf16.gmra.mrb[208].mxu0 %v8453_v11 }
 0x26c   : > { %3351 = vmatprep.mubr.bf16.mxu1 %v7596_v3  ;;  %2708 = vmatprep.mubr.bf16.mxu0 %v10085_v21  ;;  %v10088_v3 = vld [vmem:[#allocation43_spill] sm:$0xff] }
 0x26e   : > { %v2038_v30 = vpop.f32.mrb[68].mxu1  ;;  %v6727_v36 = vpop.f32.mrb[104].mxu0 }
 0x26f   : > { %v8458_v7 = vadd.f32 %v2295_v38, %v2038_v30  ;;  %v2040_v49 = vpop.f32.mrb[69].mxu1  ;;  %v2323_v46 = vpop.f32.mrb[105].mxu0 }
 0x270   : > { %v2041_v40 = vpop.f32.mrb[70].mxu1  ;;  %v6728_v9 = vpop.f32.mrb[106].mxu0 }
 0x271   : > { %10086 = vst [vmem:[#allocation40_spill] sm:$0xff] %v8458_v7  ;;  %v8460_v10 = vadd.f32 %v2298_v22, %v2041_v40  ;;  %v2043_v15 = vpop.f32.mrb[71].mxu1  ;;  %v2326_v8 = vpop.f32.mrb[107].mxu0 }
 0x273   : > { %10087 = vst [vmem:[#allocation62_spill] sm:$0xff] %v8460_v10  ;;  %3352 = vmatmul.mubr.bf16.gmra.mrb[176].mxu1 %v8177_v35  ;;  %2709 = vmatmul.mubr.bf16.gmra.mrb[212].mxu0 %v8463_v27  ;;  %v8473_v35 = vld [vmem:[#allocation2 + $0xc8] sm:$0xff] }
 0x274   : > { %3357 = vmatprep.mubr.bf16.mxu1 %v7629_v51  ;;  %2716 = vmatprep.mubr.bf16.mxu0 %v10088_v3  ;;  %10089 = vst [vmem:[#allocation43_spill] sm:$0xff] %v8473_v35 }
 0x276   : > { %v2046_v36 = vpop.f32.mrb[72].mxu1  ;;  %v6731_v38 = vpop.f32.mrb[108].mxu0 }
 0x277   : > { %v2047_v30 = vpop.f32.mrb[73].mxu1  ;;  %v8468_v49 = vpop.f32.mrb[109].mxu0 }
 0x278   : > { %v2048_v9 = vpop.f32.mrb[74].mxu1  ;;  %v6732_v22 = vpop.f32.mrb[110].mxu0 }
 0x279   : > { %v2049_v40 = vpop.f32.mrb[75].mxu1  ;;  %v8470_v15 = vpop.f32.mrb[111].mxu0 }
 0x27b   : > { %3358 = vmatmul.mubr.bf16.gmra.mrb[180].mxu1 %v8192_v34  ;;  %2717 = vmatmul.mubr.bf16.gmra.mrb[216].mxu0 %v8473_v35  ;;  %v8487_v35 = vld [vmem:[#allocation2 + $0xd0] sm:$0xff] }
 0x27c   : > { %3365 = vmatprep.mubr.bf16.mxu1 %v7517_v1  ;;  %2722 = vmatprep.mubr.bf16.mxu0 %v8089_v53 }
 0x27e   : > { %v2052_v51 = vpop.f32.mrb[76].mxu1  ;;  %v6735_v36 = vpop.f32.mrb[112].mxu0 }
 0x27f   : > { %v8478_v38 = vadd.f32 %v2309_v4, %v2052_v51  ;;  %v2054_v30 = vpop.f32.mrb[77].mxu1  ;;  %v8480_v9 = vpop.f32.mrb[113].mxu0 }
 0x280   : > { %v2055_v22 = vpop.f32.mrb[78].mxu1  ;;  %v6736_v40 = vpop.f32.mrb[114].mxu0 }
 0x281   : > { %v8482_v10 = vadd.f32 %v2312_v33, %v2055_v22  ;;  %v2057_v34 = vpop.f32.mrb[79].mxu1  ;;  %v8484_v7 = vpop.f32.mrb[115].mxu0 }
 0x283   : > { %10090 = vst [vmem:[#allocation63_spill] sm:$0xff] %v8482_v10  ;;  %3366 = vmatmul.mubr.bf16.gmra.mrb[184].mxu1 %v8203_v63  ;;  %2723 = vmatmul.mubr.bf16.gmra.mrb[220].mxu0 %v8487_v35  ;;  %v8499_v10 = vld [vmem:[#allocation2 + $0xd8] sm:$0xff] }
 0x284   : > { %3371 = vmatprep.mubr.bf16.mxu1 %v7542_v29  ;;  %2730 = vmatprep.mubr.bf16.mxu0 %v8111_v2 }
 0x286   : > { %v2060_v1 = vpop.f32.mrb[80].mxu1  ;;  %v2542_v4 = vpop.f32.mrb[116].mxu0 }
 0x287   : > { %v2061_v51 = vpop.f32.mrb[81].mxu1  ;;  %v8493_v36 = vadd.f32 %v2542_v4, %v8274_v14  ;;  %v2544_v33 = vpop.f32.mrb[117].mxu0 }
 0x288   : > { %v2062_v30 = vpop.f32.mrb[82].mxu1  ;;  %v2545_v22 = vpop.f32.mrb[118].mxu0 }
 0x289   : > { %v2063_v40 = vpop.f32.mrb[83].mxu1  ;;  %v8496_v63 = vadd.f32 %v2545_v22, %v8281_v5  ;;  %v2547_v34 = vpop.f32.mrb[119].mxu0 }
 0x28a   : > { %v8509_v40 = vld [vmem:[#allocation2 + $0xe0] sm:$0xff] }
 0x28b   : > { %3372 = vmatmul.mubr.bf16.gmra.mrb[188].mxu1 %v8225_v43  ;;  %2731 = vmatmul.mubr.bf16.gmra.mrb[224].mxu0 %v8499_v10 }
 0x28c   : > { %3379 = vmatprep.mubr.bf16.mxu1 %v7581_v58  ;;  %2736 = vmatprep.mubr.bf16.mxu0 %v8122_v12 }
 0x28e   : > { %v2066_v29 = vpop.f32.mrb[84].mxu1  ;;  %v2550_v14 = vpop.f32.mrb[120].mxu0 }
 0x28f   : > { %v8504_v1 = vadd.f32 %v2323_v46, %v2066_v29  ;;  %v2068_v4 = vpop.f32.mrb[85].mxu1  ;;  %v2551_v51 = vpop.f32.mrb[121].mxu0 }
 0x290   : > { %v2069_v33 = vpop.f32.mrb[86].mxu1  ;;  %v2552_v5 = vpop.f32.mrb[122].mxu0 }
 0x291   : > { %v8506_v30 = vadd.f32 %v2326_v8, %v2069_v33  ;;  %v2071_v22 = vpop.f32.mrb[87].mxu1  ;;  %v2553_v43 = vpop.f32.mrb[123].mxu0  ;;  %v8521_v5 = vld [vmem:[#allocation2 + $0xe8] sm:$0xff] }
 0x293   : > { %3380 = vmatmul.mubr.bf16.gmra.mrb[192].mxu1 %v8239_v19  ;;  %2737 = vmatmul.mubr.bf16.gmra.mrb[228].mxu0 %v8509_v40 }
 0x294   : > { %3385 = vmatprep.mubr.bf16.mxu1 %v7624_v50  ;;  %2744 = vmatprep.mubr.bf16.mxu0 %v8136_v6 }
 0x296   : > { %v2074_v58 = vpop.f32.mrb[88].mxu1  ;;  %v2556_v46 = vpop.f32.mrb[124].mxu0 }
 0x297   : > { %v2075_v34 = vpop.f32.mrb[89].mxu1  ;;  %v8515_v29 = vadd.f32 %v2556_v46, %v8300_v42  ;;  %v2558_v8 = vpop.f32.mrb[125].mxu0 }
 0x298   : > { %v2076_v14 = vpop.f32.mrb[90].mxu1  ;;  %v2559_v4 = vpop.f32.mrb[126].mxu0 }
 0x299   : > { %v2077_v51 = vpop.f32.mrb[91].mxu1  ;;  %v8518_v19 = vadd.f32 %v2559_v4, %v8307_v31  ;;  %v2561_v33 = vpop.f32.mrb[127].mxu0  ;;  %v8533_v14 = vld [vmem:[#allocation2 + $0xf0] sm:$0xff] }
 0x29b   : > { %3386 = vmatmul.mubr.bf16.gmra.mrb[196].mxu1 %v8264_v56  ;;  %2745 = vmatmul.mubr.bf16.gmra.mrb[232].mxu0 %v8521_v5 }
 0x29c   : > { %3393 = vmatprep.mubr.bf16.mxu1 %v7675_v41  ;;  %2750 = vmatprep.mubr.bf16.mxu0 %v8148_v61  ;;  %v10091_v41 = vld [vmem:[#allocation49_spill] sm:$0xff] }
 0x29e   : > { %v2080_v50 = vpop.f32.mrb[92].mxu1  ;;  %v2564_v42 = vpop.f32.mrb[128].mxu0 }
 0x29f   : > { %v8527_v22 = vadd.f32 %v8468_v49, %v2080_v50  ;;  %v2082_v43 = vpop.f32.mrb[93].mxu1  ;;  %v2565_v58 = vpop.f32.mrb[129].mxu0 }
 0x2a0   : > { %v2083_v31 = vpop.f32.mrb[94].mxu1  ;;  %v2566_v46 = vpop.f32.mrb[130].mxu0 }
 0x2a1   : > { %v8530_v34 = vadd.f32 %v8470_v15, %v2083_v31  ;;  %v2085_v56 = vpop.f32.mrb[95].mxu1  ;;  %v2567_v8 = vpop.f32.mrb[131].mxu0  ;;  %v8545_v31 = vld [vmem:[#allocation2 + $0xf8] sm:$0xff] }
 0x2a3   : > { %3394 = vmatmul.mubr.bf16.gmra.mrb[200].mxu1 %v8284_v26  ;;  %2751 = vmatmul.mubr.bf16.gmra.mrb[236].mxu0 %v8533_v14 }
 0x2a4   : > { %3399 = vmatprep.mubr.bf16.mxu1 %v7709_v37  ;;  %2758 = vmatprep.mubr.bf16.mxu0 %v10091_v41  ;;  %v10092_v37 = vld [vmem:[#allocation7_spill] sm:$0xff] }
 0x2a6   : > { %v2088_v49 = vpop.f32.mrb[96].mxu1  ;;  %v2570_v4 = vpop.f32.mrb[132].mxu0 }
 0x2a7   : > { %v2089_v51 = vpop.f32.mrb[97].mxu1  ;;  %v8539_v33 = vadd.f32 %v2570_v4, %v8320_v25  ;;  %v2572_v15 = vpop.f32.mrb[133].mxu0 }
 0x2a8   : > { %v2090_v50 = vpop.f32.mrb[98].mxu1  ;;  %v2573_v42 = vpop.f32.mrb[134].mxu0 }
 0x2a9   : > { %v2091_v43 = vpop.f32.mrb[99].mxu1  ;;  %v8542_v26 = vadd.f32 %v2573_v42, %v8327_v0  ;;  %v2575_v58 = vpop.f32.mrb[135].mxu0  ;;  %v10093_v50 = vld [vmem:[#allocation8_spill] sm:$0xff] }
 0x2ab   : > { %3400 = vmatmul.mubr.bf16.gmra.mrb[204].mxu1 %v8310_v52  ;;  %2759 = vmatmul.mubr.bf16.gmra.mrb[240].mxu0 %v8545_v31 }
 0x2ac   : > { %3407 = vmatprep.mubr.bf16.mxu1 %v7749_v28  ;;  %6833 = vmatprep.mubr.bf16.mxu0 %v10092_v37  ;;  %v10094_v28 = vld [vmem:[#allocation9_spill] sm:$0xff] }
 0x2ae   : > { %v2094_v25 = vpop.f32.mrb[100].mxu1  ;;  %v2578_v46 = vpop.f32.mrb[136].mxu0 }
 0x2af   : > { %v8551_v56 = vadd.f32 %v8480_v9, %v2094_v25  ;;  %v2096_v8 = vpop.f32.mrb[101].mxu1  ;;  %v2579_v49 = vpop.f32.mrb[137].mxu0 }
 0x2b0   : > { %v2097_v0 = vpop.f32.mrb[102].mxu1  ;;  %v2580_v4 = vpop.f32.mrb[138].mxu0 }
 0x2b1   : > { %v8554_v51 = vadd.f32 %v8484_v7, %v2097_v0  ;;  %v2099_v52 = vpop.f32.mrb[103].mxu1  ;;  %v2581_v15 = vpop.f32.mrb[139].mxu0  ;;  %v10096_v0 = vld [vmem:[#allocation13_spill] sm:$0xff] }
 0x2b3   : > { %3408 = vmatmul.mubr.bf16.gmra.mrb[208].mxu1 %v8330_v18  ;;  %6834 = vmatmul.mubr.bf16.vlgmr.msra.gmra.mrb[244].mxu0 %v10093_v50  ;;  %v10095_v18 = vld [vmem:[#allocation10_spill] sm:$0xff] }
 0x2b4   : > { %3413 = vmatprep.mubr.bf16.mxu1 %v10058_v60  ;;  %6837 = vmatprep.mubr.bf16.mxu0 %v10094_v28  ;;  %v10097_v60 = vld [vmem:[#allocation12_spill] sm:$0xff] }
 0x2b6   : > { %v2102_v42 = vpop.f32.mrb[104].mxu1  ;;  %v2584_v9 = vpop.f32.mrb[140].mxu0 }
 0x2b7   : > { %v2103_v43 = vpop.f32.mrb[105].mxu1  ;;  %v2585_v58 = vadd.f32 %v2584_v9, %v8344_v47  ;;  %v2586_v37 = vpop.f32.mrb[141].mxu0 }
 0x2b8   : > { %v2104_v25 = vpop.f32.mrb[106].mxu1  ;;  %v2587_v46 = vpop.f32.mrb[142].mxu0  ;;  %v10099_v37 = vld [vmem:[#allocation15_spill] sm:$0xff] }
 0x2b9   : > { %v2105_v7 = vpop.f32.mrb[107].mxu1  ;;  %v2588_v8 = vadd.f32 %v2587_v46, %v8354_v55  ;;  %v2589_v49 = vpop.f32.mrb[143].mxu0 }
 0x2bb   : > { %3414 = vmatmul.mubr.bf16.gmra.mrb[212].mxu1 %v8357_v48  ;;  %6838 = vmatmul.mubr.bf16.gmra.mrb[248].mxu0 %v10095_v18  ;;  %v10098_v48 = vld [vmem:[#allocation14_spill] sm:$0xff] }
 0x2bc   : > { %3421 = vmatprep.mubr.bf16.mxu1 %v10096_v0  ;;  %6841 = vmatprep.mubr.bf16.mxu0 %v10097_v60 }
 0x2be   : > { %v6755_v4 = vpop.f32.mrb[108].mxu1  ;;  %v2592_v52 = vpop.f32.mrb[144].mxu0 }
 0x2bf   : > { %v2799_v15 = vpop.f32.mrb[109].mxu1  ;;  %v2593_v50 = vpop.f32.mrb[145].mxu0 }
 0x2c0   : > { %v8567_v47 = vadd.f32 %v2799_v15, %v8493_v36  ;;  %v6756_v28 = vpop.f32.mrb[110].mxu1  ;;  %v2594_v42 = vpop.f32.mrb[146].mxu0 }
 0x2c1   : > { %v2802_v9 = vpop.f32.mrb[111].mxu1  ;;  %v2595_v55 = vpop.f32.mrb[147].mxu0 }
 0x2c2   : > { %v8570_v43 = vadd.f32 %v2802_v9, %v8496_v63 }
 0x2c3   : > { %3422 = vmatmul.mubr.bf16.gmra.mrb[216].mxu1 %v8373_v44  ;;  %6842 = vmatmul.mubr.bf16.gmra.mrb[252].mxu0 %v10098_v48 }
 0x2c4   : > { %3427 = vmatprep.mubr.bf16.mxu1 %v7881_v24  ;;  %6845 = vmatprep.mubr.bf16.mxu0 %v10099_v37  ;;  %v10100_v24 = vld [vmem:[#allocation16_spill] sm:$0xff] }
 0x2c6   : > { %v6759_v25 = vpop.f32.mrb[112].mxu1  ;;  %v2598_v46 = vpop.f32.mrb[148].mxu0 }
 0x2c7   : > { %v2813_v7 = vpop.f32.mrb[113].mxu1  ;;  %v2599_v36 = vadd.f32 %v2598_v46, %v8367_v54  ;;  %v2600_v49 = vpop.f32.mrb[149].mxu0  ;;  %v10101_v54 = vld [vmem:[#allocation17_spill] sm:$0xff] }
 0x2c8   : > { %v8578_v18 = vadd.f32 %v2813_v7, %v8515_v29  ;;  %v6760_v0 = vpop.f32.mrb[114].mxu1  ;;  %v2601_v63 = vpop.f32.mrb[150].mxu0 }
 0x2c9   : > { %v2816_v60 = vpop.f32.mrb[115].mxu1  ;;  %v2602_v44 = vadd.f32 %v2601_v63, %v8370_v39  ;;  %v2603_v4 = vpop.f32.mrb[151].mxu0 }
 0x2ca   : > { %v8582_v52 = vadd.f32 %v2816_v60, %v8518_v19 }
 0x2cb   : > { %3428 = vmatmul.mubr.bf16.gmra.mrb[220].mxu1 %v8388_v17  ;;  %6846 = vmatmul.mubr.bf16.gmra.mrb[0].mxu0 %v10100_v24  ;;  %v10102_v17 = vld [vmem:[#allocation18_spill] sm:$0xff] }
 0x2cc   : > { %3435 = vmatprep.mubr.bf16.mxu1 %v7906_v57  ;;  %6849 = vmatprep.mubr.bf16.mxu0 %v10101_v54  ;;  %v10103_v57 = vld [vmem:[#allocation19_spill] sm:$0xff]  ;;  %v10105_v24 = vld [vmem:[#allocation22_spill] sm:$0xff] }
 0x2ce   : > { %v6763_v15 = vpop.f32.mrb[116].mxu1  ;;  %v2606_v29 = vpop.f32.mrb[152].mxu0 }
 0x2cf   : > { %v2827_v50 = vpop.f32.mrb[117].mxu1  ;;  %v2607_v28 = vpop.f32.mrb[153].mxu0 }
 0x2d0   : > { %v8589_v42 = vadd.f32 %v2827_v50, %v8539_v33  ;;  %v6764_v39 = vpop.f32.mrb[118].mxu1  ;;  %v2608_v9 = vpop.f32.mrb[154].mxu0 }
 0x2d1   : > { %v2830_v55 = vpop.f32.mrb[119].mxu1  ;;  %v2609_v19 = vpop.f32.mrb[155].mxu0  ;;  %v10106_v9 = vld [vmem:[#allocation56_spill] sm:$0xff] }
 0x2d2   : > { %v8592_v48 = vadd.f32 %v2830_v55, %v8542_v26  ;;  %v10108_v55 = vld [vmem:[#allocation27_spill] sm:$0xff] }
 0x2d3   : > { %3436 = vmatmul.mubr.bf16.gmra.mrb[224].mxu1 %v8401_v59  ;;  %6850 = vmatmul.mubr.bf16.gmra.mrb[4].mxu0 %v10102_v17 }
 0x2d4   : > { %3441 = vmatprep.mubr.bf16.mxu1 %v10062_v16  ;;  %6853 = vmatprep.mubr.bf16.mxu0 %v10103_v57  ;;  %v10104_v16 = vld [vmem:[#allocation20_spill] sm:$0xff] }
 0x2d6   : > { %v6767_v37 = vpop.f32.mrb[120].mxu1  ;;  %v2612_v25 = vpop.f32.mrb[156].mxu0 }
 0x2d7   : > { %v2841_v46 = vpop.f32.mrb[121].mxu1  ;;  %v2613_v33 = vadd.f32 %v2612_v25, %v8379_v45  ;;  %v2614_v7 = vpop.f32.mrb[157].mxu0  ;;  %v10110_v37 = vld [vmem:[#allocation11_spill] sm:$0xff] }
 0x2d8   : > { %v8599_v49 = vadd.f32 %v2841_v46, %v2585_v58  ;;  %v6768_v0 = vpop.f32.mrb[122].mxu1  ;;  %v2615_v63 = vpop.f32.mrb[158].mxu0 }
 0x2d9   : > { %v2844_v26 = vpop.f32.mrb[123].mxu1  ;;  %v2616_v60 = vadd.f32 %v2615_v63, %v8385_v62  ;;  %v2617_v59 = vpop.f32.mrb[159].mxu0  ;;  %v10111_v63 = vld [vmem:[#allocation53_spill] sm:$0xff] }
 0x2da   : > { %v8602_v4 = vadd.f32 %v2844_v26, %v2588_v8 }
 0x2db   : > { %3442 = vmatmul.mubr.bf16.gmra.mrb[228].mxu1 %v8411_v32  ;;  %6854 = vmatmul.mubr.bf16.gmra.mrb[8].mxu0 %v10104_v16  ;;  %v10107_v32 = vld [vmem:[#allocation23_spill] sm:$0xff] }
 0x2dc   : > { %3449 = vmatprep.mubr.bf16.mxu1 %v10066_v13  ;;  %6857 = vmatprep.mubr.bf16.mxu0 %v10105_v24  ;;  %v10109_v13 = vld [vmem:[#allocation25_spill] sm:$0xff]  ;;  %v10112_v24 = vld [vmem:[#allocation59_spill] sm:$0xff] }
 0x2de   : > { %v6771_v45 = vpop.f32.mrb[124].mxu1  ;;  %v2620_v54 = vpop.f32.mrb[160].mxu0 }
 0x2df   : > { %v2855_v58 = vpop.f32.mrb[125].mxu1  ;;  %v2621_v15 = vpop.f32.mrb[161].mxu0  ;;  %v10113_v45 = vld [vmem:[#allocation26_spill] sm:$0xff] }
 0x2e0   : > { %v8608_v29 = vadd.f32 %v2855_v58, %v2599_v36  ;;  %v6772_v50 = vpop.f32.mrb[126].mxu1  ;;  %v2622_v28 = vpop.f32.mrb[162].mxu0  ;;  %v10114_v54 = vld [vmem:[#allocation30_spill] sm:$0xff]  ;;  %v10115_v58 = vld [vmem:[#allocation28_spill] sm:$0xff] }
 0x2e1   : > { %v2858_v62 = vpop.f32.mrb[127].mxu1  ;;  %v2623_v39 = vpop.f32.mrb[163].mxu0 }
 0x2e2   : > { %v8610_v8 = vadd.f32 %v2858_v62, %v2602_v44 }
 0x2e3   : > { %3450 = vmatmul.mubr.bf16.gmra.mrb[232].mxu1 %v10106_v9  ;;  %6858 = vmatmul.mubr.bf16.gmra.mrb[12].mxu0 %v10107_v32 }
 0x2e4   : > { %3455 = vmatprep.mubr.bf16.mxu1 %v10108_v55  ;;  %6861 = vmatprep.mubr.bf16.mxu0 %v10109_v13  ;;  %v10116_v13 = vld [vmem:[#allocation29_spill] sm:$0xff] }
 0x2e6   : > { %v6775_v19 = vpop.f32.mrb[128].mxu1  ;;  %v2626_v17 = vpop.f32.mrb[164].mxu0 }
 0x2e7   : > { %v2869_v57 = vpop.f32.mrb[129].mxu1  ;;  %v2627_v36 = vadd.f32 %v2626_v17, %v10110_v37  ;;  %v2628_v25 = vpop.f32.mrb[165].mxu0  ;;  %v10117_v19 = vld [vmem:[#allocation31_spill] sm:$0xff] }
 0x2e8   : > { %v8617_v46 = vadd.f32 %v2869_v57, %v2613_v33  ;;  %v6776_v7 = vpop.f32.mrb[130].mxu1  ;;  %v2629_v0 = vpop.f32.mrb[166].mxu0  ;;  %v10118_v25 = vld [vmem:[#allocation21_spill] sm:$0xff] }
 0x2e9   : > { %v2872_v44 = vpop.f32.mrb[131].mxu1  ;;  %v2630_v26 = vadd.f32 %v2629_v0, %v10111_v63  ;;  %v2631_v59 = vpop.f32.mrb[167].mxu0 }
 0x2ea   : > { %v8620_v16 = vadd.f32 %v2872_v44, %v2616_v60  ;;  %v10119_v59 = vld [vmem:[#allocation54_spill] sm:$0xff] }
 0x2eb   : > { %3456 = vmatmul.mubr.bf16.gmra.mrb[236].mxu1 %v10112_v24  ;;  %6862 = vmatmul.mubr.bf16.gmra.mrb[16].mxu0 %v10113_v45 }
 0x2ec   : > { %3463 = vmatprep.mubr.bf16.mxu1 %v10114_v54  ;;  %6865 = vmatprep.mubr.bf16.mxu0 %v10115_v58  ;;  %v10120_v54 = vld [vmem:[#allocation61_spill] sm:$0xff] }
 0x2ed   : > { %v10122_v58 = vld [vmem:[#allocation37_spill] sm:$0xff] }
 0x2ee   : > { %v6779_v15 = vpop.f32.mrb[132].mxu1  ;;  %v2634_v50 = vpop.f32.mrb[168].mxu0 }
 0x2ef   : > { %v2883_v33 = vpop.f32.mrb[133].mxu1  ;;  %v2635_v28 = vpop.f32.mrb[169].mxu0  ;;  %v10123_v15 = vld [vmem:[#allocation34_spill] sm:$0xff] }
 0x2f0   : > { %v8626_v62 = vadd.f32 %v2883_v33, %v2627_v36  ;;  %v6780_v39 = vpop.f32.mrb[134].mxu1  ;;  %v2636_v9 = vpop.f32.mrb[170].mxu0 }
 0x2f1   : > { %v2886_v32 = vpop.f32.mrb[135].mxu1  ;;  %v2637_v55 = vpop.f32.mrb[171].mxu0 }
 0x2f2   : > { %v8628_v60 = vadd.f32 %v2886_v32, %v2630_v26 }
 0x2f3   : > { %3464 = vmatmul.mubr.bf16.gmra.mrb[240].mxu1 %v8437_v23  ;;  %6866 = vmatmul.mubr.bf16.gmra.mrb[20].mxu0 %v10116_v13 }
 0x2f4   : > { %3469 = vmatprep.mubr.bf16.mxu1 %v10079_v20  ;;  %6869 = vmatprep.mubr.bf16.mxu0 %v10117_v19  ;;  %v10121_v20 = vld [vmem:[#allocation32_spill] sm:$0xff] }
 0x2f5   : > { %v10124_v19 = vld [vmem:[#allocation36_spill] sm:$0xff] }
 0x2f6   : > { %v6783_v17 = vpop.f32.mrb[136].mxu1  ;;  %v2640_v57 = vpop.f32.mrb[172].mxu0 }
 0x2f7   : > { %v2897_v37 = vpop.f32.mrb[137].mxu1  ;;  %v2641_v36 = vadd.f32 %v2640_v57, %v10118_v25  ;;  %v2642_v7 = vpop.f32.mrb[173].mxu0  ;;  %v10125_v17 = vld [vmem:[#allocation35_spill] sm:$0xff] }
 0x2f8   : > { %v6784_v0 = vpop.f32.mrb[138].mxu1  ;;  %v2643_v44 = vpop.f32.mrb[174].mxu0 }
 0x2f9   : > { %v8635_v63 = vadd.f32 %v2897_v37, %v2641_v36  ;;  %v2900_v26 = vpop.f32.mrb[139].mxu1  ;;  %v2644_v24 = vadd.f32 %v2643_v44, %v10119_v59  ;;  %v2645_v23 = vpop.f32.mrb[175].mxu0  ;;  %v10126_v36 = vld [vmem:[#allocation24_spill] sm:$0xff] }
 0x2fa   : > { %v10128_v23 = vld [vmem:[#allocation55_spill] sm:$0xff] }
 0x2fb   : > { %v8638_v45 = vadd.f32 %v2900_v26, %v2644_v24  ;;  %3470 = vmatmul.mubr.bf16.gmra.mrb[244].mxu1 %v10120_v54  ;;  %6870 = vmatmul.mubr.bf16.gmra.mrb[24].mxu0 %v10121_v20 }
 0x2fc   : > { %3477 = vmatprep.mubr.bf16.mxu1 %v10122_v58  ;;  %6873 = vmatprep.mubr.bf16.mxu0 %v10123_v15  ;;  %v10131_v58 = vld [vmem:[#allocation39_spill] sm:$0xff] }
 0x2fe   : > { %v6787_v50 = vpop.f32.mrb[140].mxu1  ;;  %v2648_v33 = vpop.f32.mrb[176].mxu0 }
 0x2ff   : > { %v2911_v28 = vpop.f32.mrb[141].mxu1  ;;  %v2649_v39 = vpop.f32.mrb[177].mxu0 }
 0x300   : > { %v6788_v9 = vpop.f32.mrb[142].mxu1  ;;  %v2650_v32 = vpop.f32.mrb[178].mxu0 }
 0x301   : > { %v2914_v55 = vpop.f32.mrb[143].mxu1  ;;  %v2651_v13 = vpop.f32.mrb[179].mxu0 }
 0x303   : > { %3478 = vmatmul.mubr.bf16.gmra.mrb[248].mxu1 %v8453_v11  ;;  %6874 = vmatmul.mubr.bf16.gmra.mrb[28].mxu0 %v10124_v19  ;;  %v10132_v19 = vld [vmem:[#allocation43_spill] sm:$0xff] }
 0x304   : > { %3483 = vmatprep.mubr.bf16.mxu1 %v10085_v21  ;;  %6877 = vmatprep.mubr.bf16.mxu0 %v10125_v17  ;;  %v10130_v21 = vld [vmem:[#allocation38_spill] sm:$0xff] }
 0x306   : > { %v6791_v57 = vpop.f32.mrb[144].mxu1  ;;  %v2654_v37 = vpop.f32.mrb[180].mxu0 }
 0x307   : > { %v2925_v25 = vpop.f32.mrb[145].mxu1  ;;  %v2655_v7 = vadd.f32 %v2654_v37, %v10126_v36  ;;  %v2656_v0 = vpop.f32.mrb[181].mxu0  ;;  %v10135_v37 = vld [vmem:[#allocation57_spill] sm:$0xff] }
 0x308   : > { %v6792_v44 = vpop.f32.mrb[146].mxu1  ;;  %v2657_v26 = vpop.f32.mrb[182].mxu0 }
 0x309   : > { %v8649_v59 = vadd.f32 %v2911_v28, %v2655_v7  ;;  %v2928_v24 = vpop.f32.mrb[147].mxu1  ;;  %v2658_v54 = vadd.f32 %v2657_v26, %v10128_v23  ;;  %v2659_v11 = vpop.f32.mrb[183].mxu0 }
 0x30b   : > { %10127 = vst [vmem:[#allocation49_spill] sm:$0xff] %v8649_v59  ;;  %v8652_v20 = vadd.f32 %v2914_v55, %v2658_v54  ;;  %3484 = vmatmul.mubr.bf16.gmra.mrb[252].mxu1 %v8463_v27  ;;  %6878 = vmatmul.mubr.bf16.gmra.mrb[32].mxu0 %v10130_v21  ;;  %v10133_v55 = vld [vmem:[#allocation42_spill] sm:$0xff]  ;;  %v10134_v27 = vld [vmem:[#allocation41_spill] sm:$0xff] }
 0x30c   : > { %3491 = vmatprep.mubr.bf16.mxu1 %v10088_v3  ;;  %6881 = vmatprep.mubr.bf16.mxu0 %v10131_v58  ;;  %v10137_v54 = vld [vmem:[#allocation58_spill] sm:$0xff] }
 0x30d   : > { %10129 = vst [vmem:[#allocation7_spill] sm:$0xff] %v8652_v20 }
 0x30e   : > { %v6795_v15 = vpop.f32.mrb[148].mxu1  ;;  %v2662_v50 = vpop.f32.mrb[184].mxu0 }
 0x30f   : > { %v2939_v33 = vpop.f32.mrb[149].mxu1  ;;  %v2663_v39 = vpop.f32.mrb[185].mxu0  ;;  %v10140_v15 = vld [vmem:[#allocation45_spill] sm:$0xff]  ;;  %v10141_v50 = vld [vmem:[#allocation52_spill] sm:$0xff] }
 0x310   : > { %v6796_v28 = vpop.f32.mrb[150].mxu1  ;;  %v2664_v9 = vpop.f32.mrb[186].mxu0  ;;  %v1431_v39 = vrot.slane %v10141_v50, 1 }
 0x311   : > { %v2942_v32 = vpop.f32.mrb[151].mxu1  ;;  %v2665_v13 = vpop.f32.mrb[187].mxu0 }
 0x313   : > { %3492 = vmatmul.mubr.bf16.gmra.mrb[0].mxu1 %v10132_v19  ;;  %6882 = vmatmul.mubr.bf16.gmra.mrb[36].mxu0 %v10133_v55 }
 0x314   : > { %3497 = vmatprep.mubr.bf16.mxu1 %v8089_v53  ;;  %6885 = vmatprep.mubr.bf16.mxu0 %v10134_v27  ;;  %v10139_v53 = vld [vmem:[#allocation44_spill] sm:$0xff] }
 0x316   : > { %v6799_v17 = vpop.f32.mrb[152].mxu1  ;;  %v2668_v3 = vpop.f32.mrb[188].mxu0 }
 0x317   : > { %v8662_v57 = vpop.f32.mrb[153].mxu1  ;;  %v2669_v36 = vadd.f32 %v2668_v3, %v10135_v37  ;;  %v2670_v7 = vpop.f32.mrb[189].mxu0  ;;  %v1323_v17 = vld [vmem:[#allocation2 + $0x120] sm:$0x1] }
 0x318   : > { %v6800_v0 = vpop.f32.mrb[154].mxu1  ;;  %v2671_v44 = vpop.f32.mrb[190].mxu0  ;;  %v1433_v37 = vrot.slane %v1323_v17, 1 }
 0x319   : > { %v8665_v26 = vadd.f32 %v2925_v25, %v2669_v36  ;;  %v2956_v23 = vpop.f32.mrb[155].mxu1  ;;  %v2672_v11 = vadd.f32 %v2671_v44, %v10137_v54  ;;  %v2673_v21 = vpop.f32.mrb[191].mxu0  ;;  %v10144_v44 = vld [vmem:[#allocation33_spill] sm:$0xff] }
 0x31b   : > { %10136 = vst [vmem:[#allocation8_spill] sm:$0xff] %v8665_v26  ;;  %v8668_v58 = vadd.f32 %v2928_v24, %v2672_v11  ;;  %3498 = vmatmul.mubr.bf16.gmra.mrb[4].mxu1 %v8487_v35  ;;  %6886 = vmatmul.mubr.bf16.gmra.mrb[40].mxu0 %v10139_v53  ;;  %v10142_v35 = vld [vmem:[#allocation47_spill] sm:$0xff] }
 0x31c   : > { %3505 = vmatprep.mubr.bf16.mxu1 %v8111_v2  ;;  %6889 = vmatprep.mubr.bf16.mxu0 %v10140_v15  ;;  %v1432_v3 = vsel %vm1361_vm6, %v10142_v35, %v1431_v39  ;;  %v10143_v2 = vld [vmem:[#allocation48_spill] sm:$0xff]  ;;  %v1434_v15 = vsel %vm1361_vm6, %v1431_v39, %v1433_v37 }
 0x31d   : > { %10138 = vst [vmem:[#allocation9_spill] sm:$0xff] %v8668_v58  ;;  %v10148_v37 = vld [vmem:[#allocation40_spill] sm:$0xff] }
 0x31e   : > { %v6803_v28 = vpop.f32.mrb[156].mxu1  ;;  %v2676_v9 = vpop.f32.mrb[192].mxu0 }
 0x31f   : > { %v8675_v25 = vpop.f32.mrb[157].mxu1  ;;  %v2677_v13 = vpop.f32.mrb[193].mxu0  ;;  %v10146_v28 = vld [vmem:[#allocation60_spill] sm:$0xff] }
 0x320   : > { %v6804_v19 = vpop.f32.mrb[158].mxu1  ;;  %v2678_v55 = vpop.f32.mrb[194].mxu0 }
 0x321   : > { %v8677_v27 = vpop.f32.mrb[159].mxu1  ;;  %v2679_v24 = vpop.f32.mrb[195].mxu0 }
 0x323   : > { %3506 = vmatmul.mubr.bf16.gmra.mrb[8].mxu1 %v8499_v10  ;;  %6890 = vmatmul.mubr.bf16.gmra.mrb[44].mxu0 %v10143_v2 }
 0x324   : > { %3511 = vmatprep.mubr.bf16.mxu1 %v8122_v12  ;;  %6893 = vmatprep.mubr.bf16.mxu0 %v1432_v3 }
 0x326   : > { %v6807_v36 = vpop.f32.mrb[160].mxu1  ;;  %v2682_v7 = vpop.f32.mrb[196].mxu0 }
 0x327   : > { %v8684_v0 = vpop.f32.mrb[161].mxu1  ;;  %v2683_v54 = vadd.f32 %v2682_v7, %v10144_v44  ;;  %v2684_v11 = vpop.f32.mrb[197].mxu0 }
 0x328   : > { %v6808_v21 = vpop.f32.mrb[162].mxu1  ;;  %v2685_v53 = vpop.f32.mrb[198].mxu0 }
 0x329   : > { %v8688_v50 = vadd.f32 %v2939_v33, %v2683_v54  ;;  %v8690_v10 = vpop.f32.mrb[163].mxu1  ;;  %v2686_v9 = vadd.f32 %v2685_v53, %v10146_v28  ;;  %v2687_v12 = vpop.f32.mrb[199].mxu0  ;;  %v10150_v21 = vld [vmem:[#allocation62_spill] sm:$0xff] }
 0x32b   : > { %10145 = vst [vmem:[#allocation10_spill] sm:$0xff] %v8688_v50  ;;  %v8693_v13 = vadd.f32 %v2942_v32, %v2686_v9  ;;  %3512 = vmatmul.mubr.bf16.gmra.mrb[12].mxu1 %v8509_v40  ;;  %6894 = vmatmul.mubr.bf16.gmra.mrb[48].mxu0 %v1434_v15 }
 0x32c   : > { %3519 = vmatprep.mubr.bf16.mxu1 %v8136_v6 }
 0x32d   : > { %10147 = vst [vmem:[#allocation13_spill] sm:$0xff] %v8693_v13 }
 0x32e   : > { %v6811_v19 = vpop.f32.mrb[164].mxu1  ;;  %v2690_v55 = vpop.f32.mrb[200].mxu0 }
 0x32f   : > { %v8697_v24 = vpop.f32.mrb[165].mxu1  ;;  %v2691_v17 = vpop.f32.mrb[201].mxu0 }
 0x330   : > { %v6812_v39 = vpop.f32.mrb[166].mxu1  ;;  %v2692_v33 = vpop.f32.mrb[202].mxu0 }
 0x331   : > { %v8699_v35 = vpop.f32.mrb[167].mxu1  ;;  %v2693_v3 = vpop.f32.mrb[203].mxu0  ;;  %v10152_v39 = vld [vmem:[#allocation50_spill] sm:$0xff] }
 0x333   : > { %3520 = vmatmul.mubr.bf16.gmra.mrb[16].mxu1 %v8521_v5 }
 0x334   : > { %3525 = vmatprep.mubr.bf16.mxu1 %v8148_v61 }
 0x336   : > { %v6815_v32 = vpop.f32.mrb[168].mxu1  ;;  %v2696_v2 = vpop.f32.mrb[204].mxu0 }
 0x337   : > { %v8703_v40 = vpop.f32.mrb[169].mxu1  ;;  %v2697_v6 = vadd.f32 %v2696_v2, %v10148_v37  ;;  %v2698_v36 = vpop.f32.mrb[205].mxu0 }
 0x338   : > { %v6816_v7 = vpop.f32.mrb[170].mxu1  ;;  %v2699_v44 = vpop.f32.mrb[206].mxu0  ;;  %v10154_v36 = vld [vmem:[#allocation63_spill] sm:$0xff] }
 0x339   : > { %v8707_v54 = vadd.f32 %v8662_v57, %v2697_v6  ;;  %v8709_v11 = vpop.f32.mrb[171].mxu1  ;;  %v2700_v53 = vadd.f32 %v2699_v44, %v10150_v21  ;;  %v2701_v15 = vpop.f32.mrb[207].mxu0  ;;  %v8727_v21 = vld [vmem:[#allocation2 + $0x128] sm:$0xff] }
 0x33b   : > { %10149 = vst [vmem:[#allocation12_spill] sm:$0xff] %v8707_v54  ;;  %v8712_v5 = vadd.f32 %v2956_v23, %v2700_v53  ;;  %3526 = vmatmul.mubr.bf16.gmra.mrb[20].mxu1 %v8533_v14  ;;  %v1203_v53 = vshll.u32 %v8727_v21, 16 }
 0x33c   : > { %3533 = vmatprep.mubr.bf16.mxu1 %v10091_v41 }
 0x33d   : > { %10151 = vst [vmem:[#allocation14_spill] sm:$0xff] %v8712_v5 }
 0x33e   : > { %v8716_v61 = vpop.f32.mrb[172].mxu1  ;;  %v2704_v28 = vpop.f32.mrb[208].mxu0 }
 0x33f   : > { %v3347_v9 = vpop.f32.mrb[173].mxu1  ;;  %v2705_v12 = vpop.f32.mrb[209].mxu0  ;;  %v10156_v28 = vld [vmem:[#allocation51_spill] sm:$0xff] }
 0x340   : > { %v8718_v19 = vpop.f32.mrb[174].mxu1  ;;  %v2706_v57 = vpop.f32.mrb[210].mxu0  ;;  %v10157_v9 = vld [vmem:[#allocation46_spill] sm:$0xff]  ;;  %v8736_v12 = vrot.slane %v1203_v53, 1 }
 0x341   : > { %v3350_v55 = vpop.f32.mrb[175].mxu1  ;;  %v2707_v17 = vpop.f32.mrb[211].mxu0 }
 0x342   : > { %10158 = vst [vmem:[#allocation17_spill] sm:$0xff] %v8736_v12 }
 0x343   : > { %3534 = vmatmul.mubr.bf16.gmra.mrb[24].mxu1 %v8545_v31  ;;  %v1199_v31 = vshrl.u32 %v8727_v21, 16 }
 0x344   : > { %3539 = vmatprep.mubr.bf16.mxu1 %v10152_v39 }
 0x346   : > { %v3353_v23 = vpop.f32.mrb[176].mxu1  ;;  %v2710_v33 = vpop.f32.mrb[212].mxu0 }
 0x347   : > { %v3354_v3 = vpop.f32.mrb[177].mxu1  ;;  %v2711_v14 = vadd.f32 %v2710_v33, %v8478_v38  ;;  %v2712_v41 = vpop.f32.mrb[213].mxu0  ;;  %v7087_v38 = vld [vmem:[#allocation2 + $0x100] sm:$0xff] }
 0x348   : > { %v3355_v32 = vpop.f32.mrb[178].mxu1  ;;  %v2713_v2 = vpop.f32.mrb[214].mxu0  ;;  %v7045_v41 = vld [vmem:[%s9935_s5] sm:$0xff]  }
 0x349   : > { %v8724_v37 = vadd.f32 %v8675_v25, %v2711_v14  ;;  %v3356_v6 = vpop.f32.mrb[179].mxu1  ;;  %v2714_v7 = vadd.f32 %v2713_v2, %v10154_v36  ;;  %v2715_v44 = vpop.f32.mrb[215].mxu0  ;;  %v1201_v25 = vor.u32 %v1199_v31, %v10157_v9  ;;  %v7088_v32 = vld [vmem:[#allocation2 + $0x108] sm:$0xff]  ;;  %6116 = vmatpush1.bf16.msra.mxu0 %v7045_v41 }
 0x34a   : > { %v7046_v2 = vld [vmem:[%s9935_s5 + $0x8] sm:$0xff]   ;;  %6117 = vmatprep.subr.bf16.mxu0 %v8727_v21 }
 0x34b   : > { %10153 = vst [vmem:[#allocation15_spill] sm:$0xff] %v8724_v37  ;;  %v8732_v15 = vadd.f32 %v8677_v27, %v2714_v7  ;;  %3540 = vmatmul.mubr.bf16.gmra.mrb[28].mxu1 %v7087_v38  ;;  %v1206_v27 = vsel %vm922_vm5, %v1201_v25, %v8736_v12 }
 0x34c   : > { %3547 = vmatprep.mubr.bf16.mxu1 %v10156_v28  ;;  %v7047_v28 = vld [vmem:[%s9935_s5 + $0x10] sm:$0xff]  }
 0x34d   : > { %10155 = vst [vmem:[#allocation16_spill] sm:$0xff] %v8732_v15  ;;  %6118 = vmatpush1.bf16.msra.mxu0 %v7046_v2 }
 0x34e   : > { %v8738_v57 = vpop.f32.mrb[180].mxu1  ;;  %v2718_v55 = vpop.f32.mrb[216].mxu0  ;;  %6119 = vmatprep.subr.bf16.mxu0 %v8727_v21 }
 0x34f   : > { %v3361_v17 = vpop.f32.mrb[181].mxu1  ;;  %v2719_v39 = vpop.f32.mrb[217].mxu0 }
 0x350   : > { %v8740_v23 = vpop.f32.mrb[182].mxu1  ;;  %v2720_v33 = vpop.f32.mrb[218].mxu0 }
 0x351   : > { %v3364_v3 = vpop.f32.mrb[183].mxu1  ;;  %v2721_v14 = vpop.f32.mrb[219].mxu0  ;;  %6120 = vmatpush1.bf16.msra.mxu0 %v7047_v28 }
 0x352   : > { %6121 = vmatprep.subr.bf16.mxu0 %v8727_v21 }
 0x353   : > { %3548 = vmatmul.mubr.bf16.gmra.mrb[32].mxu1 %v7088_v32  ;;  %v7049_v32 = vld [vmem:[%s9935_s5 + $0x20] sm:$0xff]  }
 0x354   : > { %3553 = vmatprep.mubr.bf16.mxu1 %v1206_v27 }
 0x356   : > { %v3367_v6 = vpop.f32.mrb[184].mxu1  ;;  %v2724_v36 = vpop.f32.mrb[220].mxu0 }
 0x357   : > { %v3368_v7 = vpop.f32.mrb[185].mxu1  ;;  %v2725_v44 = vadd.f32 %v2724_v36, %v8504_v1  ;;  %v2726_v31 = vpop.f32.mrb[221].mxu0 }
 0x358   : > { %v3369_v53 = vpop.f32.mrb[186].mxu1  ;;  %v2727_v38 = vpop.f32.mrb[222].mxu0  ;;  %v7050_v31 = vld [vmem:[%s9935_s5 + $0x28] sm:$0xff]  }
 0x359   : > { %v8756_v9 = vadd.f32 %v8684_v0, %v2725_v44  ;;  %v3370_v25 = vpop.f32.mrb[187].mxu1  ;;  %v2728_v55 = vadd.f32 %v2727_v38, %v8506_v30  ;;  %v2729_v17 = vpop.f32.mrb[223].mxu0  ;;  %v7048_v0 = vld [vmem:[%s9935_s5 + $0x18] sm:$0xff]  }
 0x35a   : > { %6122 = vmatpush1.bf16.msra.mxu0 %v7048_v0 }
 0x35b   : > { %10159 = vst [vmem:[#allocation18_spill] sm:$0xff] %v8756_v9  ;;  %v8761_v39 = vadd.f32 %v8690_v10, %v2728_v55  ;;  %3554 = vmatmul.mubr.bf16.gmra.mrb[36].mxu1 %v8727_v21  ;;  %6123 = vmatprep.subr.bf16.mxu0 %v8727_v21 }
 0x35d   : > { %10160 = vst [vmem:[#allocation19_spill] sm:$0xff] %v8761_v39 }
 0x35e   : > { %v8765_v1 = vpop.f32.mrb[188].mxu1  ;;  %v2732_v33 = vpop.f32.mrb[224].mxu0  ;;  %6124 = vmatpush1.bf16.msra.mxu0 %v7049_v32 }
 0x35f   : > { %v3375_v3 = vpop.f32.mrb[189].mxu1  ;;  %v2733_v30 = vpop.f32.mrb[225].mxu0  ;;  %6125 = vmatprep.subr.bf16.mxu0 %v8727_v21 }
 0x360   : > { %v8770_v14 = vpop.f32.mrb[190].mxu1  ;;  %v2734_v27 = vpop.f32.mrb[226].mxu0 }
 0x361   : > { %v3378_v10 = vpop.f32.mrb[191].mxu1  ;;  %v2735_v41 = vpop.f32.mrb[227].mxu0 }
 0x362   : > { %6126 = vmatpush1.bf16.msra.mxu0 %v7050_v31  ;;  %v7157_v41 = vmov 1983009808  }
 0x363   : > { %6127 = vmatprep.subr.bf16.mxu0 %v8727_v21  ;;  %v3962_v32 = vunpack.c.l.s4 %v7157_v41 }
 0x366   : > { %v3381_v2 = vpop.f32.mrb[192].mxu1  ;;  %v2738_v6 = vpop.f32.mrb[228].mxu0 }
 0x367   : > { %v3382_v36 = vpop.f32.mrb[193].mxu1  ;;  %v2739_v7 = vadd.f32 %v2738_v6, %v8527_v22  ;;  %v2740_v44 = vpop.f32.mrb[229].mxu0  ;;  %v7051_v22 = vld [vmem:[%s9935_s5 + $0x30] sm:$0xff]   ;;  %v3964_v2 = vlaneseq }
 0x368   : > { %v3383_v53 = vpop.f32.mrb[194].mxu1  ;;  %v2741_v38 = vpop.f32.mrb[230].mxu0  ;;  %6128 = vmatpush1.bf16.msra.mxu0 %v7051_v22 }
 0x369   : > { %v8782_v28 = vadd.f32 %v8697_v24, %v2739_v7  ;;  %v3384_v25 = vpop.f32.mrb[195].mxu1  ;;  %v2742_v55 = vadd.f32 %v2741_v38, %v8530_v34  ;;  %v2743_v17 = vpop.f32.mrb[231].mxu0  ;;  %6129 = vmatprep.subr.bf16.mxu0 %v8727_v21 }
 0x36b   : > { %10161 = vst [vmem:[#allocation20_spill] sm:$0xff] %v8782_v28  ;;  %v8786_v33 = vadd.f32 %v8699_v35, %v2742_v55 }
 0x36d   : > { %10162 = vst [vmem:[#allocation22_spill] sm:$0xff] %v8786_v33 }
 0x36e   : > { %v8792_v0 = vpop.f32.mrb[196].mxu1  ;;  %v2746_v3 = vpop.f32.mrb[232].mxu0 }
 0x36f   : > { %v3389_v30 = vpop.f32.mrb[197].mxu1  ;;  %v2747_v24 = vpop.f32.mrb[233].mxu0  ;;  %v3963_v3 = vunpack.c.0.s8 %v3962_v32 }
 0x370   : > { %v8794_v27 = vpop.f32.mrb[198].mxu1  ;;  %v2748_v34 = vpop.f32.mrb[234].mxu0  ;;  %v3965_v30 = vshrl.u32 %v3964_v2, 7 }
 0x371   : > { %v3392_v35 = vpop.f32.mrb[199].mxu1  ;;  %v2749_v10 = vpop.f32.mrb[235].mxu0  ;;  %v4809_v34 = vld [vmem:[%s7268_s21] sm:$0xff] }
 0x372   : > { %v4811_v35 = vld [vmem:[%s7268_s21 + $0x10] sm:$0xff]  ;;  %v4841_v41 = vsel %vm334_vm1, %v4809_v34, 0.0 }
 0x373   : > { %v4815_v10 = vld [vmem:[%s7268_s21 + $0x30] sm:$0xff] }
 0x376   : > { %v3395_v6 = vpop.f32.mrb[200].mxu1  ;;  %v2752_v36 = vpop.f32.mrb[236].mxu0 }
 0x377   : > { %v3396_v7 = vpop.f32.mrb[201].mxu1  ;;  %v2753_v44 = vadd.f32 %v2752_v36, %v8551_v56  ;;  %v2754_v31 = vpop.f32.mrb[237].mxu0  ;;  %v4813_v56 = vld [vmem:[%s7268_s21 + $0x20] sm:$0xff] }
 0x378   : > { %v3397_v53 = vpop.f32.mrb[202].mxu1  ;;  %v2755_v38 = vpop.f32.mrb[238].mxu0  ;;  %v4847_v6 = vsel %vm334_vm1, %v4813_v56, 0.0  ;;  %v7052_v7 = vld [vmem:[%s9935_s5 + $0x38] sm:$0xff]  }
 0x379   : > { %v8799_v25 = vadd.f32 %v8703_v40, %v2753_v44  ;;  %v3398_v55 = vpop.f32.mrb[203].mxu1  ;;  %v2756_v17 = vadd.f32 %v2755_v38, %v8554_v51  ;;  %v2757_v22 = vpop.f32.mrb[239].mxu0  ;;  %v4842_v40 = vsel %vm334_vm1, %v4811_v35, 0.0  ;;  %v8812_v51 = vsub.s32 %v3963_v3, %v3965_v30  ;;  %v4810_v38 = vld [vmem:[%s7268_s21 + $0x8] sm:$0xff]  ;;  %6130 = vmatpush1.bf16.msra.mxu0 %v7052_v7  ;;  %v4816_v35 = vld [vmem:[%s7268_s21 + $0x38] sm:$0xff] }
 0x37a   : > { %v4843_v32 = vadd.f32 %v4842_v40, %v4841_v41  ;;  %v4812_v55 = vld [vmem:[%s7268_s21 + $0x18] sm:$0xff]  ;;  %v4844_v56 = vsel %vm334_vm1, %v4810_v38, 0.0  ;;  %6131 = vmatprep.subr.bf16.mxu0 %v8727_v21  ;;  %v7053_v7 = vld [vmem:[%s9935_s5 + $0x40] ss:$0 sps:$4 sm:$0xff]  }
 0x37b   : > { %10163 = vst [vmem:[#allocation56_spill] sm:$0xff] %v8799_v25  ;;  %v8803_v24 = vadd.f32 %v8709_v11, %v2756_v17  ;;  %v4848_v11 = vsel %vm334_vm1, %v4815_v10, 0.0  ;;  %v4814_v17 = vld [vmem:[%s7268_s21 + $0x28] sm:$0xff]  ;;  %v4845_v10 = vsel %vm334_vm1, %v4812_v55, 0.0 }
 0x37c   : > { %v4849_v44 = vadd.f32 %v4848_v11, %v4847_v6  ;;  %v4905_v22 = vcombine.high %v4843_v32, %v4843_v32  ;;  %v4912_v3 = vrot.slane %v4843_v32, %v8812_v51  ;;  %v4850_v41 = vsel %vm334_vm1, %v4814_v17, 0.0 }
 0x37d   : > { %10164 = vst [vmem:[#allocation23_spill] sm:$0xff] %v8803_v24 }
 0x37e   : > { %v8815_v2 = vpop.f32.mrb[204].mxu1  ;;  %v2760_v36 = vpop.f32.mrb[240].mxu0  ;;  %v4939_v40 = vcombine.high %v4849_v44, %v4849_v44  ;;  %v4919_v32 = vrot.slane %v4905_v22, %v8812_v51  ;;  %v8837_v55 = vrot.slane %v4849_v44, %v8812_v51  ;;  %v6113_v22 = vsel %vm383_vm0, %v7053_v7, 0 }
 0x37f   : > { %v3403_v31 = vpop.f32.mrb[205].mxu1  ;;  %v2761_v53 = vpop.f32.mrb[241].mxu0  ;;  %v4846_v36 = vadd.f32 %v4845_v10, %v4844_v56  ;;  %6132 = vmatpush1.bf16.msra.mxu0 %v6113_v22 }
 0x380   : > { %v8824_v30 = vpop.f32.mrb[206].mxu1  ;;  %v2762_v34 = vpop.f32.mrb[242].mxu0  ;;  %v4851_v31 = vsel %vm334_vm1, %v4816_v35, 0.0  ;;  %v4920_v53 = vcombine.high %v4912_v3, %v4912_v3  ;;  %v8840_v17 = vrot.slane %v4939_v40, %v8812_v51  ;;  %v5242_v35 = vsel %vm5241_vm7, %v4912_v3, 0.0 }
 0x381   : > { %v3406_v6 = vpop.f32.mrb[207].mxu1  ;;  %v2763_v11 = vpop.f32.mrb[243].mxu0  ;;  %v4852_v38 = vadd.f32 %v4851_v31, %v4850_v41  ;;  %v4921_v34 = vcombine.high %v4919_v32, %v4919_v32  ;;  %v4922_v21 = vcombine.high %v4846_v36, %v4846_v36  ;;  %v4929_v56 = vrot.slane %v4846_v36, %v8812_v51 }
 0x382   : > { %v5243_v36 = vrot.slane %v5242_v35, 4  ;;  %v5249_v10 = vsel %vm5241_vm7, %v4920_v53, 0.0  ;;  %v5256_v12 = vsel %vm5241_vm7, %v4919_v32, 0.0  ;;  %v8869_v53 = vld [vmem:[%s9934_s4] ss:$0 sm:$0xff] }
 0x383   : > { %v4956_v44 = vcombine.high %v4852_v38, %v4852_v38  ;;  %v8850_v40 = vrot.slane %v4922_v21, %v8812_v51  ;;  %v4937_v6 = vcombine.high %v4929_v56, %v4929_v56  ;;  %v8853_v11 = vrot.slane %v4852_v38, %v8812_v51 }
 0x384   : > { %v5263_v41 = vsel %vm5241_vm7, %v4921_v34, 0.0  ;;  %v5244_v25 = vadd.f32 %v5243_v36, %v5242_v35  ;;  %v5270_v35 = vsel %vm5241_vm7, %v4929_v56, 0.0 }
 0x385   : > { %v8856_v7 = vrot.slane %v4956_v44, %v8812_v51  ;;  %v5264_v33 = vrot.slane %v5263_v41, 4  ;;  %v5277_v36 = vsel %vm5241_vm7, %v4937_v6, 0.0  ;;  %v5271_v37 = vrot.slane %v5270_v35, 4 }
 0x386   : > { %v3409_v31 = vpop.f32.mrb[208].mxu1  ;;  %v6835_v3 = vpop.f32.mrb[244].mxu0  ;;  %v5245_v39 = vrot.slane %v5244_v25, 2  ;;  %v5278_v34 = vrot.slane %v5277_v36, 4 }
 0x387   : > { %v3410_v22 = vpop.f32.mrb[209].mxu1  ;;  %v3602_v24 = vpop.f32.mrb[245].mxu0  ;;  %v5250_v31 = vrot.slane %v5249_v10, 4  ;;  %v5265_v9 = vadd.f32 %v5264_v33, %v5263_v41  ;;  %v5272_v13 = vadd.f32 %v5271_v37, %v5270_v35 }
 0x388   : > { %v3411_v3 = vpop.f32.mrb[210].mxu1  ;;  %v3603_v44 = vadd.f32 %v3602_v24, %v8716_v61  ;;  %v6836_v32 = vpop.f32.mrb[246].mxu0  ;;  %v5257_v22 = vrot.slane %v5256_v12, 4  ;;  %v5279_v6 = vadd.f32 %v5278_v34, %v5277_v36 }
 0x389   : > { %v3412_v21 = vpop.f32.mrb[211].mxu1  ;;  %v3605_v28 = vpop.f32.mrb[247].mxu0  ;;  %v5251_v38 = vadd.f32 %v5250_v31, %v5249_v10  ;;  %v5246_v32 = vadd.f32 %v5245_v39, %v5244_v25  ;;  %v5266_v10 = vrot.slane %v5265_v9, 2 }
 0x38a   : > { %v3825_v61 = vadd.f32 %v3603_v44, %v8567_v47  ;;  %v3606_v24 = vadd.f32 %v3605_v28, %v8718_v19  ;;  %v5258_v3 = vadd.f32 %v5257_v22, %v5256_v12  ;;  %v5273_v44 = vrot.slane %v5272_v13, 2 }
 0x38b   : > { %v5252_v15 = vrot.slane %v5251_v38, 2  ;;  %v5247_v31 = vrot.slane %v5246_v32, 1  ;;  %v5267_v28 = vadd.f32 %v5266_v10, %v5265_v9  ;;  %v5280_v22 = vrot.slane %v5279_v6, 2 }
 0x38c   : > { %v3864_v5 = vadd.f32 %v8869_v53, %v3825_v61  ;;  %v3826_v21 = vadd.f32 %v3606_v24, %v8570_v43  ;;  %v5259_v54 = vrot.slane %v5258_v3, 2  ;;  %v5274_v61 = vadd.f32 %v5273_v44, %v5272_v13 }
 0x38d   : > { %v5253_v56 = vadd.f32 %v5252_v15, %v5251_v38  ;;  %v8884_v41 = vadd.f32 %v5247_v31, %v5246_v32  ;;  %v5268_v35 = vrot.slane %v5267_v28, 1  ;;  %v5281_v24 = vadd.f32 %v5280_v22, %v5279_v6 }
 0x38e   : > { %v3896_v50 = vmax.f32 %v3864_v5, 0.0  ;;  %v8880_v47 = vadd.f32 %v8869_v53, %v3826_v21  ;;  %v8882_v19 = vpop.f32.mrb[212].mxu1  ;;  %v6839_v12 = vpop.f32.mrb[248].mxu0  ;;  %v5260_v39 = vadd.f32 %v5259_v54, %v5258_v3  ;;  %v5284_v3 = vsel %vm5241_vm7, %v8850_v40, 0.0 }
 0x38f   : > { %v3417_v33 = vpop.f32.mrb[213].mxu1  ;;  %v3616_v25 = vpop.f32.mrb[249].mxu0  ;;  %v5254_v43 = vrot.slane %v5253_v56, 1  ;;  %v5275_v31 = vrot.slane %v5274_v61, 1  ;;  %v5285_v12 = vrot.slane %v5284_v3, 4 }
 0x390   : > { %v3897_v15 = vmax.f32 %v8880_v47, 0.0  ;;  %v8887_v37 = vpop.f32.mrb[214].mxu1  ;;  %v3617_v5 = vadd.f32 %v3616_v25, %v8738_v57  ;;  %v6840_v38 = vpop.f32.mrb[250].mxu0  ;;  %v5261_v34 = vrot.slane %v5260_v39, 1  ;;  %v8898_v57 = vadd.f32 %v5268_v35, %v5267_v28 }
 0x391   : > { %v3420_v36 = vpop.f32.mrb[215].mxu1  ;;  %v3619_v54 = vpop.f32.mrb[251].mxu0  ;;  %v8890_v9 = vadd.f32 %v5254_v43, %v5253_v56  ;;  %v5282_v47 = vrot.slane %v5281_v24, 1  ;;  %v10168_v56 = vcombine.high %v8850_v40, %v8850_v40  ;;  %v5286_v28 = vadd.f32 %v5285_v12, %v5284_v3 }
 0x392   : > { %v3827_v32 = vadd.f32 %v3617_v5, %v8578_v18  ;;  %v3620_v21 = vadd.f32 %v3619_v54, %v8740_v23  ;;  %v8896_v10 = vadd.f32 %v5261_v34, %v5260_v39  ;;  %10167 = vst [vmem:[#allocation11_spill] sm:$0xff] %v8898_v57  ;;  %v5298_v18 = vsel %vm5241_vm7, %v8837_v55, 0.0 }
 0x393   : > { %10165 = vst [vmem:[#allocation27_spill] sm:$0xff] %v8890_v9  ;;  %v5291_v13 = vsel %vm5241_vm7, %v10168_v56, 0.0  ;;  %v8908_v23 = vadd.f32 %v5275_v31, %v5274_v61  ;;  %v8910_v39 = vadd.f32 %v5282_v47, %v5281_v24  ;;  %v5299_v43 = vrot.slane %v5298_v18, 4 }
 0x394   : > { %10166 = vst [vmem:[#allocation25_spill] sm:$0xff] %v8896_v10  ;;  %v3866_v6 = vadd.f32 %v8869_v53, %v3827_v32  ;;  %v3828_v33 = vadd.f32 %v3620_v21, %v8582_v52  ;;  %v5292_v25 = vrot.slane %v5291_v13, 4  ;;  %v10171_v34 = vcombine.high %v8837_v55, %v8837_v55 }
 0x395   : > { %10169 = vst [vmem:[#allocation53_spill] sm:$0xff] %v8908_v23  ;;  %10170 = vst [vmem:[#allocation59_spill] sm:$0xff] %v8910_v39  ;;  %v5287_v54 = vrot.slane %v5286_v28, 2  ;;  %v5300_v61 = vadd.f32 %v5299_v43, %v5298_v18  ;;  %v8919_v24 = vsel %vm5241_vm7, %v8840_v17, 0.0 }
 0x396   : > { %v3898_v44 = vmax.f32 %v3866_v6, 0.0  ;;  %v3867_v22 = vadd.f32 %v8869_v53, %v3828_v33  ;;  %v3423_v40 = vpop.f32.mrb[216].mxu1  ;;  %v6843_v5 = vpop.f32.mrb[252].mxu0  ;;  %v5293_v38 = vadd.f32 %v5292_v25, %v5291_v13  ;;  %v5305_v52 = vsel %vm5241_vm7, %v10171_v34, 0.0 }
 0x397   : > { %v3424_v35 = vpop.f32.mrb[217].mxu1  ;;  %v3630_v36 = vpop.f32.mrb[253].mxu0  ;;  %v5306_v32 = vrot.slane %v5305_v52, 4  ;;  %v8922_v6 = vadd.f32 %v5287_v54, %v5286_v28  ;;  %v5301_v33 = vrot.slane %v5300_v61, 2 }
 0x398   : > { %v3928_v3 = vadd.f32 %v3898_v44, %v3896_v50  ;;  %v3899_v21 = vmax.f32 %v3867_v22, 0.0  ;;  %v3425_v31 = vpop.f32.mrb[218].mxu1  ;;  %v3631_v47 = vadd.f32 %v3630_v36, %v8765_v1  ;;  %v6844_v12 = vpop.f32.mrb[254].mxu0  ;;  %v5294_v56 = vrot.slane %v5293_v38, 2 }
 0x399   : > { %v3426_v13 = vpop.f32.mrb[219].mxu1  ;;  %v3633_v55 = vpop.f32.mrb[255].mxu0  ;;  %v8924_v25 = vadd.f32 %v5306_v32, %v5305_v52  ;;  %v8933_v34 = vadd.f32 %v5301_v33, %v5300_v61 }
 0x39a   : > { %v3960_v43 = vcombine.high %v3928_v3, %v3928_v3  ;;  %v3967_v40 = vrot.slane %v3928_v3, %v8812_v51  ;;  %v3929_v5 = vadd.f32 %v3899_v21, %v3897_v15  ;;  %v3829_v50 = vadd.f32 %v3631_v47, %v8589_v42 }
 0x39b   : > { %v3634_v44 = vadd.f32 %v3633_v55, %v8770_v14  ;;  %v8931_v22 = vadd.f32 %v5294_v56, %v5293_v38 }
 0x39c   : > { %v3974_v28 = vrot.slane %v3960_v43, %v8812_v51  ;;  %v3975_v52 = vcombine.high %v3967_v40, %v3967_v40  ;;  %v4297_v35 = vsel %vm4296_vm8, %v3967_v40, 0.0  ;;  %v3977_v36 = vcombine.high %v3929_v5, %v3929_v5 }
 0x39d   : > { %v4298_v54 = vrot.slane %v4297_v35, 4  ;;  %v3984_v32 = vrot.slane %v3929_v5, %v8812_v51  ;;  %v8939_v15 = vadd.f32 %v8869_v53, %v3829_v50  ;;  %v8942_v42 = vadd.f32 %v3634_v44, %v8592_v48 }
 0x39e   : > { %v3976_v14 = vcombine.high %v3974_v28, %v3974_v28  ;;  %v4304_v38 = vsel %vm4296_vm8, %v3975_v52, 0.0  ;;  %v4311_v61 = vsel %vm4296_vm8, %v3974_v28, 0.0  ;;  %v3991_v3 = vrot.slane %v3977_v36, %v8812_v51  ;;  %v8947_v21 = vpop.f32.mrb[220].mxu1  ;;  %v6847_v31 = vpop.f32.mrb[0].mxu0 }
 0x39f   : > { %v4299_v47 = vadd.f32 %v4298_v54, %v4297_v35  ;;  %v4305_v12 = vrot.slane %v4304_v38, 4  ;;  %v4312_v56 = vrot.slane %v4311_v61, 4  ;;  %v3992_v13 = vcombine.high %v3984_v32, %v3984_v32  ;;  %v3431_v55 = vpop.f32.mrb[221].mxu1  ;;  %v8949_v33 = vpop.f32.mrb[1].mxu0 }
 0x3a0   : > { %v4318_v48 = vsel %vm4296_vm8, %v3976_v14, 0.0  ;;  %v3993_v43 = vcombine.high %v3991_v3, %v3991_v3  ;;  %v4325_v40 = vsel %vm4296_vm8, %v3984_v32, 0.0  ;;  %v4339_v5 = vsel %vm4296_vm8, %v3991_v3, 0.0  ;;  %v8954_v50 = vpop.f32.mrb[222].mxu1  ;;  %v6848_v44 = vpop.f32.mrb[2].mxu0 }
 0x3a1   : > { %v4300_v28 = vrot.slane %v4299_v47, 2  ;;  %v4306_v52 = vadd.f32 %v4305_v12, %v4304_v38  ;;  %v4313_v36 = vadd.f32 %v4312_v56, %v4311_v61  ;;  %v4319_v35 = vrot.slane %v4318_v48, 4  ;;  %v3434_v54 = vpop.f32.mrb[223].mxu1  ;;  %v8956_v31 = vpop.f32.mrb[3].mxu0 }
 0x3a2   : > { %v4326_v55 = vrot.slane %v4325_v40, 4  ;;  %v4332_v18 = vsel %vm4296_vm8, %v3992_v13, 0.0  ;;  %v4340_v14 = vrot.slane %v4339_v5, 4  ;;  %v4346_v1 = vsel %vm4296_vm8, %v3993_v43, 0.0 }
 0x3a3   : > { %v4301_v32 = vadd.f32 %v4300_v28, %v4299_v47  ;;  %v4307_v58 = vrot.slane %v4306_v52, 2  ;;  %v4314_v3 = vrot.slane %v4313_v36, 2  ;;  %v4320_v26 = vadd.f32 %v4319_v35, %v4318_v48 }
 0x3a4   : > { %v4327_v44 = vadd.f32 %v4326_v55, %v4325_v40  ;;  %v4333_v20 = vrot.slane %v4332_v18, 4  ;;  %v4341_v38 = vadd.f32 %v4340_v14, %v4339_v5  ;;  %v4347_v61 = vrot.slane %v4346_v1, 4 }
 0x3a5   : > { %v4302_v12 = vrot.slane %v4301_v32, 1  ;;  %v4308_v56 = vadd.f32 %v4307_v58, %v4306_v52  ;;  %v4315_v54 = vadd.f32 %v4314_v3, %v4313_v36  ;;  %v4321_v59 = vrot.slane %v4320_v26, 2 }
 0x3a6   : > { %v4328_v39 = vrot.slane %v4327_v44, 2  ;;  %v4334_v13 = vadd.f32 %v4333_v20, %v4332_v18  ;;  %v4342_v23 = vrot.slane %v4341_v38, 2  ;;  %v4348_v57 = vadd.f32 %v4347_v61, %v4346_v1  ;;  %v3437_v43 = vpop.f32.mrb[224].mxu1  ;;  %v6851_v47 = vpop.f32.mrb[4].mxu0 }
 0x3a7   : > { %v4303_v28 = vadd.f32 %v4302_v12, %v4301_v32  ;;  %v4309_v10 = vrot.slane %v4308_v56, 1  ;;  %v4316_v48 = vrot.slane %v4315_v54, 1  ;;  %v4322_v35 = vadd.f32 %v4321_v59, %v4320_v26  ;;  %v3438_v40 = vpop.f32.mrb[225].mxu1  ;;  %v3658_v5 = vpop.f32.mrb[5].mxu0 }
 0x3a8   : > { %v4329_v55 = vadd.f32 %v4328_v39, %v4327_v44  ;;  %v4335_v14 = vrot.slane %v4334_v13, 2  ;;  %v4343_v9 = vadd.f32 %v4342_v23, %v4341_v38  ;;  %v4349_v58 = vrot.slane %v4348_v57, 2  ;;  %v3439_v52 = vpop.f32.mrb[226].mxu1  ;;  %v6852_v36 = vpop.f32.mrb[6].mxu0 }
 0x3a9   : > { %v4310_v3 = vadd.f32 %v4309_v10, %v4308_v56  ;;  %v4317_v20 = vadd.f32 %v4316_v48, %v4315_v54  ;;  %v4323_v18 = vrot.slane %v4322_v35, 1  ;;  %v4745_v1 = vmul.f32 0.25, %v4303_v28  ;;  %v3440_v61 = vpop.f32.mrb[227].mxu1  ;;  %v3661_v32 = vpop.f32.mrb[7].mxu0 }
 0x3aa   : > { %v4330_v12 = vrot.slane %v4329_v55, 1  ;;  %v4336_v43 = vadd.f32 %v4335_v14, %v4334_v13  ;;  %v4344_v59 = vrot.slane %v4343_v9, 1  ;;  %v4350_v26 = vadd.f32 %v4349_v58, %v4348_v57 }
 0x3ab   : > { %v4324_v47 = vadd.f32 %v4323_v18, %v4322_v35  ;;  %v4746_v40 = vmul.f32 0.25, %v4310_v3  ;;  %v4747_v39 = vmul.f32 0.25, %v4317_v20  ;;  %v3900_v23 = vmax.f32 %v8939_v15, 0.0 }
 0x3ac   : > { %v4331_v44 = vadd.f32 %v4330_v12, %v4329_v55  ;;  %v4337_v38 = vrot.slane %v4336_v43, 1  ;;  %v4345_v52 = vadd.f32 %v4344_v59, %v4343_v9  ;;  %v4351_v36 = vrot.slane %v4350_v26, 1 }
 0x3ad   : > { %v4748_v10 = vmul.f32 0.25, %v4324_v47  ;;  %v5819_v56 = vsel %vm5818_vm9, %v4746_v40, %v4745_v1  ;;  %v3869_v54 = vadd.f32 %v8869_v53, %v8942_v42  ;;  %v3645_v13 = vadd.f32 %v8949_v33, %v8792_v0 }
 0x3ae   : > { %v5821_v57 = vsel %vm5820_vm10, %v4747_v39, %v5819_v56  ;;  %v4338_v28 = vadd.f32 %v4337_v38, %v4336_v43  ;;  %v4352_v48 = vadd.f32 %v4351_v36, %v4350_v26  ;;  %v4749_v35 = vmul.f32 0.25, %v4331_v44  ;;  %v8967_v14 = vpop.f32.mrb[228].mxu1  ;;  %v6855_v15 = vpop.f32.mrb[8].mxu0 }
 0x3af   : > { %v4751_v55 = vmul.f32 0.25, %v4345_v52  ;;  %v5823_v9 = vsel %vm5822_vm11, %v4748_v10, %v5821_v57  ;;  %v3901_v58 = vmax.f32 %v3869_v54, 0.0  ;;  %v3831_v3 = vadd.f32 %v3645_v13, %v8599_v49  ;;  %v3445_v20 = vpop.f32.mrb[229].mxu1  ;;  %v3672_v18 = vpop.f32.mrb[9].mxu0 }
 0x3b0   : > { %v4750_v42 = vmul.f32 0.25, %v4338_v28  ;;  %v4752_v1 = vmul.f32 0.25, %v4352_v48  ;;  %v5825_v0 = vsel %vm5824_vm12, %v4749_v35, %v5823_v9  ;;  %v3648_v33 = vadd.f32 %v8956_v31, %v8794_v27  ;;  %v8974_v61 = vpop.f32.mrb[230].mxu1  ;;  %v6856_v12 = vpop.f32.mrb[10].mxu0 }
 0x3b1   : > { %v3870_v43 = vadd.f32 %v8869_v53, %v3831_v3  ;;  %v3659_v59 = vadd.f32 %v3658_v5, %v8815_v2  ;;  %v3662_v26 = vadd.f32 %v3661_v32, %v8824_v30  ;;  %v3448_v47 = vpop.f32.mrb[231].mxu1  ;;  %v3673_v49 = vadd.f32 %v3672_v18, %v8882_v19  ;;  %v3675_v40 = vpop.f32.mrb[11].mxu0 }
 0x3b2   : > { %v5827_v39 = vsel %vm5826_vm13, %v4750_v42, %v5825_v0  ;;  %v3832_v44 = vadd.f32 %v3648_v33, %v8602_v4  ;;  %v3676_v38 = vadd.f32 %v3675_v40, %v8887_v37  ;;  %v10172_v27 = vrot.slane %v8922_v6, 1 }
 0x3b3   : > { %v5829_v52 = vsel %vm5828_vm14, %v4751_v55, %v5827_v39  ;;  %v3902_v2 = vmax.f32 %v3870_v43, 0.0  ;;  %v3833_v30 = vadd.f32 %v3659_v59, %v8608_v29  ;;  %v3834_v5 = vadd.f32 %v3662_v26, %v8610_v8 }
 0x3b4   : > { %v8986_v31 = vadd.f32 %v10172_v27, %v8922_v6  ;;  %v8992_v19 = vsel %vm5830_vm15, %v4752_v1, %v5829_v52  ;;  %v3871_v32 = vadd.f32 %v8869_v53, %v3832_v44  ;;  %v3835_v4 = vadd.f32 %v3673_v49, %v8617_v46 }
 0x3b5   : > { %v3836_v37 = vadd.f32 %v3676_v38, %v8620_v16  ;;  %v3930_v36 = vadd.f32 %v3902_v2, %v3900_v23  ;;  %v3872_v6 = vadd.f32 %v8869_v53, %v3833_v30  ;;  %v3873_v10 = vadd.f32 %v8869_v53, %v3834_v5 }
 0x3b6   : > { %v5296_v56 = vrot.slane %v8931_v22, 1  ;;  %v3903_v54 = vmax.f32 %v3871_v32, 0.0  ;;  %v3874_v29 = vadd.f32 %v8869_v53, %v3835_v4  ;;  %v3451_v13 = vpop.f32.mrb[232].mxu1  ;;  %v6859_v57 = vpop.f32.mrb[12].mxu0 }
 0x3b7   : > { %v3875_v8 = vadd.f32 %v8869_v53, %v3836_v37  ;;  %v3994_v48 = vcombine.high %v3930_v36, %v3930_v36  ;;  %v4001_v46 = vrot.slane %v3930_v36, %v8812_v51  ;;  %v3904_v16 = vmax.f32 %v3872_v6, 0.0  ;;  %v3452_v35 = vpop.f32.mrb[233].mxu1  ;;  %v3686_v15 = vpop.f32.mrb[13].mxu0 }
 0x3b8   : > { %v3905_v23 = vmax.f32 %v3873_v10, 0.0  ;;  %v3931_v55 = vadd.f32 %v3903_v54, %v3901_v58  ;;  %v3906_v9 = vmax.f32 %v3874_v29, 0.0  ;;  %v3453_v20 = vpop.f32.mrb[234].mxu1  ;;  %v9005_v18 = vadd.f32 %v3686_v15, %v8947_v21  ;;  %v6860_v42 = vpop.f32.mrb[14].mxu0 }
 0x3b9   : > { %v3907_v3 = vmax.f32 %v3875_v8, 0.0  ;;  %v4008_v1 = vrot.slane %v3994_v48, %v8812_v51  ;;  %v4009_v0 = vcombine.high %v4001_v46, %v4001_v46  ;;  %v4353_v33 = vsel %vm4296_vm8, %v4001_v46, 0.0  ;;  %v3454_v12 = vpop.f32.mrb[235].mxu1  ;;  %v9009_v43 = vpop.f32.mrb[15].mxu0 }
 0x3ba   : > { %v9012_v59 = vadd.f32 %v5296_v56, %v8931_v22  ;;  %v4354_v26 = vrot.slane %v4353_v33, 4  ;;  %v4011_v58 = vcombine.high %v3931_v55, %v3931_v55  ;;  %v4018_v47 = vrot.slane %v3931_v55, %v8812_v51 }
 0x3bb   : > { %v9015_v49 = vadd.f32 %v3906_v9, %v3904_v16  ;;  %v4010_v21 = vcombine.high %v4008_v1, %v4008_v1  ;;  %v4360_v40 = vsel %vm4296_vm8, %v4009_v0, 0.0  ;;  %v4367_v39 = vsel %vm4296_vm8, %v4008_v1, 0.0 }
 0x3bc   : > { %v9019_v44 = vadd.f32 %v3907_v3, %v3905_v23  ;;  %v4355_v38 = vadd.f32 %v4354_v26, %v4353_v33  ;;  %v4361_v27 = vrot.slane %v4360_v40, 4  ;;  %v4368_v52 = vrot.slane %v4367_v39, 4 }
 0x3bd   : > { %v4025_v2 = vrot.slane %v4011_v58, %v8812_v51  ;;  %v4374_v22 = vsel %vm4296_vm8, %v4010_v21, 0.0  ;;  %v4026_v30 = vcombine.high %v4018_v47, %v4018_v47  ;;  %v4381_v5 = vsel %vm4296_vm8, %v4018_v47, 0.0 }
 0x3be   : > { %v4028_v32 = vcombine.high %v9015_v49, %v9015_v49  ;;  %v4356_v4 = vrot.slane %v4355_v38, 2  ;;  %v4362_v37 = vadd.f32 %v4361_v27, %v4360_v40  ;;  %v4369_v36 = vadd.f32 %v4368_v52, %v4367_v39  ;;  %v9026_v10 = vpop.f32.mrb[236].mxu1  ;;  %v6863_v56 = vpop.f32.mrb[16].mxu0 }
 0x3bf   : > { %v4375_v6 = vrot.slane %v4374_v22, 4  ;;  %v4027_v54 = vcombine.high %v4025_v2, %v4025_v2  ;;  %v4382_v29 = vrot.slane %v4381_v5, 4  ;;  %v4388_v8 = vsel %vm4296_vm8, %v4026_v30, 0.0  ;;  %v3459_v57 = vpop.f32.mrb[237].mxu1  ;;  %v9030_v48 = vpop.f32.mrb[17].mxu0 }
 0x3c0   : > { %v4395_v13 = vsel %vm4296_vm8, %v4025_v2, 0.0  ;;  %v4357_v46 = vadd.f32 %v4356_v4, %v4355_v38  ;;  %v4363_v16 = vrot.slane %v4362_v37, 2  ;;  %v4370_v23 = vrot.slane %v4369_v36, 2  ;;  %v9032_v15 = vpop.f32.mrb[238].mxu1  ;;  %v6864_v55 = vpop.f32.mrb[18].mxu0 }
 0x3c1   : > { %v4376_v35 = vadd.f32 %v4375_v6, %v4374_v22  ;;  %v4383_v9 = vadd.f32 %v4382_v29, %v4381_v5  ;;  %v4389_v3 = vrot.slane %v4388_v8, 4  ;;  %v4396_v20 = vrot.slane %v4395_v13, 4  ;;  %v3462_v1 = vpop.f32.mrb[239].mxu1  ;;  %v9035_v0 = vpop.f32.mrb[19].mxu0 }
 0x3c2   : > { %v4402_v42 = vsel %vm4296_vm8, %v4027_v54, 0.0  ;;  %v4358_v33 = vrot.slane %v4357_v46, 1  ;;  %v4364_v12 = vadd.f32 %v4363_v16, %v4362_v37  ;;  %v4371_v26 = vadd.f32 %v4370_v23, %v4369_v36 }
 0x3c3   : > { %v4377_v58 = vrot.slane %v4376_v35, 2  ;;  %v4384_v47 = vrot.slane %v4383_v9, 2  ;;  %v4390_v21 = vadd.f32 %v4389_v3, %v4388_v8  ;;  %v4397_v40 = vadd.f32 %v4396_v20, %v4395_v13 }
 0x3c4   : > { %v4403_v39 = vrot.slane %v4402_v42, 4  ;;  %v4359_v38 = vadd.f32 %v4358_v33, %v4357_v46  ;;  %v4365_v27 = vrot.slane %v4364_v12, 1  ;;  %v4372_v52 = vrot.slane %v4371_v26, 1 }
 0x3c5   : > { %v4378_v2 = vadd.f32 %v4377_v58, %v4376_v35  ;;  %v4385_v22 = vadd.f32 %v4384_v47, %v4383_v9  ;;  %v4391_v30 = vrot.slane %v4390_v21, 2  ;;  %v4398_v5 = vrot.slane %v4397_v40, 2 }
 0x3c6   : > { %v4404_v4 = vadd.f32 %v4403_v39, %v4402_v42  ;;  %v4366_v6 = vadd.f32 %v4365_v27, %v4364_v12  ;;  %v4373_v56 = vadd.f32 %v4372_v52, %v4371_v26  ;;  %v4753_v29 = vmul.f32 0.25, %v4359_v38  ;;  %v3465_v57 = vpop.f32.mrb[240].mxu1  ;;  %v6867_v37 = vpop.f32.mrb[20].mxu0 }
 0x3c7   : > { %v4379_v54 = vrot.slane %v4378_v2, 1  ;;  %v4386_v36 = vrot.slane %v4385_v22, 1  ;;  %v4392_v16 = vadd.f32 %v4391_v30, %v4390_v21  ;;  %v4399_v23 = vadd.f32 %v4398_v5, %v4397_v40  ;;  %v3466_v13 = vpop.f32.mrb[241].mxu1  ;;  %v9037_v55 = vpop.f32.mrb[21].mxu0 }
 0x3c8   : > { %v4405_v8 = vrot.slane %v4404_v4, 2  ;;  %v4754_v3 = vmul.f32 0.25, %v4366_v6  ;;  %v4755_v35 = vmul.f32 0.25, %v4373_v56  ;;  %v4035_v9 = vrot.slane %v9015_v49, %v8812_v51  ;;  %v3467_v20 = vpop.f32.mrb[242].mxu1  ;;  %v6868_v42 = vpop.f32.mrb[22].mxu0 }
 0x3c9   : > { %v4380_v46 = vadd.f32 %v4379_v54, %v4378_v2  ;;  %v4387_v1 = vadd.f32 %v4386_v36, %v4385_v22  ;;  %v4393_v33 = vrot.slane %v4392_v16, 1  ;;  %v4400_v12 = vrot.slane %v4399_v23, 1  ;;  %v3468_v58 = vpop.f32.mrb[243].mxu1  ;;  %v9041_v47 = vpop.f32.mrb[23].mxu0 }
 0x3ca   : > { %v4406_v26 = vadd.f32 %v4405_v8, %v4404_v4  ;;  %v5832_v40 = vsel %vm5818_vm9, %v4754_v3, %v4753_v29  ;;  %v4042_v39 = vrot.slane %v4028_v32, %v8812_v51  ;;  %v4043_v38 = vcombine.high %v4035_v9, %v4035_v9 }
 0x3cb   : > { %v4756_v21 = vmul.f32 0.25, %v4380_v46  ;;  %v5833_v27 = vsel %vm5820_vm10, %v4755_v35, %v5832_v40  ;;  %v4394_v52 = vadd.f32 %v4393_v33, %v4392_v16  ;;  %v4401_v2 = vadd.f32 %v4400_v12, %v4399_v23 }
 0x3cc   : > { %v4407_v22 = vrot.slane %v4406_v26, 1  ;;  %v4757_v30 = vmul.f32 0.25, %v4387_v1  ;;  %v4044_v4 = vcombine.high %v4042_v39, %v4042_v39  ;;  %v4409_v6 = vsel %vm4296_vm8, %v4035_v9, 0.0 }
 0x3cd   : > { %v5834_v5 = vsel %vm5822_vm11, %v4756_v21, %v5833_v27  ;;  %v4758_v54 = vmul.f32 0.25, %v4394_v52  ;;  %v4759_v29 = vmul.f32 0.25, %v4401_v2  ;;  %v4410_v57 = vrot.slane %v4409_v6, 4 }
 0x3ce   : > { %v4408_v56 = vadd.f32 %v4407_v22, %v4406_v26  ;;  %v5835_v37 = vsel %vm5824_vm12, %v4757_v30, %v5834_v5  ;;  %v4416_v49 = vsel %vm4296_vm8, %v4043_v38, 0.0  ;;  %v4423_v32 = vsel %vm4296_vm8, %v4042_v39, 0.0  ;;  %v9055_v16 = vpop.f32.mrb[244].mxu1  ;;  %v6871_v23 = vpop.f32.mrb[24].mxu0 }
 0x3cf   : > { %v4430_v36 = vsel %vm4296_vm8, %v4044_v4, 0.0  ;;  %v5836_v13 = vsel %vm5826_vm13, %v4758_v54, %v5835_v37  ;;  %v4411_v46 = vadd.f32 %v4410_v57, %v4409_v6  ;;  %v4417_v3 = vrot.slane %v4416_v49, 4  ;;  %v3473_v35 = vpop.f32.mrb[245].mxu1  ;;  %v9058_v9 = vpop.f32.mrb[25].mxu0 }
 0x3d0   : > { %v4760_v8 = vmul.f32 0.25, %v4408_v56  ;;  %v5837_v20 = vsel %vm5828_vm14, %v4759_v29, %v5836_v13  ;;  %v4424_v42 = vrot.slane %v4423_v32, 4  ;;  %v4431_v1 = vrot.slane %v4430_v36, 4  ;;  %v9063_v12 = vpop.f32.mrb[246].mxu1  ;;  %v6872_v26 = vpop.f32.mrb[26].mxu0 }
 0x3d1   : > { %v4045_v33 = vcombine.high %v9019_v44, %v9019_v44  ;;  %v4412_v21 = vrot.slane %v4411_v46, 2  ;;  %v4418_v40 = vadd.f32 %v4417_v3, %v4416_v49  ;;  %v4052_v39 = vrot.slane %v9019_v44, %v8812_v51  ;;  %v3476_v38 = vpop.f32.mrb[247].mxu1  ;;  %v9070_v27 = vpop.f32.mrb[27].mxu0 }
 0x3d2   : > { %v9066_v58 = vsel %vm5830_vm15, %v4760_v8, %v5837_v20  ;;  %v4425_v2 = vadd.f32 %v4424_v42, %v4423_v32  ;;  %v4432_v22 = vadd.f32 %v4431_v1, %v4430_v36  ;;  %v3837_v28 = vadd.f32 %v9005_v18, %v8626_v62 }
 0x3d3   : > { %v4059_v30 = vrot.slane %v4045_v33, %v8812_v51  ;;  %v4413_v5 = vadd.f32 %v4412_v21, %v4411_v46  ;;  %v4419_v4 = vrot.slane %v4418_v40, 2  ;;  %v4060_v6 = vcombine.high %v4052_v39, %v4052_v39 }
 0x3d4   : > { %v4437_v56 = vsel %vm4296_vm8, %v4052_v39, 0.0  ;;  %v4426_v54 = vrot.slane %v4425_v2, 2  ;;  %v4433_v29 = vrot.slane %v4432_v22, 2 }
 0x3d5   : > { %v4061_v57 = vcombine.high %v4059_v30, %v4059_v30  ;;  %v4438_v37 = vrot.slane %v4437_v56, 4  ;;  %v4414_v44 = vrot.slane %v4413_v5, 1  ;;  %v4420_v49 = vadd.f32 %v4419_v4, %v4418_v40 }
 0x3d6   : > { %v4444_v23 = vsel %vm4296_vm8, %v4060_v6, 0.0  ;;  %v4451_v8 = vsel %vm4296_vm8, %v4059_v30, 0.0  ;;  %v4427_v13 = vadd.f32 %v4426_v54, %v4425_v2  ;;  %v4434_v32 = vadd.f32 %v4433_v29, %v4432_v22  ;;  %v3479_v35 = vpop.f32.mrb[248].mxu1  ;;  %v6875_v46 = vpop.f32.mrb[28].mxu0 }
 0x3d7   : > { %v4439_v36 = vadd.f32 %v4438_v37, %v4437_v56  ;;  %v4445_v3 = vrot.slane %v4444_v23, 4  ;;  %v4415_v20 = vadd.f32 %v4414_v44, %v4413_v5  ;;  %v4421_v42 = vrot.slane %v4420_v49, 1  ;;  %v3480_v26 = vpop.f32.mrb[249].mxu1  ;;  %v9079_v21 = vpop.f32.mrb[29].mxu0 }
 0x3d8   : > { %v4452_v1 = vrot.slane %v4451_v8, 4  ;;  %v4458_v33 = vsel %vm4296_vm8, %v4061_v57, 0.0  ;;  %v4428_v39 = vrot.slane %v4427_v13, 1  ;;  %v4435_v40 = vrot.slane %v4434_v32, 1  ;;  %v3481_v6 = vpop.f32.mrb[250].mxu1  ;;  %v6876_v30 = vpop.f32.mrb[30].mxu0 }
 0x3d9   : > { %v4440_v38 = vrot.slane %v4439_v36, 2  ;;  %v4446_v4 = vadd.f32 %v4445_v3, %v4444_v23  ;;  %v4422_v2 = vadd.f32 %v4421_v42, %v4420_v49  ;;  %v4761_v22 = vmul.f32 0.25, %v4415_v20  ;;  %v3482_v29 = vpop.f32.mrb[251].mxu1  ;;  %v9081_v37 = vpop.f32.mrb[31].mxu0 }
 0x3da   : > { %v4453_v56 = vadd.f32 %v4452_v1, %v4451_v8  ;;  %v4459_v54 = vrot.slane %v4458_v33, 4  ;;  %v4429_v5 = vadd.f32 %v4428_v39, %v4427_v13  ;;  %v4436_v44 = vadd.f32 %v4435_v40, %v4434_v32 }
 0x3db   : > { %v4441_v35 = vadd.f32 %v4440_v38, %v4439_v36  ;;  %v4447_v57 = vrot.slane %v4446_v4, 2  ;;  %v4762_v46 = vmul.f32 0.25, %v4422_v2  ;;  %v3876_v1 = vadd.f32 %v8869_v53, %v3837_v28 }
 0x3dc   : > { %v4454_v26 = vrot.slane %v4453_v56, 2  ;;  %v4460_v52 = vadd.f32 %v4459_v54, %v4458_v33  ;;  %v4763_v23 = vmul.f32 0.25, %v4429_v5  ;;  %v4764_v3 = vmul.f32 0.25, %v4436_v44 }
 0x3dd   : > { %v4442_v6 = vrot.slane %v4441_v35, 1  ;;  %v4448_v49 = vadd.f32 %v4447_v57, %v4446_v4  ;;  %v5839_v8 = vsel %vm5818_vm9, %v4762_v46, %v4761_v22  ;;  %v3690_v33 = vadd.f32 %v9009_v43, %v8954_v50 }
 0x3de   : > { %v4455_v20 = vadd.f32 %v4454_v26, %v4453_v56  ;;  %v4461_v42 = vrot.slane %v4460_v52, 2  ;;  %v5840_v13 = vsel %vm5820_vm10, %v4763_v23, %v5839_v8  ;;  %v9090_v39 = vpop.f32.mrb[252].mxu1  ;;  %v6879_v62 = vpop.f32.mrb[32].mxu0  ;;  %v3908_v4 = vmax.f32 %v3876_v1, 0.0 }
 0x3df   : > { %v4443_v32 = vadd.f32 %v4442_v6, %v4441_v35  ;;  %v4449_v36 = vrot.slane %v4448_v49, 1  ;;  %v5841_v38 = vsel %vm5822_vm11, %v4764_v3, %v5840_v13  ;;  %v3487_v30 = vpop.f32.mrb[253].mxu1  ;;  %v9093_v2 = vpop.f32.mrb[33].mxu0  ;;  %v3838_v56 = vadd.f32 %v3690_v33, %v8628_v60 }
 0x3e0   : > { %v4456_v18 = vrot.slane %v4455_v20, 1  ;;  %v4462_v40 = vadd.f32 %v4461_v42, %v4460_v52  ;;  %v3701_v54 = vadd.f32 %v9030_v48, %v8967_v14  ;;  %v9098_v29 = vpop.f32.mrb[254].mxu1  ;;  %v6880_v50 = vpop.f32.mrb[34].mxu0  ;;  %v3704_v52 = vadd.f32 %v9035_v0, %v8974_v61 }
 0x3e1   : > { %v4450_v22 = vadd.f32 %v4449_v36, %v4448_v49  ;;  %v4765_v28 = vmul.f32 0.25, %v4443_v32  ;;  %v10173_v44 = vrot.slane %v8933_v34, 1  ;;  %v3490_v57 = vpop.f32.mrb[255].mxu1  ;;  %v9107_v46 = vpop.f32.mrb[35].mxu0  ;;  %v3877_v14 = vadd.f32 %v8869_v53, %v3838_v56 }
 0x3e2   : > { %v4457_v43 = vadd.f32 %v4456_v18, %v4455_v20  ;;  %v4463_v5 = vrot.slane %v4462_v40, 1  ;;  %10174 = vst [vmem:[#allocation26_spill] sm:$0xff] %v9107_v46  ;;  %v3839_v48 = vadd.f32 %v3701_v54, %v8635_v63  ;;  %v3840_v6 = vadd.f32 %v3704_v52, %v8638_v45 }
 0x3e3   : > { %v9105_v35 = vadd.f32 %v10173_v44, %v8933_v34  ;;  %v4766_v60 = vmul.f32 0.25, %v4450_v22  ;;  %v5842_v26 = vsel %vm5824_vm12, %v4765_v28, %v5841_v38  ;;  %v5308_v61 = vrot.slane %v8924_v25, 2 }
 0x3e4   : > { %v4464_v23 = vadd.f32 %v4463_v5, %v4462_v40  ;;  %v4767_v3 = vmul.f32 0.25, %v4457_v43  ;;  %v3909_v34 = vmax.f32 %v3877_v14, 0.0  ;;  %v3878_v49 = vadd.f32 %v8869_v53, %v3839_v48 }
 0x3e5   : > { %v5843_v0 = vsel %vm5826_vm13, %v4766_v60, %v5842_v26  ;;  %v10175_v8 = vrot.slane %v8919_v24, 4  ;;  %v3879_v63 = vadd.f32 %v8869_v53, %v3840_v6  ;;  %v5309_v45 = vadd.f32 %v5308_v61, %v8924_v25 }
 0x3e6   : > { %v9119_v42 = vmul.f32 0.25, %v4464_v23  ;;  %v9122_v1 = vsel %vm5828_vm14, %v4767_v3, %v5843_v0  ;;  %v3910_v13 = vmax.f32 %v3878_v49, 0.0  ;;  %v10176_v36 = vcombine.high %v8840_v17, %v8840_v17  ;;  %v6883_v18 = vpop.f32.mrb[36].mxu0 }
 0x3e7   : > { %v5314_v20 = vadd.f32 %v10175_v8, %v8919_v24  ;;  %v5326_v62 = vsel %vm5241_vm7, %v8853_v11, 0.0  ;;  %v3493_v24 = vpop.f32.mrb[0].mxu1  ;;  %v3911_v40 = vmax.f32 %v3879_v63, 0.0  ;;  %v5310_v38 = vrot.slane %v5309_v45, 1  ;;  %v9132_v53 = vpop.f32.mrb[37].mxu0 }
 0x3e8   : > { %v5319_v33 = vsel %vm5241_vm7, %v10176_v36, 0.0  ;;  %v5327_v22 = vrot.slane %v5326_v62, 4  ;;  %v3494_v28 = vpop.f32.mrb[1].mxu1  ;;  %10177 = vst [vmem:[#allocation30_spill] sm:$0xff] %v9132_v53  ;;  %v3934_v25 = vadd.f32 %v3910_v13, %v3908_v4  ;;  %v10178_v54 = vcombine.high %v8853_v11, %v8853_v11  ;;  %v6884_v5 = vpop.f32.mrb[38].mxu0 }
 0x3e9   : > { %v5315_v32 = vrot.slane %v5314_v20, 2  ;;  %v5320_v30 = vrot.slane %v5319_v33, 4  ;;  %v9142_v50 = vsel %vm5241_vm7, %v8856_v7, 0.0  ;;  %v3495_v43 = vpop.f32.mrb[2].mxu1  ;;  %v3935_v52 = vadd.f32 %v3911_v40, %v3909_v34  ;;  %v9150_v26 = vpop.f32.mrb[39].mxu0 }
 0x3ea   : > { %v9138_v17 = vsel %vm5241_vm7, %v10178_v54, 0.0  ;;  %v9144_v44 = vadd.f32 %v5310_v38, %v5309_v45  ;;  %v9148_v60 = vadd.f32 %v5327_v22, %v5326_v62  ;;  %v3496_v4 = vpop.f32.mrb[3].mxu1  ;;  %10179 = vst [vmem:[#allocation28_spill] sm:$0xff] %v9150_v26  ;;  %v4062_v11 = vcombine.high %v3934_v25, %v3934_v25 }
 0x3eb   : > { %v5316_v56 = vadd.f32 %v5315_v32, %v5314_v20  ;;  %v9146_v57 = vadd.f32 %v5320_v30, %v5319_v33  ;;  %v4069_v14 = vrot.slane %v3934_v25, %v8812_v51  ;;  %v4079_v3 = vcombine.high %v3935_v52, %v3935_v52 }
 0x3ec   : > { %v4086_v6 = vrot.slane %v3935_v52, %v8812_v51  ;;  %v4076_v34 = vrot.slane %v4062_v11, %v8812_v51 }
 0x3ed   : > { %v5317_v48 = vrot.slane %v5316_v56, 1  ;;  %v4077_v49 = vcombine.high %v4069_v14, %v4069_v14  ;;  %v4465_v8 = vsel %vm4296_vm8, %v4069_v14, 0.0  ;;  %v4093_v45 = vrot.slane %v4079_v3, %v8812_v51 }
 0x3ee   : > { %v4466_v63 = vrot.slane %v4465_v8, 4  ;;  %v4094_v13 = vcombine.high %v4086_v6, %v4086_v6  ;;  %v4493_v32 = vsel %vm4296_vm8, %v4086_v6, 0.0  ;;  %v4078_v36 = vcombine.high %v4076_v34, %v4076_v34  ;;  %v9165_v18 = vpop.f32.mrb[4].mxu1  ;;  %v6887_v40 = vpop.f32.mrb[40].mxu0 }
 0x3ef   : > { %v9159_v20 = vadd.f32 %v5317_v48, %v5316_v56  ;;  %v4472_v33 = vsel %vm4296_vm8, %v4077_v49, 0.0  ;;  %v4479_v62 = vsel %vm4296_vm8, %v4076_v34, 0.0  ;;  %v4494_v24 = vrot.slane %v4493_v32, 4  ;;  %v3501_v25 = vpop.f32.mrb[5].mxu1  ;;  %v9167_v56 = vpop.f32.mrb[41].mxu0 }
 0x3f0   : > { %v4467_v38 = vadd.f32 %v4466_v63, %v4465_v8  ;;  %v4473_v30 = vrot.slane %v4472_v33, 4  ;;  %v4480_v22 = vrot.slane %v4479_v62, 4  ;;  %v4095_v28 = vcombine.high %v4093_v45, %v4093_v45  ;;  %10180 = vst [vmem:[#allocation29_spill] sm:$0xff] %v9167_v56  ;;  %v9172_v4 = vpop.f32.mrb[6].mxu1  ;;  %v6888_v11 = vpop.f32.mrb[42].mxu0 }
 0x3f1   : > { %v4486_v54 = vsel %vm4296_vm8, %v4078_v36, 0.0  ;;  %v4495_v43 = vadd.f32 %v4494_v24, %v4493_v32  ;;  %v4500_v5 = vsel %vm4296_vm8, %v4094_v13, 0.0  ;;  %v4507_v52 = vsel %vm4296_vm8, %v4093_v45, 0.0  ;;  %10181 = vst [vmem:[#allocation31_spill] sm:$0xff] %v9172_v4  ;;  %v3504_v34 = vpop.f32.mrb[7].mxu1  ;;  %v9174_v49 = vpop.f32.mrb[43].mxu0 }
 0x3f2   : > { %v4468_v14 = vrot.slane %v4467_v38, 2  ;;  %v4474_v48 = vadd.f32 %v4473_v30, %v4472_v33  ;;  %v4481_v3 = vadd.f32 %v4480_v22, %v4479_v62  ;;  %v4487_v6 = vrot.slane %v4486_v54, 4  ;;  %10182 = vst [vmem:[#allocation21_spill] sm:$0xff] %v9174_v49 }
 0x3f3   : > { %v4496_v8 = vrot.slane %v4495_v43, 2  ;;  %v4501_v63 = vrot.slane %v4500_v5, 4  ;;  %v4508_v40 = vrot.slane %v4507_v52, 4  ;;  %v4514_v36 = vsel %vm4296_vm8, %v4095_v28, 0.0 }
 0x3f4   : > { %v4469_v32 = vadd.f32 %v4468_v14, %v4467_v38  ;;  %v4475_v24 = vrot.slane %v4474_v48, 2  ;;  %v4482_v13 = vrot.slane %v4481_v3, 2  ;;  %v4488_v25 = vadd.f32 %v4487_v6, %v4486_v54 }
 0x3f5   : > { %v4497_v45 = vadd.f32 %v4496_v8, %v4495_v43  ;;  %v4502_v23 = vadd.f32 %v4501_v63, %v4500_v5  ;;  %v4509_v0 = vadd.f32 %v4508_v40, %v4507_v52  ;;  %v4515_v11 = vrot.slane %v4514_v36, 4 }
 0x3f6   : > { %v4470_v61 = vrot.slane %v4469_v32, 1  ;;  %v4476_v33 = vadd.f32 %v4475_v24, %v4474_v48  ;;  %v4483_v62 = vadd.f32 %v4482_v13, %v4481_v3  ;;  %v4489_v30 = vrot.slane %v4488_v25, 2  ;;  %v3507_v26 = vpop.f32.mrb[8].mxu1  ;;  %v6891_v53 = vpop.f32.mrb[44].mxu0 }
 0x3f7   : > { %v4498_v22 = vrot.slane %v4497_v45, 1  ;;  %v4503_v34 = vrot.slane %v4502_v23, 2  ;;  %v4510_v49 = vrot.slane %v4509_v0, 2  ;;  %v4516_v56 = vadd.f32 %v4515_v11, %v4514_v36  ;;  %v3508_v4 = vpop.f32.mrb[9].mxu1  ;;  %v9177_v54 = vpop.f32.mrb[45].mxu0 }
 0x3f8   : > { %v4471_v46 = vadd.f32 %v4470_v61, %v4469_v32  ;;  %v4477_v28 = vrot.slane %v4476_v33, 1  ;;  %v4484_v38 = vrot.slane %v4483_v62, 1  ;;  %v4490_v14 = vadd.f32 %v4489_v30, %v4488_v25  ;;  %v3509_v48 = vpop.f32.mrb[10].mxu1  ;;  %v6892_v3 = vpop.f32.mrb[46].mxu0 }
 0x3f9   : > { %v4499_v43 = vadd.f32 %v4498_v22, %v4497_v45  ;;  %v4504_v5 = vadd.f32 %v4503_v34, %v4502_v23  ;;  %v4511_v52 = vadd.f32 %v4510_v49, %v4509_v0  ;;  %v4517_v6 = vrot.slane %v4516_v56, 2  ;;  %v3510_v36 = vpop.f32.mrb[11].mxu1  ;;  %v9179_v26 = vpop.f32.mrb[47].mxu0 }
 0x3fa   : > { %v4478_v8 = vadd.f32 %v4477_v28, %v4476_v33  ;;  %v4485_v63 = vadd.f32 %v4484_v38, %v4483_v62  ;;  %v4491_v40 = vrot.slane %v4490_v14, 1  ;;  %v4769_v24 = vmul.f32 0.25, %v4471_v46 }
 0x3fb   : > { %v4505_v53 = vrot.slane %v4504_v5, 1  ;;  %v4512_v61 = vrot.slane %v4511_v52, 1  ;;  %v4518_v32 = vadd.f32 %v4517_v6, %v4516_v56  ;;  %v4773_v13 = vmul.f32 0.25, %v4499_v43 }
 0x3fc   : > { %v4492_v4 = vadd.f32 %v4491_v40, %v4490_v14  ;;  %v4770_v25 = vmul.f32 0.25, %v4478_v8  ;;  %v4771_v11 = vmul.f32 0.25, %v4485_v63  ;;  %v10183_v23 = vrot.slane %v9146_v57, 2 }
 0x3fd   : > { %v4506_v49 = vadd.f32 %v4505_v53, %v4504_v5  ;;  %v4513_v45 = vadd.f32 %v4512_v61, %v4511_v52  ;;  %v4519_v33 = vrot.slane %v4518_v32, 1  ;;  %v10184_v46 = vrot.slane %v9148_v60, 2 }
 0x3fe   : > { %v5323_v0 = vadd.f32 %v10183_v23, %v9146_v57  ;;  %v4772_v30 = vmul.f32 0.25, %v4492_v4  ;;  %v5846_v22 = vsel %vm5818_vm9, %v4770_v25, %v4769_v24  ;;  %v10185_v56 = vrot.slane %v9138_v17, 4  ;;  %v9192_v5 = vpop.f32.mrb[12].mxu1  ;;  %v6895_v52 = vpop.f32.mrb[48].mxu0 }
 0x3ff   : > { %v5330_v62 = vadd.f32 %v10184_v46, %v9148_v60  ;;  %v5847_v38 = vsel %vm5820_vm10, %v4771_v11, %v5846_v22  ;;  %v4520_v14 = vadd.f32 %v4519_v33, %v4518_v32  ;;  %v4774_v43 = vmul.f32 0.25, %v4506_v49  ;;  %v3515_v8 = vpop.f32.mrb[13].mxu1  ;;  %v10187_v49 = vld [vmem:[#allocation27_spill] sm:$0xff]  ;;  %v10188_v46 = vld [vmem:[#allocation25_spill] sm:$0xff] }
 0x400   : > { %v5324_v34 = vrot.slane %v5323_v0, 1  ;;  %v5335_v28 = vadd.f32 %v10185_v56, %v9138_v17  ;;  %v4775_v57 = vmul.f32 0.25, %v4513_v45  ;;  %v5848_v6 = vsel %vm5822_vm11, %v4772_v30, %v5847_v38  ;;  %v9203_v53 = vpop.f32.mrb[14].mxu1  ;;  %v10189_v22 = vld [vmem:[#allocation11_spill] sm:$0xff] }
 0x401   : > { %v5331_v60 = vrot.slane %v5330_v62, 1  ;;  %v9195_v63 = vmul.f32 0.25, %v4520_v14  ;;  %v5849_v40 = vsel %vm5824_vm12, %v4773_v13, %v5848_v6  ;;  %v5341_v17 = vrot.slane %v9142_v50, 4  ;;  %v3518_v11 = vpop.f32.mrb[15].mxu1  ;;  %v10191_v38 = vld [vmem:[#allocation59_spill] sm:$0xff] }
 0x402   : > { %v5325_v48 = vadd.f32 %v5324_v34, %v5323_v0  ;;  %v5336_v3 = vrot.slane %v5335_v28, 2  ;;  %v10186_v24 = vcombine.high %v8856_v7, %v8856_v7  ;;  %v5850_v61 = vsel %vm5826_vm13, %v4774_v43, %v5849_v40 }
 0x403   : > { %v5332_v32 = vadd.f32 %v5331_v60, %v5330_v62  ;;  %v9207_v23 = vsel %vm5828_vm14, %v4775_v57, %v5850_v61  ;;  %v5342_v13 = vadd.f32 %v5341_v17, %v9142_v50  ;;  %v5690_v0 = vmul.f32 0.25, %v8884_v41  ;;  %v10190_v62 = vld [vmem:[#allocation53_spill] sm:$0xff] }
 0x404   : > { %v5347_v36 = vsel %vm5241_vm7, %v10186_v24, 0.0  ;;  %v5337_v4 = vadd.f32 %v5336_v3, %v5335_v28  ;;  %v5691_v45 = vmul.f32 0.25, %v10187_v49  ;;  %v5692_v30 = vmul.f32 0.25, %v10188_v46 }
 0x405   : > { %v5348_v25 = vrot.slane %v5347_v36, 4  ;;  %v5693_v34 = vmul.f32 0.25, %v10189_v22  ;;  %v5343_v56 = vrot.slane %v5342_v13, 2  ;;  %v5694_v28 = vmul.f32 0.25, %v10190_v62 }
 0x406   : > { %v5338_v7 = vrot.slane %v5337_v4, 1  ;;  %v5695_v14 = vmul.f32 0.25, %v10191_v38  ;;  %v5696_v43 = vmul.f32 0.25, %v8986_v31  ;;  %v5697_v50 = vmul.f32 0.25, %v9012_v59  ;;  %v3521_v40 = vpop.f32.mrb[16].mxu1 }
 0x407   : > { %v5349_v33 = vadd.f32 %v5348_v25, %v5347_v36  ;;  %v5698_v41 = vmul.f32 0.25, %v9105_v35  ;;  %v5344_v6 = vadd.f32 %v5343_v56, %v5342_v13  ;;  %v5699_v60 = vmul.f32 0.25, %v9144_v44  ;;  %v3522_v25 = vpop.f32.mrb[17].mxu1  ;;  %v9241_v56 = vld [vmem:[%s9934_s4] ss:$0 sm:$0xff] }
 0x408   : > { %v5339_v57 = vadd.f32 %v5338_v7, %v5337_v4  ;;  %v5700_v3 = vmul.f32 0.25, %v9159_v20  ;;  %v5701_v8 = vmul.f32 0.25, %v5325_v48  ;;  %v5702_v24 = vmul.f32 0.25, %v5332_v32  ;;  %v3523_v11 = vpop.f32.mrb[18].mxu1  ;;  %v10192_v7 = vld [vmem:[#allocation49_spill] sm:$0xff] }
 0x409   : > { %v5350_v52 = vrot.slane %v5349_v33, 2  ;;  %v5953_v61 = vsel %vm5818_vm9, %v5691_v45, %v5690_v0  ;;  %v5345_v31 = vrot.slane %v5344_v6, 1  ;;  %v5960_v59 = vsel %vm5818_vm9, %v5699_v60, %v5698_v41  ;;  %v3524_v13 = vpop.f32.mrb[19].mxu1  ;;  %v10197_v11 = vld [vmem:[#allocation13_spill] sm:$0xff] }
 0x40a   : > { %v5703_v36 = vmul.f32 0.25, %v5339_v57  ;;  %v5954_v4 = vsel %vm5820_vm10, %v5692_v30, %v5953_v61  ;;  %v3715_v35 = vadd.f32 %v9037_v55, %v9026_v10  ;;  %v5961_v48 = vsel %vm5820_vm10, %v5700_v3, %v5960_v59  ;;  %v10193_v30 = vld [vmem:[#allocation7_spill] sm:$0xff]  ;;  %v4818_v3 = vld [vmem:[%s7268_s21 + $0x48] sm:$0xff] }
 0x40b   : > { %v5351_v17 = vadd.f32 %v5350_v52, %v5349_v33  ;;  %v5955_v20 = vsel %vm5822_vm11, %v5693_v34, %v5954_v4  ;;  %v3718_v32 = vadd.f32 %v9041_v47, %v9032_v15  ;;  %v5346_v0 = vadd.f32 %v5345_v31, %v5344_v6  ;;  %v4817_v52 = vld [vmem:[%s7268_s21 + $0x40] sm:$0xff] }
 0x40c   : > { %v5956_v49 = vsel %vm5824_vm12, %v5694_v28, %v5955_v20  ;;  %v5962_v45 = vsel %vm5822_vm11, %v5701_v8, %v5961_v48  ;;  %v3841_v33 = vadd.f32 %v3715_v35, %v10192_v7  ;;  %v3729_v57 = vadd.f32 %v9058_v9, %v9055_v16  ;;  %v4819_v8 = vld [vmem:[%s7268_s21 + $0x50] sm:$0xff]  ;;  %v10194_v9 = vld [vmem:[#allocation8_spill] sm:$0xff]  ;;  %v4821_v31 = vld [vmem:[%s7268_s21 + $0x60] sm:$0xff] }
 0x40d   : > { %v5352_v44 = vrot.slane %v5351_v17, 1  ;;  %v5957_v10 = vsel %vm5826_vm13, %v5695_v14, %v5956_v49  ;;  %v5963_v55 = vsel %vm5824_vm12, %v5702_v24, %v5962_v45  ;;  %v3842_v22 = vadd.f32 %v3718_v32, %v10193_v30  ;;  %v4822_v20 = vld [vmem:[%s7268_s21 + $0x68] sm:$0xff]  ;;  %v4823_v48 = vld [vmem:[%s7268_s21 + $0x70] sm:$0xff]  ;;  %v4824_v49 = vld [vmem:[%s7268_s21 + $0x78] sm:$0xff] }
 0x40e   : > { %v5704_v34 = vmul.f32 0.25, %v5346_v0  ;;  %v5958_v15 = vsel %vm5828_vm14, %v5696_v43, %v5957_v10  ;;  %v5964_v47 = vsel %vm5826_vm13, %v5703_v36, %v5963_v55  ;;  %v3880_v62 = vadd.f32 %v9241_v56, %v3841_v33  ;;  %v4820_v36 = vld [vmem:[%s7268_s21 + $0x58] sm:$0xff] }
 0x40f   : > { %v5353_v46 = vadd.f32 %v5352_v44, %v5351_v17  ;;  %v5959_v38 = vsel %vm5830_vm15, %v5697_v50, %v5958_v15  ;;  %v3881_v14 = vadd.f32 %v9241_v56, %v3842_v22  ;;  %v3732_v6 = vadd.f32 %v9070_v27, %v9063_v12  ;;  %v9256_v50 = vpop.f32.mrb[20].mxu1  ;;  %v10195_v27 = vld [vmem:[#allocation9_spill] sm:$0xff] }
 0x410   : > { %v5965_v43 = vsel %vm5828_vm14, %v5704_v34, %v5964_v47  ;;  %v3912_v41 = vmax.f32 %v3880_v62, 0.0  ;;  %v3743_v60 = vadd.f32 %v9079_v21, %v9090_v39  ;;  %v3843_v17 = vadd.f32 %v3729_v57, %v10194_v9  ;;  %v3529_v61 = vpop.f32.mrb[21].mxu1  ;;  %v10196_v39 = vld [vmem:[#allocation10_spill] sm:$0xff] }
 0x411   : > { %v5705_v28 = vmul.f32 0.25, %v5353_v46  ;;  %v3913_v16 = vmax.f32 %v3881_v14, 0.0  ;;  %v3746_v24 = vadd.f32 %v9081_v37, %v9098_v29  ;;  %v3844_v21 = vadd.f32 %v3732_v6, %v10195_v27  ;;  %v9267_v59 = vpop.f32.mrb[22].mxu1 }
 0x412   : > { %v3845_v25 = vadd.f32 %v3743_v60, %v10196_v39  ;;  %v4853_v4 = vsel %vm334_vm1, %v4817_v52, 0.0  ;;  %v3882_v35 = vadd.f32 %v9241_v56, %v3843_v17  ;;  %v4854_v37 = vsel %vm334_vm1, %v4819_v8, 0.0  ;;  %v3532_v32 = vpop.f32.mrb[23].mxu1 }
 0x413   : > { %v5966_v40 = vsel %vm5830_vm15, %v5705_v28, %v5965_v43  ;;  %v3846_v44 = vadd.f32 %v3746_v24, %v10197_v11  ;;  %v4856_v29 = vsel %vm334_vm1, %v4818_v3, 0.0  ;;  %v3883_v13 = vadd.f32 %v9241_v56, %v3844_v21 }
 0x414   : > { %v6018_v12 = vpack.c.bf16 %v5966_v40, %v5959_v38  ;;  %v9278_v0 = vadd.f32 %v9241_v56, %v3845_v25  ;;  %v4855_v45 = vadd.f32 %v4854_v37, %v4853_v4  ;;  %v4857_v7 = vsel %vm334_vm1, %v4820_v36, 0.0 }
 0x415   : > { %v10198_v33 = vpack.c.bf16 %v9066_v58, %v8992_v19  ;;  %v3914_v46 = vmax.f32 %v3882_v35, 0.0  ;;  %v9286_v10 = vadd.f32 %v9241_v56, %v3846_v44  ;;  %v4858_v55 = vadd.f32 %v4857_v7, %v4856_v29 }
 0x416   : > { %6475 = vmatprep.mubr.msk.bf16.mxu0 %vm334_vm1, %v6018_v12  ;;  %v4859_v30 = vsel %vm334_vm1, %v4821_v31, 0.0  ;;  %v3915_v22 = vmax.f32 %v3883_v13, 0.0  ;;  %v3916_v34 = vmax.f32 %v9278_v0, 0.0  ;;  %v4860_v15 = vsel %vm334_vm1, %v4823_v48, 0.0  ;;  %v3535_v43 = vpop.f32.mrb[24].mxu1 }
 0x417   : > { %6148 = vmatmul.mubr.bf16.vlgmr.msra.gmra.mrb[52].mxu0 %v10198_v33  ;;  %v4862_v47 = vsel %vm334_vm1, %v4822_v20, 0.0  ;;  %v3936_v62 = vadd.f32 %v3914_v46, %v3912_v41  ;;  %v9293_v38 = vadd.f32 %v4860_v15, %v4859_v30  ;;  %v4863_v19 = vsel %vm334_vm1, %v4824_v49, 0.0  ;;  %v3536_v8 = vpop.f32.mrb[25].mxu1 }
 0x418   : > { %v3937_v58 = vadd.f32 %v3915_v22, %v3913_v16  ;;  %v9296_v14 = vadd.f32 %v4863_v19, %v4862_v47  ;;  %v4973_v57 = vcombine.high %v4855_v45, %v4855_v45  ;;  %v9299_v52 = vrot.slane %v4855_v45, %v8812_v51  ;;  %v3537_v24 = vpop.f32.mrb[26].mxu1 }
 0x419   : > { %v4096_v6 = vcombine.high %v3936_v62, %v3936_v62  ;;  %v4103_v60 = vrot.slane %v3936_v62, %v8812_v51  ;;  %v4990_v3 = vcombine.high %v4858_v55, %v4858_v55  ;;  %v9303_v41 = vrot.slane %v4858_v55, %v8812_v51  ;;  %v3538_v21 = vpop.f32.mrb[27].mxu1 }
 0x41a   : > { %v4113_v40 = vcombine.high %v3937_v58, %v3937_v58  ;;  %v4120_v9 = vrot.slane %v3937_v58, %v8812_v51  ;;  %v9307_v16 = vrot.slane %v4973_v57, %v8812_v51  ;;  %v4988_v17 = vcombine.high %v9299_v52, %v9299_v52 }
 0x41b   : > { %v4110_v36 = vrot.slane %v4096_v6, %v8812_v51  ;;  %v4111_v61 = vcombine.high %v4103_v60, %v4103_v60  ;;  %v4521_v12 = vsel %vm4296_vm8, %v4103_v60, 0.0  ;;  %v9314_v27 = vrot.slane %v4990_v3, %v8812_v51 }
 0x41c   : > { %v4522_v39 = vrot.slane %v4521_v12, 4  ;;  %v4127_v25 = vrot.slane %v4113_v40, %v8812_v51  ;;  %v4128_v31 = vcombine.high %v4120_v9, %v4120_v9  ;;  %v4549_v4 = vsel %vm4296_vm8, %v4120_v9, 0.0 }
 0x41d   : > { %v4112_v35 = vcombine.high %v4110_v36, %v4110_v36  ;;  %v4528_v11 = vsel %vm4296_vm8, %v4111_v61, 0.0  ;;  %v4535_v44 = vsel %vm4296_vm8, %v4110_v36, 0.0  ;;  %v4550_v20 = vrot.slane %v4549_v4, 4 }
 0x41e   : > { %v4523_v48 = vadd.f32 %v4522_v39, %v4521_v12  ;;  %v4529_v37 = vrot.slane %v4528_v11, 4  ;;  %v4536_v29 = vrot.slane %v4535_v44, 4  ;;  %v4129_v32 = vcombine.high %v4127_v25, %v4127_v25 }
 0x41f   : > { %v4542_v13 = vsel %vm4296_vm8, %v4112_v35, 0.0  ;;  %v4551_v49 = vadd.f32 %v4550_v20, %v4549_v4  ;;  %v4556_v45 = vsel %vm4296_vm8, %v4128_v31, 0.0  ;;  %v4563_v7 = vsel %vm4296_vm8, %v4127_v25, 0.0 }
 0x420   : > { %v4524_v33 = vrot.slane %v4523_v48, 2  ;;  %v4530_v46 = vadd.f32 %v4529_v37, %v4528_v11  ;;  %v4537_v55 = vadd.f32 %v4536_v29, %v4535_v44  ;;  %v4543_v30 = vrot.slane %v4542_v13, 4 }
 0x421   : > { %v4552_v22 = vrot.slane %v4551_v49, 2  ;;  %v4557_v15 = vrot.slane %v4556_v45, 4  ;;  %v4564_v47 = vrot.slane %v4563_v7, 4  ;;  %v4570_v62 = vsel %vm4296_vm8, %v4129_v32, 0.0 }
 0x422   : > { %v4525_v19 = vadd.f32 %v4524_v33, %v4523_v48  ;;  %v4531_v58 = vrot.slane %v4530_v46, 2  ;;  %v4538_v57 = vrot.slane %v4537_v55, 2  ;;  %v4544_v43 = vadd.f32 %v4543_v30, %v4542_v13 }
 0x423   : > { %v4553_v6 = vadd.f32 %v4552_v22, %v4551_v49  ;;  %v4558_v60 = vadd.f32 %v4557_v15, %v4556_v45  ;;  %v4565_v3 = vadd.f32 %v4564_v47, %v4563_v7  ;;  %v4571_v8 = vrot.slane %v4570_v62, 4 }
 0x424   : > { %v4526_v40 = vrot.slane %v4525_v19, 1  ;;  %v4532_v9 = vadd.f32 %v4531_v58, %v4530_v46  ;;  %v4539_v24 = vadd.f32 %v4538_v57, %v4537_v55  ;;  %v4545_v36 = vrot.slane %v4544_v43, 2 }
 0x425   : > { %v4554_v61 = vrot.slane %v4553_v6, 1  ;;  %v4559_v12 = vrot.slane %v4558_v60, 2  ;;  %v4566_v21 = vrot.slane %v4565_v3, 2  ;;  %v4572_v39 = vadd.f32 %v4571_v8, %v4570_v62 }
 0x426   : > { %v4527_v25 = vadd.f32 %v4526_v40, %v4525_v19  ;;  %v4533_v31 = vrot.slane %v4532_v9, 1  ;;  %v4540_v4 = vrot.slane %v4539_v24, 1  ;;  %v4546_v35 = vadd.f32 %v4545_v36, %v4544_v43 }
 0x427   : > { %v4555_v11 = vadd.f32 %v4554_v61, %v4553_v6  ;;  %v4560_v44 = vadd.f32 %v4559_v12, %v4558_v60  ;;  %v4567_v20 = vadd.f32 %v4566_v21, %v4565_v3  ;;  %v4573_v48 = vrot.slane %v4572_v39, 2 }
 0x428   : > { %v4534_v37 = vadd.f32 %v4533_v31, %v4532_v9  ;;  %v4541_v29 = vadd.f32 %v4540_v4, %v4539_v24  ;;  %v4547_v32 = vrot.slane %v4546_v35, 1  ;;  %v4777_v13 = vmul.f32 0.25, %v4527_v25 }
 0x429   : > { %v4561_v49 = vrot.slane %v4560_v44, 1  ;;  %v4568_v45 = vrot.slane %v4567_v20, 1  ;;  %v4574_v7 = vadd.f32 %v4573_v48, %v4572_v39  ;;  %v4781_v33 = vmul.f32 0.25, %v4555_v11 }
 0x42a   : > { %v4548_v46 = vadd.f32 %v4547_v32, %v4546_v35  ;;  %v4778_v55 = vmul.f32 0.25, %v4534_v37  ;;  %v4779_v30 = vmul.f32 0.25, %v4541_v29  ;;  %v4989_v22 = vcombine.high %v9307_v16, %v9307_v16 }
 0x42b   : > { %v4562_v15 = vadd.f32 %v4561_v49, %v4560_v44  ;;  %v4569_v47 = vadd.f32 %v4568_v45, %v4567_v20  ;;  %v4575_v62 = vrot.slane %v4574_v7, 1  ;;  %v5005_v19 = vcombine.high %v9303_v41, %v9303_v41 }
 0x42c   : > { %v4780_v58 = vmul.f32 0.25, %v4548_v46  ;;  %v5853_v57 = vsel %vm5818_vm9, %v4778_v55, %v4777_v13  ;;  %v5006_v43 = vcombine.high %v9314_v27, %v9314_v27  ;;  %v5007_v6 = vcombine.high %v9293_v38, %v9293_v38 }
 0x42d   : > { %v5854_v60 = vsel %vm5820_vm10, %v4779_v30, %v5853_v57  ;;  %v4576_v3 = vadd.f32 %v4575_v62, %v4574_v7  ;;  %v4782_v8 = vmul.f32 0.25, %v4562_v15  ;;  %v4783_v40 = vmul.f32 0.25, %v4569_v47 }
 0x42e   : > { %v5855_v9 = vsel %vm5822_vm11, %v4780_v58, %v5854_v60  ;;  %v9337_v24 = vrot.slane %v9293_v38, %v8812_v51  ;;  %v9340_v36 = vrot.slane %v5007_v6, %v8812_v51  ;;  %v5024_v61 = vcombine.high %v9296_v14, %v9296_v14 }
 0x42f   : > { %v9344_v12 = vmul.f32 0.25, %v4576_v3  ;;  %v5856_v21 = vsel %vm5824_vm12, %v4781_v33, %v5855_v9  ;;  %v9349_v39 = vrot.slane %v9296_v14, %v8812_v51  ;;  %v5354_v25 = vsel %vm5241_vm7, %v9299_v52, 0.0  ;;  %v9381_v3 = vpop.f32.mrb[28].mxu1 }
 0x430   : > { %v5857_v38 = vsel %vm5826_vm13, %v4782_v8, %v5856_v21  ;;  %v5022_v31 = vcombine.high %v9337_v24, %v9337_v24  ;;  %v5023_v4 = vcombine.high %v9340_v36, %v9340_v36  ;;  %v9359_v35 = vrot.slane %v5024_v61, %v8812_v51  ;;  %v9383_v8 = vpop.f32.mrb[49].mxu0  ;;  %v3543_v61 = vpop.f32.mrb[29].mxu1 }
 0x431   : > { %v9362_v11 = vsel %vm5828_vm14, %v4783_v40, %v5857_v38  ;;  %v5039_v14 = vcombine.high %v9349_v39, %v9349_v39  ;;  %v5355_v44 = vrot.slane %v5354_v25, 4  ;;  %v5361_v20 = vsel %vm5241_vm7, %v4988_v17, 0.0  ;;  %v6896_v21 = vpop.f32.mrb[50].mxu0 }
 0x432   : > { %v5040_v48 = vcombine.high %v9359_v35, %v9359_v35  ;;  %v5362_v37 = vrot.slane %v5361_v20, 4  ;;  %v5368_v29 = vsel %vm5241_vm7, %v9307_v16, 0.0  ;;  %v5375_v32 = vsel %vm5241_vm7, %v4989_v22, 0.0 }
 0x433   : > { %v5356_v13 = vadd.f32 %v5355_v44, %v5354_v25  ;;  %v5369_v49 = vrot.slane %v5368_v29, 4  ;;  %v5376_v45 = vrot.slane %v5375_v32, 4  ;;  %v5382_v7 = vsel %vm5241_vm7, %v9303_v41, 0.0 }
 0x434   : > { %v5363_v33 = vadd.f32 %v5362_v37, %v5361_v20  ;;  %v5383_v46 = vrot.slane %v5382_v7, 4  ;;  %v5389_v52 = vsel %vm5241_vm7, %v5005_v19, 0.0  ;;  %v5396_v17 = vsel %vm5241_vm7, %v9314_v27, 0.0  ;;  %v9385_v37 = vpop.f32.mrb[30].mxu1 }
 0x435   : > { %v5357_v55 = vrot.slane %v5356_v13, 2  ;;  %v5370_v30 = vadd.f32 %v5369_v49, %v5368_v29  ;;  %v5377_v15 = vadd.f32 %v5376_v45, %v5375_v32  ;;  %v5390_v47 = vrot.slane %v5389_v52, 4  ;;  %v3546_v45 = vpop.f32.mrb[31].mxu1 }
 0x436   : > { %v5364_v16 = vrot.slane %v5363_v33, 2  ;;  %v5384_v62 = vadd.f32 %v5383_v46, %v5382_v7  ;;  %v5397_v22 = vrot.slane %v5396_v17, 4  ;;  %v5403_v58 = vsel %vm5241_vm7, %v5006_v43, 0.0  ;;  %v9387_v43 = vpop.f32.mrb[51].mxu0 }
 0x437   : > { %v5358_v57 = vadd.f32 %v5357_v55, %v5356_v13  ;;  %v5371_v6 = vrot.slane %v5370_v30, 2  ;;  %v5378_v60 = vrot.slane %v5377_v15, 2  ;;  %v5391_v41 = vadd.f32 %v5390_v47, %v5389_v52 }
 0x438   : > { %v5365_v19 = vadd.f32 %v5364_v16, %v5363_v33  ;;  %v5385_v40 = vrot.slane %v5384_v62, 2  ;;  %v5398_v27 = vadd.f32 %v5397_v22, %v5396_v17  ;;  %v5404_v9 = vrot.slane %v5403_v58, 4  ;;  %v3549_v17 = vpop.f32.mrb[32].mxu1 }
 0x439   : > { %v5359_v25 = vrot.slane %v5358_v57, 1  ;;  %v5372_v38 = vadd.f32 %v5371_v6, %v5370_v30  ;;  %v5379_v44 = vadd.f32 %v5378_v60, %v5377_v15  ;;  %v5392_v20 = vrot.slane %v5391_v41, 2  ;;  %v3550_v16 = vpop.f32.mrb[33].mxu1 }
 0x43a   : > { %v5366_v29 = vrot.slane %v5365_v19, 1  ;;  %v5386_v32 = vadd.f32 %v5385_v40, %v5384_v62  ;;  %v5399_v13 = vrot.slane %v5398_v27, 2  ;;  %v5405_v49 = vadd.f32 %v5404_v9, %v5403_v58 }
 0x43b   : > { %v9389_v7 = vadd.f32 %v5359_v25, %v5358_v57  ;;  %v5373_v33 = vrot.slane %v5372_v38, 1  ;;  %v5380_v46 = vrot.slane %v5379_v44, 1  ;;  %v5393_v52 = vadd.f32 %v5392_v20, %v5391_v41  ;;  %v3551_v57 = vpop.f32.mrb[34].mxu1 }
 0x43c   : > { %v9391_v55 = vadd.f32 %v5366_v29, %v5365_v19  ;;  %v5387_v30 = vrot.slane %v5386_v32, 1  ;;  %v5400_v15 = vadd.f32 %v5399_v13, %v5398_v27  ;;  %v5406_v47 = vrot.slane %v5405_v49, 2  ;;  %v3552_v19 = vpop.f32.mrb[35].mxu1 }
 0x43d   : > { %v9393_v22 = vadd.f32 %v5373_v33, %v5372_v38  ;;  %v9395_v6 = vadd.f32 %v5380_v46, %v5379_v44  ;;  %v5394_v62 = vrot.slane %v5393_v52, 1  ;;  %v5410_v58 = vsel %vm5241_vm7, %v9337_v24, 0.0  ;;  %v9413_v38 = vpop.f32.mrb[36].mxu1 }
 0x43e   : > { %v9399_v60 = vadd.f32 %v5387_v30, %v5386_v32  ;;  %v5401_v40 = vrot.slane %v5400_v15, 1  ;;  %v5407_v41 = vadd.f32 %v5406_v47, %v5405_v49  ;;  %v5411_v9 = vrot.slane %v5410_v58, 4  ;;  %v3557_v13 = vpop.f32.mrb[37].mxu1 }
 0x43f   : > { %v9401_v61 = vadd.f32 %v5394_v62, %v5393_v52  ;;  %v5417_v27 = vsel %vm5241_vm7, %v5022_v31, 0.0  ;;  %v5424_v21 = vsel %vm5241_vm7, %v9340_v36, 0.0  ;;  %v5431_v25 = vsel %vm5241_vm7, %v5023_v4, 0.0 }
 0x440   : > { %v5402_v44 = vadd.f32 %v5401_v40, %v5400_v15  ;;  %v5408_v20 = vrot.slane %v5407_v41, 1  ;;  %v5412_v29 = vadd.f32 %v5411_v9, %v5410_v58  ;;  %v5418_v32 = vrot.slane %v5417_v27, 4 }
 0x441   : > { %v5425_v49 = vrot.slane %v5424_v21, 4  ;;  %v5432_v45 = vrot.slane %v5431_v25, 4  ;;  %v5438_v24 = vsel %vm5241_vm7, %v9349_v39, 0.0  ;;  %v5445_v31 = vsel %vm5241_vm7, %v5039_v14, 0.0 }
 0x442   : > { %v5409_v36 = vadd.f32 %v5408_v20, %v5407_v41  ;;  %v5413_v33 = vrot.slane %v5412_v29, 2  ;;  %v5419_v4 = vadd.f32 %v5418_v32, %v5417_v27  ;;  %v5439_v46 = vrot.slane %v5438_v24, 4 }
 0x443   : > { %v5426_v52 = vadd.f32 %v5425_v49, %v5424_v21  ;;  %v5433_v17 = vadd.f32 %v5432_v45, %v5431_v25  ;;  %v5446_v30 = vrot.slane %v5445_v31, 4  ;;  %v5452_v15 = vsel %vm5241_vm7, %v9359_v35, 0.0 }
 0x444   : > { %v5414_v47 = vadd.f32 %v5413_v33, %v5412_v29  ;;  %v5420_v16 = vrot.slane %v5419_v4, 2  ;;  %v5440_v62 = vadd.f32 %v5439_v46, %v5438_v24  ;;  %v5453_v58 = vrot.slane %v5452_v15, 4 }
 0x445   : > { %v5427_v57 = vrot.slane %v5426_v52, 2  ;;  %v5434_v40 = vrot.slane %v5433_v17, 2  ;;  %v5447_v9 = vadd.f32 %v5446_v30, %v5445_v31  ;;  %v5459_v39 = vsel %vm5241_vm7, %v5040_v48, 0.0 }
 0x446   : > { %v5415_v14 = vrot.slane %v5414_v47, 1  ;;  %v5421_v41 = vadd.f32 %v5420_v16, %v5419_v4  ;;  %v5441_v19 = vrot.slane %v5440_v62, 2  ;;  %v5454_v27 = vadd.f32 %v5453_v58, %v5452_v15 }
 0x447   : > { %v5428_v21 = vadd.f32 %v5427_v57, %v5426_v52  ;;  %v5435_v25 = vadd.f32 %v5434_v40, %v5433_v17  ;;  %v5448_v20 = vrot.slane %v5447_v9, 2  ;;  %v5460_v32 = vrot.slane %v5459_v39, 4 }
 0x448   : > { %v5416_v29 = vadd.f32 %v5415_v14, %v5414_v47  ;;  %v5422_v13 = vrot.slane %v5421_v41, 1  ;;  %v5442_v49 = vadd.f32 %v5441_v19, %v5440_v62  ;;  %v5455_v45 = vrot.slane %v5454_v27, 2 }
 0x449   : > { %v5429_v24 = vrot.slane %v5428_v21, 1  ;;  %v5436_v33 = vrot.slane %v5435_v25, 1  ;;  %v5449_v31 = vadd.f32 %v5448_v20, %v5447_v9  ;;  %v5461_v46 = vadd.f32 %v5460_v32, %v5459_v39 }
 0x44a   : > { %v5423_v30 = vadd.f32 %v5422_v13, %v5421_v41  ;;  %v5443_v35 = vrot.slane %v5442_v49, 1  ;;  %v5456_v28 = vadd.f32 %v5455_v45, %v5454_v27  ;;  %v5706_v48 = vmul.f32 0.25, %v9389_v7  ;;  %v9433_v27 = vpop.f32.mrb[38].mxu1 }
 0x44b   : > { %v5430_v4 = vadd.f32 %v5429_v24, %v5428_v21  ;;  %v5437_v16 = vadd.f32 %v5436_v33, %v5435_v25  ;;  %v5450_v15 = vrot.slane %v5449_v31, 1  ;;  %v5462_v52 = vrot.slane %v5461_v46, 2 }
 0x44c   : > { %v5444_v17 = vadd.f32 %v5443_v35, %v5442_v49  ;;  %v5457_v58 = vrot.slane %v5456_v28, 1  ;;  %v5707_v47 = vmul.f32 0.25, %v9391_v55  ;;  %v5708_v62 = vmul.f32 0.25, %v9393_v22  ;;  %v3560_v55 = vpop.f32.mrb[39].mxu1  ;;  %v10199_v35 = vld [vmem:[#allocation12_spill] sm:$0xff] }
 0x44d   : > { %v5451_v57 = vadd.f32 %v5450_v15, %v5449_v31  ;;  %v5463_v40 = vadd.f32 %v5462_v52, %v5461_v46  ;;  %v5709_v9 = vmul.f32 0.25, %v9395_v6  ;;  %v5710_v39 = vmul.f32 0.25, %v9399_v60  ;;  %v10203_v52 = vld [vmem:[#allocation28_spill] sm:$0xff]  ;;  %v10207_v55 = vld [vmem:[#allocation29_spill] sm:$0xff] }
 0x44e   : > { %v5458_v14 = vadd.f32 %v5457_v58, %v5456_v28  ;;  %v5711_v41 = vmul.f32 0.25, %v9401_v61  ;;  %v5712_v7 = vmul.f32 0.25, %v5402_v44  ;;  %v5713_v19 = vmul.f32 0.25, %v5409_v36 }
 0x44f   : > { %v5464_v21 = vrot.slane %v5463_v40, 1  ;;  %v5714_v25 = vmul.f32 0.25, %v5416_v29  ;;  %v5715_v20 = vmul.f32 0.25, %v5423_v30  ;;  %v5716_v32 = vmul.f32 0.25, %v5430_v4  ;;  %v10200_v4 = vld [vmem:[#allocation31_spill] sm:$0xff] }
 0x450   : > { %v5717_v13 = vmul.f32 0.25, %v5437_v16  ;;  %v5718_v22 = vmul.f32 0.25, %v5444_v17  ;;  %v5719_v49 = vmul.f32 0.25, %v5451_v57  ;;  %v5720_v45 = vmul.f32 0.25, %v5458_v14  ;;  %v10201_v16 = vld [vmem:[#allocation26_spill] sm:$0xff] }
 0x451   : > { %v5465_v24 = vadd.f32 %v5464_v21, %v5463_v40  ;;  %v5967_v6 = vsel %vm5818_vm9, %v5707_v47, %v5706_v48  ;;  %v5974_v28 = vsel %vm5818_vm9, %v5715_v20, %v5714_v25  ;;  %v5845_v60 = vsel %vm5830_vm15, %v9119_v42, %v9122_v1  ;;  %v10204_v57 = vld [vmem:[#allocation14_spill] sm:$0xff] }
 0x452   : > { %v5968_v61 = vsel %vm5820_vm10, %v5708_v62, %v5967_v6  ;;  %v5975_v44 = vsel %vm5820_vm10, %v5716_v32, %v5974_v28  ;;  %v5852_v36 = vsel %vm5830_vm15, %v9195_v63, %v9207_v23  ;;  %v3757_v29 = vadd.f32 %v9093_v2, %v9165_v18  ;;  %v10202_v18 = vld [vmem:[#allocation30_spill] sm:$0xff] }
 0x453   : > { %v5721_v33 = vmul.f32 0.25, %v5465_v24  ;;  %v5969_v31 = vsel %vm5822_vm11, %v5709_v9, %v5968_v61  ;;  %v5976_v46 = vsel %vm5822_vm11, %v5717_v13, %v5975_v44  ;;  %v6019_v30 = vpack.c.bf16 %v5852_v36, %v5845_v60  ;;  %v4825_v9 = vld [vmem:[%s7268_s21 + $0x80] sm:$0xff]  ;;  %v10209_v60 = vld [vmem:[#allocation18_spill] sm:$0xff]  ;;  %v4828_v44 = vld [vmem:[%s7268_s21 + $0x98] sm:$0xff] }
 0x454   : > { %v5970_v42 = vsel %vm5824_vm12, %v5710_v39, %v5969_v31  ;;  %v5977_v1 = vsel %vm5824_vm12, %v5718_v22, %v5976_v46  ;;  %v3847_v48 = vadd.f32 %v3757_v29, %v10199_v35  ;;  %v3760_v63 = vadd.f32 %v10201_v16, %v10200_v4  ;;  %v4829_v36 = vld [vmem:[%s7268_s21 + $0xa0] sm:$0xff]  ;;  %v10210_v31 = vld [vmem:[#allocation19_spill] sm:$0xff] }
 0x455   : > { %v5971_v23 = vsel %vm5826_vm13, %v5711_v41, %v5970_v42  ;;  %v5978_v2 = vsel %vm5826_vm13, %v5719_v49, %v5977_v1  ;;  %v3771_v15 = vadd.f32 %v10202_v18, %v9192_v5  ;;  %v3774_v17 = vadd.f32 %v10203_v52, %v9203_v53  ;;  %v10205_v41 = vld [vmem:[#allocation15_spill] sm:$0xff]  ;;  %v10206_v5 = vld [vmem:[#allocation16_spill] sm:$0xff]  ;;  %v10208_v49 = vld [vmem:[#allocation21_spill] sm:$0xff] }
 0x456   : > { %v5972_v58 = vsel %vm5828_vm14, %v5712_v7, %v5971_v23  ;;  %v5979_v47 = vsel %vm5828_vm14, %v5720_v45, %v5978_v2  ;;  %v3886_v62 = vadd.f32 %v9241_v56, %v3847_v48  ;;  %v3848_v40 = vadd.f32 %v3760_v63, %v10204_v57  ;;  %v4827_v53 = vld [vmem:[%s7268_s21 + $0x90] sm:$0xff] }
 0x457   : > { %v5973_v39 = vsel %vm5830_vm15, %v5713_v19, %v5972_v58  ;;  %v5980_v14 = vsel %vm5830_vm15, %v5721_v33, %v5979_v47  ;;  %v3849_v21 = vadd.f32 %v3771_v15, %v10205_v41  ;;  %v3850_v25 = vadd.f32 %v3774_v17, %v10206_v5 }
 0x458   : > { %v6020_v7 = vpack.c.bf16 %v5980_v14, %v5973_v39  ;;  %v3918_v20 = vmax.f32 %v3886_v62, 0.0  ;;  %v3887_v32 = vadd.f32 %v9241_v56, %v3848_v40  ;;  %v3785_v13 = vadd.f32 %v10207_v55, %v9256_v50  ;;  %v4826_v50 = vld [vmem:[%s7268_s21 + $0x88] sm:$0xff] }
 0x459   : > { %v9474_v22 = vadd.f32 %v9241_v56, %v3849_v21  ;;  %v9477_v19 = vadd.f32 %v9241_v56, %v3850_v25  ;;  %v3788_v45 = vadd.f32 %v10208_v49, %v9267_v59  ;;  %v4865_v24 = vsel %vm334_vm1, %v4825_v9, 0.0 }
 0x45a   : > { %6476 = vmatprep.mubr.msk.bf16.mxu0 %vm334_vm1, %v6020_v7  ;;  %v3938_v6 = vadd.f32 %v3918_v20, %v3916_v34  ;;  %v3919_v28 = vmax.f32 %v3887_v32, 0.0  ;;  %v3851_v61 = vadd.f32 %v3785_v13, %v10209_v60  ;;  %v4866_v29 = vsel %vm334_vm1, %v4827_v53, 0.0 }
 0x45b   : > { %6156 = vmatmul.mubr.bf16.gmra.mrb[56].mxu0 %v6019_v30  ;;  %v3920_v33 = vmax.f32 %v9474_v22, 0.0  ;;  %v3921_v59 = vmax.f32 %v9477_v19, 0.0  ;;  %v3852_v46 = vadd.f32 %v3788_v45, %v10210_v31  ;;  %v9493_v42 = vadd.f32 %v4866_v29, %v4865_v24 }
 0x45c   : > { %v4130_v1 = vcombine.high %v3938_v6, %v3938_v6  ;;  %v4137_v0 = vrot.slane %v3938_v6, %v8812_v51  ;;  %v10211_v34 = vmax.f32 %v9286_v10, 0.0  ;;  %v9499_v48 = vadd.f32 %v9241_v56, %v3851_v61 }
 0x45d   : > { %v9502_v4 = vadd.f32 %v9241_v56, %v3852_v46  ;;  %v9505_v30 = vsel %vm334_vm1, %v4826_v50, 0.0  ;;  %v9508_v16 = vsel %vm334_vm1, %v4828_v44, 0.0  ;;  %v9511_v63 = vsel %vm334_vm1, %v4829_v36, 0.0 }
 0x45e   : > { %v3939_v35 = vadd.f32 %v3919_v28, %v10211_v34  ;;  %v4144_v23 = vrot.slane %v4130_v1, %v8812_v51  ;;  %v4145_v2 = vcombine.high %v4137_v0, %v4137_v0  ;;  %v4577_v10 = vsel %vm4296_vm8, %v4137_v0, 0.0 }
 0x45f   : > { %v4578_v15 = vrot.slane %v4577_v10, 4  ;;  %v3922_v56 = vmax.f32 %v9499_v48, 0.0  ;;  %v3923_v17 = vmax.f32 %v9502_v4, 0.0 }
 0x460   : > { %v4147_v18 = vcombine.high %v3939_v35, %v3939_v35  ;;  %v4154_v52 = vrot.slane %v3939_v35, %v8812_v51  ;;  %v4146_v58 = vcombine.high %v4144_v23, %v4144_v23  ;;  %v4584_v47 = vsel %vm4296_vm8, %v4145_v2, 0.0 }
 0x461   : > { %v4591_v62 = vsel %vm4296_vm8, %v4144_v23, 0.0  ;;  %v4579_v40 = vadd.f32 %v4578_v15, %v4577_v10  ;;  %v4585_v9 = vrot.slane %v4584_v47, 4 }
 0x462   : > { %v4161_v57 = vrot.slane %v4147_v18, %v8812_v51  ;;  %v4592_v39 = vrot.slane %v4591_v62, 4  ;;  %v4162_v14 = vcombine.high %v4154_v52, %v4154_v52  ;;  %v4598_v41 = vsel %vm4296_vm8, %v4146_v58, 0.0 }
 0x463   : > { %v4605_v5 = vsel %vm4296_vm8, %v4154_v52, 0.0  ;;  %v4580_v53 = vrot.slane %v4579_v40, 2  ;;  %v4586_v7 = vadd.f32 %v4585_v9, %v4584_v47  ;;  %v4599_v32 = vrot.slane %v4598_v41, 4 }
 0x464   : > { %v4163_v21 = vcombine.high %v4161_v57, %v4161_v57  ;;  %v4619_v25 = vsel %vm4296_vm8, %v4161_v57, 0.0  ;;  %v4593_v20 = vadd.f32 %v4592_v39, %v4591_v62  ;;  %v4606_v55 = vrot.slane %v4605_v5, 4 }
 0x465   : > { %v4612_v13 = vsel %vm4296_vm8, %v4162_v14, 0.0  ;;  %v4620_v49 = vrot.slane %v4619_v25, 4  ;;  %v4581_v24 = vadd.f32 %v4580_v53, %v4579_v40  ;;  %v4587_v6 = vrot.slane %v4586_v7, 2 }
 0x466   : > { %v4626_v45 = vsel %vm4296_vm8, %v4163_v21, 0.0  ;;  %v4594_v28 = vrot.slane %v4593_v20, 2  ;;  %v4600_v60 = vadd.f32 %v4599_v32, %v4598_v41  ;;  %v4607_v61 = vadd.f32 %v4606_v55, %v4605_v5 }
 0x467   : > { %v4613_v50 = vrot.slane %v4612_v13, 4  ;;  %v4621_v44 = vadd.f32 %v4620_v49, %v4619_v25  ;;  %v4627_v36 = vrot.slane %v4626_v45, 4  ;;  %v4582_v29 = vrot.slane %v4581_v24, 1 }
 0x468   : > { %v4588_v31 = vadd.f32 %v4587_v6, %v4586_v7  ;;  %v4595_v46 = vadd.f32 %v4594_v28, %v4593_v20  ;;  %v4601_v1 = vrot.slane %v4600_v60, 2  ;;  %v4608_v0 = vrot.slane %v4607_v61, 2 }
 0x469   : > { %v4614_v34 = vadd.f32 %v4613_v50, %v4612_v13  ;;  %v4622_v35 = vrot.slane %v4621_v44, 2  ;;  %v4628_v48 = vadd.f32 %v4627_v36, %v4626_v45  ;;  %v4583_v23 = vadd.f32 %v4582_v29, %v4581_v24 }
 0x46a   : > { %v4589_v2 = vrot.slane %v4588_v31, 1  ;;  %v4596_v10 = vrot.slane %v4595_v46, 1  ;;  %v4602_v18 = vadd.f32 %v4601_v1, %v4600_v60  ;;  %v4609_v15 = vadd.f32 %v4608_v0, %v4607_v61 }
 0x46b   : > { %v4615_v52 = vrot.slane %v4614_v34, 2  ;;  %v4623_v58 = vadd.f32 %v4622_v35, %v4621_v44  ;;  %v4629_v47 = vrot.slane %v4628_v48, 2  ;;  %v4785_v9 = vmul.f32 0.25, %v4583_v23 }
 0x46c   : > { %v4590_v62 = vadd.f32 %v4589_v2, %v4588_v31  ;;  %v4597_v57 = vadd.f32 %v4596_v10, %v4595_v46  ;;  %v4603_v40 = vrot.slane %v4602_v18, 1  ;;  %v4610_v39 = vrot.slane %v4609_v15, 1 }
 0x46d   : > { %v4616_v14 = vadd.f32 %v4615_v52, %v4614_v34  ;;  %v4624_v41 = vrot.slane %v4623_v58, 1  ;;  %v4630_v21 = vadd.f32 %v4629_v47, %v4628_v48  ;;  %v3940_v7 = vadd.f32 %v3922_v56, %v3920_v33 }
 0x46e   : > { %v4604_v5 = vadd.f32 %v4603_v40, %v4602_v18  ;;  %v4786_v25 = vmul.f32 0.25, %v4590_v62  ;;  %v4787_v53 = vmul.f32 0.25, %v4597_v57  ;;  %v4611_v20 = vadd.f32 %v4610_v39, %v4609_v15  ;;  %v4830_v18 = vld [vmem:[%s7268_s21 + $0xa8] sm:$0xff]  ;;  %v4831_v15 = vld [vmem:[%s7268_s21 + $0xb0] sm:$0xff] }
 0x46f   : > { %v4617_v32 = vrot.slane %v4616_v14, 1  ;;  %v4625_v55 = vadd.f32 %v4624_v41, %v4623_v58  ;;  %v4631_v13 = vrot.slane %v4630_v21, 1  ;;  %v4164_v24 = vcombine.high %v3940_v7, %v3940_v7 }
 0x470   : > { %v4788_v49 = vmul.f32 0.25, %v4604_v5  ;;  %v5860_v45 = vsel %vm5818_vm9, %v4786_v25, %v4785_v9  ;;  %v4171_v6 = vrot.slane %v3940_v7, %v8812_v51  ;;  %v4789_v50 = vmul.f32 0.25, %v4611_v20 }
 0x471   : > { %v5861_v28 = vsel %vm5820_vm10, %v4787_v53, %v5860_v45  ;;  %v4618_v60 = vadd.f32 %v4617_v32, %v4616_v14  ;;  %v4632_v61 = vadd.f32 %v4631_v13, %v4630_v21  ;;  %v4791_v44 = vmul.f32 0.25, %v4625_v55 }
 0x472   : > { %v5862_v22 = vsel %vm5822_vm11, %v4788_v49, %v5861_v28  ;;  %v4178_v33 = vrot.slane %v4164_v24, %v8812_v51  ;;  %v4179_v56 = vcombine.high %v4171_v6, %v4171_v6  ;;  %v4633_v46 = vsel %vm4296_vm8, %v4171_v6, 0.0 }
 0x473   : > { %v4790_v36 = vmul.f32 0.25, %v4618_v60  ;;  %v9533_v29 = vmul.f32 0.25, %v4632_v61  ;;  %v5863_v31 = vsel %vm5824_vm12, %v4789_v50, %v5862_v22  ;;  %v4634_v0 = vrot.slane %v4633_v46, 4 }
 0x474   : > { %v4180_v1 = vcombine.high %v4178_v33, %v4178_v33  ;;  %v4640_v34 = vsel %vm4296_vm8, %v4179_v56, 0.0  ;;  %v4647_v35 = vsel %vm4296_vm8, %v4178_v33, 0.0  ;;  %v3941_v10 = vadd.f32 %v3923_v17, %v3921_v59 }
 0x475   : > { %v5864_v48 = vsel %vm5826_vm13, %v4790_v36, %v5863_v31  ;;  %v4641_v23 = vrot.slane %v4640_v34, 4  ;;  %v4648_v2 = vrot.slane %v4647_v35, 4  ;;  %v4635_v58 = vadd.f32 %v4634_v0, %v4633_v46  ;;  %v4832_v46 = vld [vmem:[%s7268_s21 + $0xb8] sm:$0xff] }
 0x476   : > { %v9547_v52 = vsel %vm5828_vm14, %v4791_v44, %v5864_v48  ;;  %v4654_v47 = vsel %vm4296_vm8, %v4180_v1, 0.0  ;;  %v9552_v62 = vadd.f32 %v9508_v16, %v9505_v30  ;;  %v4181_v39 = vcombine.high %v3941_v10, %v3941_v10 }
 0x477   : > { %v4642_v57 = vadd.f32 %v4641_v23, %v4640_v34  ;;  %v4649_v40 = vadd.f32 %v4648_v2, %v4647_v35  ;;  %v4655_v9 = vrot.slane %v4654_v47, 4  ;;  %v4636_v19 = vrot.slane %v4635_v58, 2 }
 0x478   : > { %v4188_v4 = vrot.slane %v3941_v10, %v8812_v51  ;;  %v4872_v59 = vsel %vm334_vm1, %v4831_v15, 0.0  ;;  %v4874_v17 = vsel %vm334_vm1, %v4830_v18, 0.0  ;;  %v4195_v5 = vrot.slane %v4181_v39, %v8812_v51 }
 0x479   : > { %v4643_v14 = vrot.slane %v4642_v57, 2  ;;  %v4650_v41 = vrot.slane %v4649_v40, 2  ;;  %v4656_v21 = vadd.f32 %v4655_v9, %v4654_v47  ;;  %v4637_v25 = vadd.f32 %v4636_v19, %v4635_v58 }
 0x47a   : > { %v4196_v53 = vcombine.high %v4188_v4, %v4188_v4  ;;  %v4661_v30 = vsel %vm4296_vm8, %v4188_v4, 0.0  ;;  %v9560_v16 = vadd.f32 %v4872_v59, %v9511_v63  ;;  %v4197_v55 = vcombine.high %v4195_v5, %v4195_v5 }
 0x47b   : > { %v4644_v7 = vadd.f32 %v4643_v14, %v4642_v57  ;;  %v4651_v20 = vadd.f32 %v4650_v41, %v4649_v40  ;;  %v4657_v32 = vrot.slane %v4656_v21, 2  ;;  %v4638_v13 = vrot.slane %v4637_v25, 1 }
 0x47c   : > { %v4662_v49 = vrot.slane %v4661_v30, 4  ;;  %v4668_v45 = vsel %vm4296_vm8, %v4196_v53, 0.0  ;;  %v4675_v24 = vsel %vm4296_vm8, %v4195_v5, 0.0  ;;  %v4682_v63 = vsel %vm4296_vm8, %v4197_v55, 0.0 }
 0x47d   : > { %v4645_v6 = vrot.slane %v4644_v7, 1  ;;  %v4652_v28 = vrot.slane %v4651_v20, 1  ;;  %v4658_v60 = vadd.f32 %v4657_v32, %v4656_v21  ;;  %v4669_v61 = vrot.slane %v4668_v45, 4 }
 0x47e   : > { %v4639_v50 = vadd.f32 %v4638_v13, %v4637_v25  ;;  %v4663_v44 = vadd.f32 %v4662_v49, %v4661_v30  ;;  %v4676_v22 = vrot.slane %v4675_v24, 4  ;;  %v4683_v35 = vrot.slane %v4682_v63, 4 }
 0x47f   : > { %v4646_v33 = vadd.f32 %v4645_v6, %v4644_v7  ;;  %v4653_v56 = vadd.f32 %v4652_v28, %v4651_v20  ;;  %v4659_v36 = vrot.slane %v4658_v60, 1  ;;  %v4670_v31 = vadd.f32 %v4669_v61, %v4668_v45 }
 0x480   : > { %v4793_v1 = vmul.f32 0.25, %v4639_v50  ;;  %v4664_v0 = vrot.slane %v4663_v44, 2  ;;  %v4677_v34 = vadd.f32 %v4676_v22, %v4675_v24  ;;  %v4684_v58 = vadd.f32 %v4683_v35, %v4682_v63 }
 0x481   : > { %v4660_v48 = vadd.f32 %v4659_v36, %v4658_v60  ;;  %v4794_v23 = vmul.f32 0.25, %v4646_v33  ;;  %v4795_v2 = vmul.f32 0.25, %v4653_v56  ;;  %v4671_v10 = vrot.slane %v4670_v31, 2 }
 0x482   : > { %v4665_v18 = vadd.f32 %v4664_v0, %v4663_v44  ;;  %v4678_v15 = vrot.slane %v4677_v34, 2  ;;  %v4875_v47 = vsel %vm334_vm1, %v4832_v46, 0.0  ;;  %v4685_v14 = vrot.slane %v4684_v58, 2 }
 0x483   : > { %v4796_v57 = vmul.f32 0.25, %v4660_v48  ;;  %v5867_v40 = vsel %vm5818_vm9, %v4794_v23, %v4793_v1  ;;  %v4672_v9 = vadd.f32 %v4671_v10, %v4670_v31  ;;  %v4876_v39 = vadd.f32 %v4875_v47, %v4874_v17 }
 0x484   : > { %v5868_v19 = vsel %vm5820_vm10, %v4795_v2, %v5867_v40  ;;  %v4666_v4 = vrot.slane %v4665_v18, 1  ;;  %v4679_v59 = vadd.f32 %v4678_v15, %v4677_v34  ;;  %v5041_v5 = vcombine.high %v9493_v42, %v9493_v42 }
 0x485   : > { %v4673_v41 = vrot.slane %v4672_v9, 1  ;;  %v5869_v21 = vsel %vm5822_vm11, %v4796_v57, %v5868_v19  ;;  %v5048_v25 = vrot.slane %v9493_v42, %v8812_v51  ;;  %v4686_v7 = vadd.f32 %v4685_v14, %v4684_v58 }
 0x486   : > { %v4667_v53 = vadd.f32 %v4666_v4, %v4665_v18  ;;  %v4680_v30 = vrot.slane %v4679_v59, 1  ;;  %v5058_v17 = vcombine.high %v9552_v62, %v9552_v62  ;;  %v5055_v32 = vrot.slane %v5041_v5, %v8812_v51 }
 0x487   : > { %v4674_v20 = vadd.f32 %v4673_v41, %v4672_v9  ;;  %v5056_v55 = vcombine.high %v5048_v25, %v5048_v25  ;;  %v5065_v13 = vrot.slane %v9552_v62, %v8812_v51  ;;  %v4687_v45 = vrot.slane %v4686_v7, 1 }
 0x488   : > { %v4681_v49 = vadd.f32 %v4680_v30, %v4679_v59  ;;  %v4797_v24 = vmul.f32 0.25, %v4667_v53  ;;  %v5072_v6 = vrot.slane %v5058_v17, %v8812_v51  ;;  %v5057_v42 = vcombine.high %v5055_v32, %v5055_v32 }
 0x489   : > { %v4798_v28 = vmul.f32 0.25, %v4674_v20  ;;  %v5073_v60 = vcombine.high %v5065_v13, %v5065_v13  ;;  %v5075_v61 = vcombine.high %v9560_v16, %v9560_v16  ;;  %v4688_v50 = vadd.f32 %v4687_v45, %v4686_v7 }
 0x48a   : > { %v4799_v44 = vmul.f32 0.25, %v4681_v49  ;;  %v5870_v22 = vsel %vm5824_vm12, %v4797_v24, %v5869_v21  ;;  %v5074_v63 = vcombine.high %v5072_v6, %v5072_v6  ;;  %v9586_v62 = vrot.slane %v9560_v16, %v8812_v51 }
 0x48b   : > { %v5871_v33 = vsel %vm5826_vm13, %v4798_v28, %v5870_v22  ;;  %v9589_v56 = vrot.slane %v5075_v61, %v8812_v51  ;;  %v5092_v36 = vcombine.high %v4876_v39, %v4876_v39  ;;  %v9591_v31 = vmul.f32 0.25, %v4688_v50 }
 0x48c   : > { %v9594_v46 = vsel %vm5828_vm14, %v4799_v44, %v5871_v33  ;;  %v9597_v1 = vrot.slane %v4876_v39, %v8812_v51  ;;  %v5466_v0 = vsel %vm5241_vm7, %v5048_v25, 0.0  ;;  %v5090_v34 = vcombine.high %v9586_v62, %v9586_v62 }
 0x48d   : > { %v5091_v16 = vcombine.high %v9589_v56, %v9589_v56  ;;  %v9605_v35 = vrot.slane %v5092_v36, %v8812_v51  ;;  %v5467_v48 = vrot.slane %v5466_v0, 4  ;;  %v5473_v2 = vsel %vm5241_vm7, %v5056_v55, 0.0 }
 0x48e   : > { %v5107_v23 = vcombine.high %v9597_v1, %v9597_v1  ;;  %v5480_v10 = vsel %vm5241_vm7, %v5055_v32, 0.0  ;;  %v5487_v18 = vsel %vm5241_vm7, %v5057_v42, 0.0  ;;  %v5474_v47 = vrot.slane %v5473_v2, 4 }
 0x48f   : > { %v5108_v15 = vcombine.high %v9605_v35, %v9605_v35  ;;  %v5468_v58 = vadd.f32 %v5467_v48, %v5466_v0  ;;  %v5481_v57 = vrot.slane %v5480_v10, 4  ;;  %v5488_v40 = vrot.slane %v5487_v18, 4 }
 0x490   : > { %v5494_v9 = vsel %vm5241_vm7, %v5065_v13, 0.0  ;;  %v5501_v39 = vsel %vm5241_vm7, %v5073_v60, 0.0  ;;  %v5508_v19 = vsel %vm5241_vm7, %v5072_v6, 0.0  ;;  %v5475_v59 = vadd.f32 %v5474_v47, %v5473_v2 }
 0x491   : > { %v5469_v4 = vrot.slane %v5468_v58, 2  ;;  %v5482_v14 = vadd.f32 %v5481_v57, %v5480_v10  ;;  %v5495_v41 = vrot.slane %v5494_v9, 4  ;;  %v5489_v21 = vadd.f32 %v5488_v40, %v5487_v18 }
 0x492   : > { %v5502_v5 = vrot.slane %v5501_v39, 4  ;;  %v5509_v25 = vrot.slane %v5508_v19, 4  ;;  %v5515_v53 = vsel %vm5241_vm7, %v5074_v63, 0.0  ;;  %v5476_v7 = vrot.slane %v5475_v59, 2 }
 0x493   : > { %v5470_v30 = vadd.f32 %v5469_v4, %v5468_v58  ;;  %v5483_v17 = vrot.slane %v5482_v14, 2  ;;  %v5496_v20 = vadd.f32 %v5495_v41, %v5494_v9  ;;  %v5490_v32 = vrot.slane %v5489_v21, 2 }
 0x494   : > { %v5503_v55 = vadd.f32 %v5502_v5, %v5501_v39  ;;  %v5510_v13 = vadd.f32 %v5509_v25, %v5508_v19  ;;  %v5516_v49 = vrot.slane %v5515_v53, 4  ;;  %v5477_v24 = vadd.f32 %v5476_v7, %v5475_v59 }
 0x495   : > { %v5471_v45 = vrot.slane %v5470_v30, 1  ;;  %v5484_v6 = vadd.f32 %v5483_v17, %v5482_v14  ;;  %v5497_v28 = vrot.slane %v5496_v20, 2  ;;  %v5491_v42 = vadd.f32 %v5490_v32, %v5489_v21 }
 0x496   : > { %v5504_v60 = vrot.slane %v5503_v55, 2  ;;  %v5511_v61 = vrot.slane %v5510_v13, 2  ;;  %v5517_v50 = vadd.f32 %v5516_v49, %v5515_v53  ;;  %v5478_v22 = vrot.slane %v5477_v24, 1 }
 0x497   : > { %v9618_v44 = vadd.f32 %v5471_v45, %v5470_v30  ;;  %v5485_v63 = vrot.slane %v5484_v6, 1  ;;  %v5498_v33 = vadd.f32 %v5497_v28, %v5496_v20  ;;  %v5492_v36 = vrot.slane %v5491_v42, 1 }
 0x498   : > { %v5505_v0 = vadd.f32 %v5504_v60, %v5503_v55  ;;  %v5512_v48 = vadd.f32 %v5511_v61, %v5510_v13  ;;  %v5518_v2 = vrot.slane %v5517_v50, 2  ;;  %v5479_v10 = vadd.f32 %v5478_v22, %v5477_v24 }
 0x499   : > { %v9620_v18 = vadd.f32 %v5485_v63, %v5484_v6  ;;  %v5499_v58 = vrot.slane %v5498_v33, 1  ;;  %v5522_v47 = vsel %vm5241_vm7, %v9586_v62, 0.0  ;;  %v5493_v57 = vadd.f32 %v5492_v36, %v5491_v42 }
 0x49a   : > { %v5506_v40 = vrot.slane %v5505_v0, 1  ;;  %v5513_v9 = vrot.slane %v5512_v48, 1  ;;  %v5519_v39 = vadd.f32 %v5518_v2, %v5517_v50  ;;  %v5523_v4 = vrot.slane %v5522_v47, 4 }
 0x49b   : > { %v5500_v19 = vadd.f32 %v5499_v58, %v5498_v33  ;;  %v5529_v59 = vsel %vm5241_vm7, %v5090_v34, 0.0  ;;  %v5536_v14 = vsel %vm5241_vm7, %v9589_v56, 0.0  ;;  %v5543_v62 = vsel %vm5241_vm7, %v5091_v16, 0.0 }
 0x49c   : > { %v5507_v41 = vadd.f32 %v5506_v40, %v5505_v0  ;;  %v5514_v21 = vadd.f32 %v5513_v9, %v5512_v48  ;;  %v5520_v5 = vrot.slane %v5519_v39, 1  ;;  %v5530_v25 = vrot.slane %v5529_v59, 4 }
 0x49d   : > { %v5524_v53 = vadd.f32 %v5523_v4, %v5522_v47  ;;  %v5537_v30 = vrot.slane %v5536_v14, 4  ;;  %v5550_v7 = vsel %vm5241_vm7, %v9597_v1, 0.0  ;;  %v5544_v34 = vrot.slane %v5543_v62, 4 }
 0x49e   : > { %v5521_v17 = vadd.f32 %v5520_v5, %v5519_v39  ;;  %v5531_v20 = vadd.f32 %v5530_v25, %v5529_v59  ;;  %v5551_v32 = vrot.slane %v5550_v7, 4  ;;  %v5557_v49 = vsel %vm5241_vm7, %v5107_v23, 0.0 }
 0x49f   : > { %v5525_v55 = vrot.slane %v5524_v53, 2  ;;  %v5538_v13 = vadd.f32 %v5537_v30, %v5536_v14  ;;  %v5564_v45 = vsel %vm5241_vm7, %v9605_v35, 0.0  ;;  %v5545_v24 = vadd.f32 %v5544_v34, %v5543_v62 }
 0x4a0   : > { %v5532_v56 = vrot.slane %v5531_v20, 2  ;;  %v5552_v16 = vadd.f32 %v5551_v32, %v5550_v7  ;;  %v5558_v6 = vrot.slane %v5557_v49, 4  ;;  %v5565_v60 = vrot.slane %v5564_v45, 4 }
 0x4a1   : > { %v5526_v28 = vadd.f32 %v5525_v55, %v5524_v53  ;;  %v5539_v42 = vrot.slane %v5538_v13, 2  ;;  %v5571_v61 = vsel %vm5241_vm7, %v5108_v15, 0.0  ;;  %v5546_v22 = vrot.slane %v5545_v24, 2 }
 0x4a2   : > { %v5533_v50 = vadd.f32 %v5532_v56, %v5531_v20  ;;  %v5553_v1 = vrot.slane %v5552_v16, 2  ;;  %v5559_v63 = vadd.f32 %v5558_v6, %v5557_v49  ;;  %v5566_v36 = vadd.f32 %v5565_v60, %v5564_v45 }
 0x4a3   : > { %v5527_v23 = vrot.slane %v5526_v28, 1  ;;  %v5540_v33 = vadd.f32 %v5539_v42, %v5538_v13  ;;  %v5572_v0 = vrot.slane %v5571_v61, 4  ;;  %v5547_v2 = vadd.f32 %v5546_v22, %v5545_v24 }
 0x4a4   : > { %v5534_v48 = vrot.slane %v5533_v50, 1  ;;  %v5554_v58 = vadd.f32 %v5553_v1, %v5552_v16  ;;  %v5560_v47 = vrot.slane %v5559_v63, 2  ;;  %v5567_v39 = vrot.slane %v5566_v36, 2 }
 0x4a5   : > { %v5528_v40 = vadd.f32 %v5527_v23, %v5526_v28  ;;  %v5541_v9 = vrot.slane %v5540_v33, 1  ;;  %v5573_v4 = vadd.f32 %v5572_v0, %v5571_v61  ;;  %v5548_v35 = vrot.slane %v5547_v2, 1 }
 0x4a6   : > { %v5535_v59 = vadd.f32 %v5534_v48, %v5533_v50  ;;  %v5555_v14 = vrot.slane %v5554_v58, 1  ;;  %v5561_v15 = vadd.f32 %v5560_v47, %v5559_v63  ;;  %v5568_v25 = vadd.f32 %v5567_v39, %v5566_v36  ;;  %v4833_v47 = vld [vmem:[%s7268_s21 + $0xc0] sm:$0xff]  ;;  %v4835_v39 = vld [vmem:[%s7268_s21 + $0xd0] sm:$0xff] }
 0x4a7   : > { %v5542_v5 = vadd.f32 %v5541_v9, %v5540_v33  ;;  %v5574_v53 = vrot.slane %v5573_v4, 2  ;;  %v5722_v30 = vmul.f32 0.25, %v9618_v44  ;;  %v5549_v62 = vadd.f32 %v5548_v35, %v5547_v2  ;;  %v4834_v35 = vld [vmem:[%s7268_s21 + $0xc8] sm:$0xff] }
 0x4a8   : > { %v5556_v7 = vadd.f32 %v5555_v14, %v5554_v58  ;;  %v5562_v20 = vrot.slane %v5561_v15, 1  ;;  %v5723_v34 = vmul.f32 0.25, %v5479_v10  ;;  %v5569_v32 = vrot.slane %v5568_v25, 1 }
 0x4a9   : > { %v5575_v55 = vadd.f32 %v5574_v53, %v5573_v4  ;;  %v5724_v13 = vmul.f32 0.25, %v9620_v18  ;;  %v5725_v49 = vmul.f32 0.25, %v5493_v57  ;;  %v5726_v56 = vmul.f32 0.25, %v5500_v19  ;;  %v4836_v53 = vld [vmem:[%s7268_s21 + $0xd8] sm:$0xff] }
 0x4aa   : > { %v5563_v45 = vadd.f32 %v5562_v20, %v5561_v15  ;;  %v5727_v24 = vmul.f32 0.25, %v5507_v41  ;;  %v5728_v16 = vmul.f32 0.25, %v5514_v21  ;;  %v5570_v6 = vadd.f32 %v5569_v32, %v5568_v25  ;;  %v7090_v15 = vld [vmem:[%s9934_s4] ss:$0 sm:$0xff]  ;;  %v4838_v32 = vld [vmem:[%s7268_s21 + $0xe8] sm:$0xff] }
 0x4ab   : > { %v5576_v28 = vrot.slane %v5575_v55, 1  ;;  %v5729_v42 = vmul.f32 0.25, %v5521_v17  ;;  %v5730_v60 = vmul.f32 0.25, %v5528_v40  ;;  %v5731_v61 = vmul.f32 0.25, %v5535_v59 }
 0x4ac   : > { %v5732_v50 = vmul.f32 0.25, %v5542_v5  ;;  %v5733_v44 = vmul.f32 0.25, %v5549_v62  ;;  %v5734_v22 = vmul.f32 0.25, %v5556_v7  ;;  %v5735_v63 = vmul.f32 0.25, %v5563_v45 }
 0x4ad   : > { %v5577_v1 = vadd.f32 %v5576_v28, %v5575_v55  ;;  %v5736_v10 = vmul.f32 0.25, %v5570_v6  ;;  %v5981_v23 = vsel %vm5818_vm9, %v5723_v34, %v5722_v30  ;;  %v5988_v57 = vsel %vm5818_vm9, %v5731_v61, %v5730_v60  ;;  %v4837_v30 = vld [vmem:[%s7268_s21 + $0xe0] sm:$0xff]  ;;  %v4839_v55 = vld [vmem:[%s7268_s21 + $0xf0] sm:$0xff] }
 0x4ae   : > { %v5982_v18 = vsel %vm5820_vm10, %v5724_v13, %v5981_v23  ;;  %v5859_v19 = vsel %vm5830_vm15, %v9344_v12, %v9362_v11  ;;  %v5866_v41 = vsel %vm5830_vm15, %v9533_v29, %v9547_v52  ;;  %v5989_v33 = vsel %vm5820_vm10, %v5732_v50, %v5988_v57  ;;  %v4840_v13 = vld [vmem:[%s7268_s21 + $0xf8] sm:$0xff]  ;;  %s269_s21 = sand.u32 1, %s7146_s25  }
 0x4af   : > { %v5737_v21 = vmul.f32 0.25, %v5577_v1  ;;  %v5983_v17 = vsel %vm5822_vm11, %v5725_v49, %v5982_v18  ;;  %v6021_v36 = vpack.c.bf16 %v5866_v41, %v5859_v19  ;;  %v5990_v48 = vsel %vm5822_vm11, %v5733_v44, %v5989_v33  ;;  %s6276_s23 = sshll.u32 %s269_s21, 6  ;;  %s9889_s28 = scalar_lea.sflag [#allocation5], %s269_s21 }
 0x4b0   : > { %v5984_v0 = vsel %vm5824_vm12, %v5726_v56, %v5983_v17  ;;  %v3799_v2 = vadd.f32 %v9177_v54, %v9381_v3  ;;  %v3802_v12 = vadd.f32 %v9179_v26, %v9385_v37  ;;  %v5991_v29 = vsel %vm5824_vm12, %v5734_v22, %v5990_v48  ;;  %v10212_v3 = vld [vmem:[#allocation20_spill] sm:$0xff]  ;;  %v10213_v26 = vld [vmem:[#allocation22_spill] sm:$0xff]  ;;  %s9861_s29 = scalar_lea.vmem [#allocation4], %s6276_s23 }
 0x4b1   : > { %v5985_v11 = vsel %vm5826_vm13, %v5727_v24, %v5984_v0  ;;  %v3813_v52 = vadd.f32 %v9383_v8, %v9413_v38  ;;  %v3816_v58 = vadd.f32 %v9387_v43, %v9433_v27  ;;  %v5992_v54 = vsel %vm5826_vm13, %v5735_v63, %v5991_v29  ;;  %v10214_v38 = vld [vmem:[#allocation56_spill] sm:$0xff]  ;;  %v10215_v27 = vld [vmem:[#allocation23_spill] sm:$0xff]  ;;  %s6210_s9 = sshll.u32 %s9861_s29, 4  ;;  %s9883_s9 = int_to_ptr.vmem [resolvable:$true] %s6210_s9 }
 0x4b2   : > { %v5986_v40 = vsel %vm5828_vm14, %v5728_v16, %v5985_v11  ;;  %v3853_v9 = vadd.f32 %v3799_v2, %v10212_v3  ;;  %v3854_v37 = vadd.f32 %v3802_v12, %v10213_v26  ;;  %v5993_v8 = vsel %vm5828_vm14, %v5736_v10, %v5992_v54  ;;  %s7092_s16 = scalar_lea.vmem %s9883_s9, 1024  ;;  %p7099_p0 = scmp.lt.s32.totalorder %s9883_s9, %s7097_s18 }
 0x4b3   : > { %v5987_v4 = vsel %vm5830_vm15, %v5729_v42, %v5986_v40  ;;  %v3855_v43 = vadd.f32 %v3813_v52, %v10214_v38  ;;  %v3856_v59 = vadd.f32 %v3816_v58, %v10215_v27  ;;  %v5994_v14 = vsel %vm5830_vm15, %v5737_v21, %v5993_v8  ;;  %p7093_p11 = scmp.ne.s32.totalorder %s9883_s9, %s7092_s16  ;;  %p7100_p1 = scmp.lt.s32.totalorder %s7098_s19, %s7092_s16 }
 0x4b4   : > { %v3892_v5 = vadd.f32 %v7090_v15, %v3853_v9  ;;  %v3893_v25 = vadd.f32 %v7090_v15, %v3854_v37  ;;  %v4877_v62 = vsel %vm334_vm1, %v4833_v47, 0.0  ;;  %v6022_v7 = vpack.c.bf16 %v5994_v14, %v5987_v4 }
 0x4b5   : > { %v3894_v20 = vadd.f32 %v7090_v15, %v3855_v43  ;;  %v3895_v34 = vadd.f32 %v7090_v15, %v3856_v59  ;;  %v4878_v49 = vsel %vm334_vm1, %v4835_v39, 0.0  ;;  %v4880_v16 = vsel %vm334_vm1, %v4834_v35, 0.0  ;;  %p7094_p12 = pnand %p7093_p11, %p7239_p5  ;;  %p7101_p2 = por %p7100_p1, %p7099_p0 }
 0x4b6   : > { %v3924_v45 = vmax.f32 %v3892_v5, 0.0  ;;  %v3925_v56 = vmax.f32 %v3893_v25, 0.0  ;;  %v4879_v24 = vadd.f32 %v4878_v49, %v4877_v62  ;;  %6477 = vmatprep.mubr.msk.bf16.mxu0 %vm334_vm1, %v6022_v7  ;;  %v4881_v42 = vsel %vm334_vm1, %v4836_v53, 0.0 }
 0x4b7   : > { %v3926_v6 = vmax.f32 %v3894_v20, 0.0  ;;  %v3927_v28 = vmax.f32 %v3895_v34, 0.0  ;;  %v4883_v60 = vsel %vm334_vm1, %v4837_v30, 0.0  ;;  %6164 = vmatmul.mubr.bf16.gmra.mrb[60].mxu0 %v6021_v36  ;;  %v4882_v61 = vadd.f32 %v4881_v42, %v4880_v16  ;;  %p7095_p13 = pneg %p7094_p12 }
 0x4b8   : > { %v4884_v50 = vsel %vm334_vm1, %v4839_v55, 0.0  ;;  %v4886_v44 = vsel %vm334_vm1, %v4838_v32, 0.0  ;;  %v4887_v22 = vsel %vm334_vm1, %v4840_v13, 0.0  ;;  %v5109_v18 = vcombine.high %v4879_v24, %v4879_v24 }
 0x4b9   : > { %v3942_v1 = vadd.f32 %v3926_v6, %v3924_v45  ;;  %v3943_v63 = vadd.f32 %v3927_v28, %v3925_v56  ;;  %v9697_v10 = vadd.f32 %v4884_v50, %v4883_v60  ;;  %v9699_v23 = vadd.f32 %v4887_v22, %v4886_v44  ;;  %p7102_p3 = pnand %p7101_p2, %p7095_p13 }
 0x4ba   : > { %v9702_v57 = vrot.slane %v4879_v24, %v8812_v51  ;;  %v5126_v19 = vcombine.high %v4882_v61, %v4882_v61  ;;  %v9705_v41 = vrot.slane %v4882_v61, %v8812_v51  ;;  %v9710_v0 = vrot.slane %v5109_v18, %v8812_v51 }
 0x4bb   : > { %v4198_v21 = vcombine.high %v3942_v1, %v3942_v1  ;;  %v4205_v17 = vrot.slane %v3942_v1, %v8812_v51  ;;  %v4215_v33 = vcombine.high %v3943_v63, %v3943_v63  ;;  %v4222_v36 = vrot.slane %v3943_v63, %v8812_v51 }
 0x4bc   : > { %v5124_v48 = vcombine.high %v9702_v57, %v9702_v57  ;;  %v9715_v2 = vrot.slane %v5126_v19, %v8812_v51  ;;  %v5141_v12 = vcombine.high %v9705_v41, %v9705_v41  ;;  %v5125_v3 = vcombine.high %v9710_v0, %v9710_v0 }
 0x4bd   : > { %v4212_v11 = vrot.slane %v4198_v21, %v8812_v51  ;;  %v4213_v29 = vcombine.high %v4205_v17, %v4205_v17  ;;  %v4689_v52 = vsel %vm4296_vm8, %v4205_v17, 0.0  ;;  %v4229_v58 = vrot.slane %v4215_v33, %v8812_v51 }
 0x4be   : > { %v4690_v47 = vrot.slane %v4689_v52, 4  ;;  %v4230_v40 = vcombine.high %v4222_v36, %v4222_v36  ;;  %v4717_v54 = vsel %vm4296_vm8, %v4222_v36, 0.0 }
 0x4bf   : > { %v4214_v9 = vcombine.high %v4212_v11, %v4212_v11  ;;  %v4696_v26 = vsel %vm4296_vm8, %v4213_v29, 0.0  ;;  %v4703_v37 = vsel %vm4296_vm8, %v4212_v11, 0.0  ;;  %v4231_v39 = vcombine.high %v4229_v58, %v4229_v58 }
 0x4c0   : > { %v4691_v4 = vadd.f32 %v4690_v47, %v4689_v52  ;;  %v4697_v8 = vrot.slane %v4696_v26, 4  ;;  %v4704_v38 = vrot.slane %v4703_v37, 4  ;;  %v4718_v43 = vrot.slane %v4717_v54, 4 }
 0x4c1   : > { %v4710_v27 = vsel %vm4296_vm8, %v4214_v9, 0.0  ;;  %v4724_v59 = vsel %vm4296_vm8, %v4230_v40, 0.0  ;;  %v4731_v35 = vsel %vm4296_vm8, %v4229_v58, 0.0  ;;  %v4738_v14 = vsel %vm4296_vm8, %v4231_v39, 0.0 }
 0x4c2   : > { %v4692_v15 = vrot.slane %v4691_v4, 2  ;;  %v4698_v5 = vadd.f32 %v4697_v8, %v4696_v26  ;;  %v4705_v25 = vadd.f32 %v4704_v38, %v4703_v37  ;;  %v4711_v53 = vrot.slane %v4710_v27, 4 }
 0x4c3   : > { %v4719_v30 = vadd.f32 %v4718_v43, %v4717_v54  ;;  %v4725_v62 = vrot.slane %v4724_v59, 4  ;;  %v4732_v7 = vrot.slane %v4731_v35, 4  ;;  %v4739_v20 = vrot.slane %v4738_v14, 4 }
 0x4c4   : > { %v4693_v34 = vadd.f32 %v4692_v15, %v4691_v4  ;;  %v4699_v32 = vrot.slane %v4698_v5, 2  ;;  %v4706_v55 = vrot.slane %v4705_v25, 2  ;;  %v4712_v13 = vadd.f32 %v4711_v53, %v4710_v27 }
 0x4c5   : > { %v4720_v49 = vrot.slane %v4719_v30, 2  ;;  %v4726_v45 = vadd.f32 %v4725_v62, %v4724_v59  ;;  %v4733_v56 = vadd.f32 %v4732_v7, %v4731_v35  ;;  %v4740_v24 = vadd.f32 %v4739_v20, %v4738_v14 }
 0x4c6   : > { %v4694_v16 = vrot.slane %v4693_v34, 1  ;;  %v4700_v6 = vadd.f32 %v4699_v32, %v4698_v5  ;;  %v4707_v28 = vadd.f32 %v4706_v55, %v4705_v25  ;;  %v4713_v42 = vrot.slane %v4712_v13, 2 }
 0x4c7   : > { %v4721_v60 = vadd.f32 %v4720_v49, %v4719_v30  ;;  %v4727_v61 = vrot.slane %v4726_v45, 2  ;;  %v4734_v50 = vrot.slane %v4733_v56, 2  ;;  %v4741_v44 = vrot.slane %v4740_v24, 2 }
 0x4c8   : > { %v4695_v22 = vadd.f32 %v4694_v16, %v4693_v34  ;;  %v4701_v1 = vrot.slane %v4700_v6, 1  ;;  %v4708_v63 = vrot.slane %v4707_v28, 1  ;;  %v4714_v18 = vadd.f32 %v4713_v42, %v4712_v13 }
 0x4c9   : > { %v4722_v19 = vrot.slane %v4721_v60, 1  ;;  %v4728_v21 = vadd.f32 %v4727_v61, %v4726_v45  ;;  %v4735_v17 = vadd.f32 %v4734_v50, %v4733_v56  ;;  %v4742_v33 = vadd.f32 %v4741_v44, %v4740_v24 }
 0x4ca   : > { %v4702_v36 = vadd.f32 %v4701_v1, %v4700_v6  ;;  %v4709_v11 = vadd.f32 %v4708_v63, %v4707_v28  ;;  %v4715_v29 = vrot.slane %v4714_v18, 1  ;;  %v4801_v52 = vmul.f32 0.25, %v4695_v22 }
 0x4cb   : > { %v4723_v58 = vadd.f32 %v4722_v19, %v4721_v60  ;;  %v4729_v47 = vrot.slane %v4728_v21, 1  ;;  %v4736_v40 = vrot.slane %v4735_v17, 1  ;;  %v4743_v54 = vrot.slane %v4742_v33, 1 }
 0x4cc   : > { %v4716_v9 = vadd.f32 %v4715_v29, %v4714_v18  ;;  %v4802_v26 = vmul.f32 0.25, %v4702_v36  ;;  %v4803_v37 = vmul.f32 0.25, %v4709_v11  ;;  %v5142_v39 = vcombine.high %v9715_v2, %v9715_v2 }
 0x4cd   : > { %v4730_v4 = vadd.f32 %v4729_v47, %v4728_v21  ;;  %v4737_v8 = vadd.f32 %v4736_v40, %v4735_v17  ;;  %v4744_v38 = vadd.f32 %v4743_v54, %v4742_v33  ;;  %v4805_v43 = vmul.f32 0.25, %v4723_v58 }
 0x4ce   : > { %v4804_v27 = vmul.f32 0.25, %v4716_v9  ;;  %v5874_v59 = vsel %vm5818_vm9, %v4802_v26, %v4801_v52  ;;  %v5143_v35 = vcombine.high %v9697_v10, %v9697_v10  ;;  %v9738_v14 = vrot.slane %v9697_v10, %v8812_v51 }
 0x4cf   : > { %v5875_v15 = vsel %vm5820_vm10, %v4803_v37, %v5874_v59  ;;  %v4806_v5 = vmul.f32 0.25, %v4730_v4  ;;  %v4807_v25 = vmul.f32 0.25, %v4737_v8  ;;  %v9741_v53 = vmul.f32 0.25, %v4744_v38 }
 0x4d0   : > { %v5876_v30 = vsel %vm5822_vm11, %v4804_v27, %v5875_v15  ;;  %v9745_v62 = vrot.slane %v5143_v35, %v8812_v51  ;;  %v5158_v7 = vcombine.high %v9738_v14, %v9738_v14  ;;  %v5160_v20 = vcombine.high %v9699_v23, %v9699_v23 }
 0x4d1   : > { %v5877_v10 = vsel %vm5824_vm12, %v4805_v43, %v5876_v30  ;;  %v9754_v34 = vrot.slane %v9699_v23, %v8812_v51  ;;  %v5578_v32 = vsel %vm5241_vm7, %v9702_v57, 0.0  ;;  %v5585_v55 = vsel %vm5241_vm7, %v5124_v48, 0.0 }
 0x4d2   : > { %v5878_v13 = vsel %vm5826_vm13, %v4806_v5, %v5877_v10  ;;  %v5159_v49 = vcombine.high %v9745_v62, %v9745_v62  ;;  %v9766_v45 = vrot.slane %v5160_v20, %v8812_v51  ;;  %v5579_v56 = vrot.slane %v5578_v32, 4 }
 0x4d3   : > { %v9769_v23 = vsel %vm5828_vm14, %v4807_v25, %v5878_v13  ;;  %v5175_v24 = vcombine.high %v9754_v34, %v9754_v34  ;;  %v5586_v16 = vrot.slane %v5585_v55, 4  ;;  %v5592_v57 = vsel %vm5241_vm7, %v9710_v0, 0.0 }
 0x4d4   : > { %v5176_v48 = vcombine.high %v9766_v45, %v9766_v45  ;;  %v5580_v6 = vadd.f32 %v5579_v56, %v5578_v32  ;;  %v5593_v28 = vrot.slane %v5592_v57, 4  ;;  %v5599_v51 = vsel %vm5241_vm7, %v5125_v3, 0.0 }
 0x4d5   : > { %v5587_v42 = vadd.f32 %v5586_v16, %v5585_v55  ;;  %v5600_v60 = vrot.slane %v5599_v51, 4  ;;  %v5606_v61 = vsel %vm5241_vm7, %v9705_v41, 0.0  ;;  %v5613_v50 = vsel %vm5241_vm7, %v5141_v12, 0.0 }
 0x4d6   : > { %v5581_v44 = vrot.slane %v5580_v6, 2  ;;  %v5594_v22 = vadd.f32 %v5593_v28, %v5592_v57  ;;  %v5607_v1 = vrot.slane %v5606_v61, 4  ;;  %v5614_v63 = vrot.slane %v5613_v50, 4 }
 0x4d7   : > { %v5588_v18 = vrot.slane %v5587_v42, 2  ;;  %v5601_v19 = vadd.f32 %v5600_v60, %v5599_v51  ;;  %v5620_v0 = vsel %vm5241_vm7, %v9715_v2, 0.0  ;;  %v5627_v3 = vsel %vm5241_vm7, %v5142_v39, 0.0 }
 0x4d8   : > { %v5582_v21 = vadd.f32 %v5581_v44, %v5580_v6  ;;  %v5595_v17 = vrot.slane %v5594_v22, 2  ;;  %v5608_v33 = vadd.f32 %v5607_v1, %v5606_v61  ;;  %v5615_v36 = vadd.f32 %v5614_v63, %v5613_v50 }
 0x4d9   : > { %v5589_v11 = vadd.f32 %v5588_v18, %v5587_v42  ;;  %v5602_v29 = vrot.slane %v5601_v19, 2  ;;  %v5621_v41 = vrot.slane %v5620_v0, 4  ;;  %v5628_v52 = vrot.slane %v5627_v3, 4 }
 0x4da   : > { %v5583_v12 = vrot.slane %v5582_v21, 1  ;;  %v5596_v58 = vadd.f32 %v5595_v17, %v5594_v22  ;;  %v5609_v47 = vrot.slane %v5608_v33, 2  ;;  %v5616_v40 = vrot.slane %v5615_v36, 2 }
 0x4db   : > { %v5590_v54 = vrot.slane %v5589_v11, 1  ;;  %v5603_v9 = vadd.f32 %v5602_v29, %v5601_v19  ;;  %v5622_v26 = vadd.f32 %v5621_v41, %v5620_v0  ;;  %v5629_v37 = vadd.f32 %v5628_v52, %v5627_v3 }
 0x4dc   : > { %v9790_v4 = vadd.f32 %v5583_v12, %v5582_v21  ;;  %v5597_v2 = vrot.slane %v5596_v58, 1  ;;  %v5610_v39 = vadd.f32 %v5609_v47, %v5608_v33  ;;  %v5617_v8 = vadd.f32 %v5616_v40, %v5615_v36 }
 0x4dd   : > { %v9792_v38 = vadd.f32 %v5590_v54, %v5589_v11  ;;  %v5604_v43 = vrot.slane %v5603_v9, 1  ;;  %v5623_v27 = vrot.slane %v5622_v26, 2  ;;  %v5630_v59 = vrot.slane %v5629_v37, 2 }
 0x4de   : > { %v9794_v35 = vadd.f32 %v5597_v2, %v5596_v58  ;;  %v5611_v15 = vrot.slane %v5610_v39, 1  ;;  %v5618_v5 = vrot.slane %v5617_v8, 1  ;;  %v5634_v25 = vsel %vm5241_vm7, %v9738_v14, 0.0 }
 0x4df   : > { %v9798_v30 = vadd.f32 %v5604_v43, %v5603_v9  ;;  %v5624_v20 = vadd.f32 %v5623_v27, %v5622_v26  ;;  %v5631_v10 = vadd.f32 %v5630_v59, %v5629_v37  ;;  %v5635_v32 = vrot.slane %v5634_v25, 4 }
 0x4e0   : > { %v9800_v55 = vadd.f32 %v5611_v15, %v5610_v39  ;;  %v9802_v13 = vadd.f32 %v5618_v5, %v5617_v8  ;;  %v5641_v56 = vsel %vm5241_vm7, %v5158_v7, 0.0  ;;  %v5648_v16 = vsel %vm5241_vm7, %v9745_v62, 0.0 }
 0x4e1   : > { %v5625_v57 = vrot.slane %v5624_v20, 1  ;;  %v5632_v6 = vrot.slane %v5631_v10, 1  ;;  %v5636_v28 = vadd.f32 %v5635_v32, %v5634_v25  ;;  %v5642_v51 = vrot.slane %v5641_v56, 4 }
 0x4e2   : > { %v5649_v42 = vrot.slane %v5648_v16, 4  ;;  %v5655_v60 = vsel %vm5241_vm7, %v5159_v49, 0.0  ;;  %v5662_v61 = vsel %vm5241_vm7, %v9754_v34, 0.0  ;;  %v5669_v14 = vsel %vm5241_vm7, %v5175_v24, 0.0 }
 0x4e3   : > { %v5626_v50 = vadd.f32 %v5625_v57, %v5624_v20  ;;  %v5633_v7 = vadd.f32 %v5632_v6, %v5631_v10  ;;  %v5637_v44 = vrot.slane %v5636_v28, 2  ;;  %v5643_v22 = vadd.f32 %v5642_v51, %v5641_v56 }
 0x4e4   : > { %v5650_v1 = vadd.f32 %v5649_v42, %v5648_v16  ;;  %v5656_v63 = vrot.slane %v5655_v60, 4  ;;  %v5663_v18 = vrot.slane %v5662_v61, 4  ;;  %v5670_v19 = vrot.slane %v5669_v14, 4 }
 0x4e5   : > { %v5638_v0 = vadd.f32 %v5637_v44, %v5636_v28  ;;  %v5644_v3 = vrot.slane %v5643_v22, 2  ;;  %v5676_v62 = vsel %vm5241_vm7, %v9766_v45, 0.0  ;;  %v5683_v34 = vsel %vm5241_vm7, %v5176_v48, 0.0 }
 0x4e6   : > { %v5651_v49 = vrot.slane %v5650_v1, 2  ;;  %v5657_v24 = vadd.f32 %v5656_v63, %v5655_v60  ;;  %v5664_v21 = vadd.f32 %v5663_v18, %v5662_v61  ;;  %v5671_v17 = vadd.f32 %v5670_v19, %v5669_v14 }
 0x4e7   : > { %v5639_v33 = vrot.slane %v5638_v0, 1  ;;  %v5645_v36 = vadd.f32 %v5644_v3, %v5643_v22  ;;  %v5677_v11 = vrot.slane %v5676_v62, 4  ;;  %v5684_v29 = vrot.slane %v5683_v34, 4 }
 0x4e8   : > { %v5652_v41 = vadd.f32 %v5651_v49, %v5650_v1  ;;  %v5658_v52 = vrot.slane %v5657_v24, 2  ;;  %v5665_v12 = vrot.slane %v5664_v21, 2  ;;  %v5672_v58 = vrot.slane %v5671_v17, 2 }
 0x4e9   : > { %v5640_v47 = vadd.f32 %v5639_v33, %v5638_v0  ;;  %v5646_v40 = vrot.slane %v5645_v36, 1  ;;  %v5678_v54 = vadd.f32 %v5677_v11, %v5676_v62  ;;  %v5685_v9 = vadd.f32 %v5684_v29, %v5683_v34 }
 0x4ea   : > { %v6149_v26 = vpop.f32.mrb[52].mxu0  ;;  %v5653_v45 = vrot.slane %v5652_v41, 1  ;;  %v5659_v37 = vadd.f32 %v5658_v52, %v5657_v24  ;;  %v5666_v48 = vadd.f32 %v5665_v12, %v5664_v21  ;;  %v5673_v2 = vadd.f32 %v5672_v58, %v5671_v17  ;;  %v9837_v24 = vld [vmem:[%s9936_s6] ss:$0 sm:$0xff]  ;;  %v7091_v52 = vld [vmem:[#allocation2 + $0x128] sm:$0xff] }
 0x4eb   : > { %v6151_v39 = vpop.f32.mrb[53].mxu0  ;;  %v5647_v8 = vadd.f32 %v5646_v40, %v5645_v36  ;;  %v5679_v43 = vrot.slane %v5678_v54, 2  ;;  %v5686_v27 = vrot.slane %v5685_v9, 2  ;;  %v5738_v59 = vmul.f32 0.25, %v9790_v4 }
 0x4ec   : > { %v6152_v15 = vpop.f32.mrb[54].mxu0  ;;  %v5654_v5 = vadd.f32 %v5653_v45, %v5652_v41  ;;  %v5660_v25 = vrot.slane %v5659_v37, 1  ;;  %v5667_v20 = vrot.slane %v5666_v48, 1  ;;  %v5674_v10 = vrot.slane %v5673_v2, 1 }
 0x4ed   : > { %v6154_v32 = vpop.f32.mrb[55].mxu0  ;;  %v5680_v56 = vadd.f32 %v5679_v43, %v5678_v54  ;;  %v5687_v16 = vadd.f32 %v5686_v27, %v5685_v9  ;;  %v5739_v57 = vmul.f32 0.25, %v9792_v38  ;;  %v5740_v6 = vmul.f32 0.25, %v9794_v35 }
 0x4ee   : > { %v5661_v28 = vadd.f32 %v5660_v25, %v5659_v37  ;;  %v5668_v51 = vadd.f32 %v5667_v20, %v5666_v48  ;;  %v5675_v42 = vadd.f32 %v5674_v10, %v5673_v2  ;;  %v5741_v60 = vmul.f32 0.25, %v9798_v30 }
 0x4ef   : > { %v5681_v61 = vrot.slane %v5680_v56, 1  ;;  %v5688_v4 = vrot.slane %v5687_v16, 1  ;;  %v5742_v14 = vmul.f32 0.25, %v9800_v55  ;;  %v5743_v44 = vmul.f32 0.25, %v9802_v13 }
 0x4f0   : > { %v5744_v22 = vmul.f32 0.25, %v5626_v50  ;;  %v5745_v1 = vmul.f32 0.25, %v5633_v7  ;;  %v5746_v63 = vmul.f32 0.25, %v5640_v47  ;;  %v5747_v18 = vmul.f32 0.25, %v5647_v8  ;;  %v921_v7 = vld [vmem:[#allocation2 + $0x120] sm:$0x1] }
 0x4f1   : > { %v5682_v19 = vadd.f32 %v5681_v61, %v5680_v56  ;;  %v5689_v38 = vadd.f32 %v5688_v4, %v5687_v16  ;;  %v5748_v0 = vmul.f32 0.25, %v5654_v5  ;;  %v5749_v35 = vmul.f32 0.25, %v5661_v28 }
 0x4f2   : > { %v5750_v3 = vmul.f32 0.25, %v5668_v51  ;;  %v5751_v62 = vmul.f32 0.25, %v5675_v42  ;;  %v5995_v30 = vsel %vm5818_vm9, %v5739_v57, %v5738_v59  ;;  %v6002_v34 = vsel %vm5818_vm9, %v5747_v18, %v5746_v63 }
 0x4f3   : > { %v5752_v49 = vmul.f32 0.25, %v5682_v19  ;;  %v5753_v55 = vmul.f32 0.25, %v5689_v38  ;;  %v5996_v13 = vsel %vm5820_vm10, %v5740_v6, %v5995_v30  ;;  %v6003_v50 = vsel %vm5820_vm10, %v5748_v0, %v6002_v34 }
 0x4f4   : > { %v5997_v21 = vsel %vm5822_vm11, %v5741_v60, %v5996_v13  ;;  %v6004_v17 = vsel %vm5822_vm11, %v5749_v35, %v6003_v50  ;;  %v5873_v33 = vsel %vm5830_vm15, %v9591_v31, %v9594_v46  ;;  %v5880_v36 = vsel %vm5830_vm15, %v9741_v53, %v9769_v23  ;;  %v10216_v23 = vld [vmem:[#allocation17_spill] sm:$0xff] }
 0x4f5   : > { %v5998_v11 = vsel %vm5824_vm12, %v5742_v14, %v5997_v21  ;;  %v6005_v29 = vsel %vm5824_vm12, %v5750_v3, %v6004_v17  ;;  %v6023_v41 = vpack.c.bf16 %v5880_v36, %v5873_v33  ;;  %v1207_v12 = vshrl.u32 %v7091_v52, 16 }
 0x4f6   : > { %v5999_v58 = vsel %vm5826_vm13, %v5743_v44, %v5998_v11  ;;  %v6006_v47 = vsel %vm5826_vm13, %v5751_v62, %v6005_v29  ;;  %v1211_v40 = vshll.u32 %v921_v7, 16  ;;  %v6150_v31 = vadd.f32 %v9837_v24, %v6149_v26 }
 0x4f7   : > { %v6000_v46 = vsel %vm5828_vm14, %v5744_v22, %v5999_v58  ;;  %v6007_v53 = vsel %vm5828_vm14, %v5752_v49, %v6006_v47  ;;  %v1209_v54 = vor.u32 %v1207_v12, %v10216_v23  ;;  %v6153_v9 = vadd.f32 %v9837_v24, %v6152_v15 }
 0x4f8   : > { %v6001_v45 = vsel %vm5830_vm15, %v5745_v1, %v6000_v46  ;;  %v6008_v37 = vsel %vm5830_vm15, %v5753_v55, %v6007_v53  ;;  %v1213_v48 = vrot.slane %v1211_v40, 1  ;;  %v6180_v2 = vmax.f32 %v6150_v31, 0.0 }
 0x4f9   : > { %v6024_v39 = vpack.c.bf16 %v6008_v37, %v6001_v45  ;;  %v6181_v8 = vmax.f32 %v6153_v9, 0.0 }
 0x4fa   : > { %v1214_v43 = vsel %vm922_vm5, %v1209_v54, %v1213_v48  ;;  %6188 = vst [vmem:[%s9861_s29] sm:$0xff] %v6180_v2 }
 0x4fb   : > { %6478 = vmatprep.mubr.msk.bf16.mxu0 %vm334_vm1, %v6024_v39  ;;  %3561 = vmatprep.mubr.bf16.mxu1 %v1214_v43  ;;  %6189 = vst [vmem:[%s9861_s29 + $0x8] sm:$0xff] %v6181_v8 }
 0x4fc   : > { %6172 = vmatmul.mubr.bf16.gmra.mrb[64].mxu0 %v6023_v41  ;;  %3562 = vmatmul.mubr.bf16.gmra.mrb[40].mxu1 %v7091_v52 }
 0x52e   : > { %v6157_v26 = vpop.f32.mrb[56].mxu0 }
 0x52f   : > { %v6158_v27 = vadd.f32 %v9837_v24, %v6157_v26  ;;  %v6159_v59 = vpop.f32.mrb[57].mxu0 }
 0x530   : > { %v6160_v15 = vpop.f32.mrb[58].mxu0 }
 0x531   : > { %v6182_v5 = vmax.f32 %v6158_v27, 0.0  ;;  %v6161_v25 = vadd.f32 %v9837_v24, %v6160_v15  ;;  %v6162_v20 = vpop.f32.mrb[59].mxu0 }
 0x533   : > { %6190 = vst [vmem:[%s9861_s29 + $0x10] sm:$0xff] %v6182_v5  ;;  %v6183_v10 = vmax.f32 %v6161_v25, 0.0 }
 0x535   : > { %6191 = vst [vmem:[%s9861_s29 + $0x18] sm:$0xff] %v6183_v10 }
 0x58a   : > { %v6165_v32 = vpop.f32.mrb[60].mxu0 }
 0x58b   : > { %v6166_v56 = vadd.f32 %v9837_v24, %v6165_v32  ;;  %v6167_v16 = vpop.f32.mrb[61].mxu0 }
 0x58c   : > { %v6168_v57 = vpop.f32.mrb[62].mxu0 }
 0x58d   : > { %v6184_v6 = vmax.f32 %v6166_v56, 0.0  ;;  %v6169_v28 = vadd.f32 %v9837_v24, %v6168_v57  ;;  %v6170_v51 = vpop.f32.mrb[63].mxu0 }
 0x58f   : > { %6192 = vst [vmem:[%s9861_s29 + $0x20] sm:$0xff] %v6184_v6  ;;  %v6185_v42 = vmax.f32 %v6169_v28, 0.0 }
 0x591   : > { %6193 = vst [vmem:[%s9861_s29 + $0x28] sm:$0xff] %v6185_v42 }
 0x5cf   : > { %v6173_v60 = vpop.f32.mrb[64].mxu0  ;;  %v3563_v61 = vpop.f32.mrb[40].mxu1 }
 0x5d0   : > { %v6174_v4 = vadd.f32 %v9837_v24, %v6173_v60  ;;  %v6175_v14 = vpop.f32.mrb[65].mxu0  ;;  %v3564_v44 = vpop.f32.mrb[41].mxu1 }
 0x5d1   : > { %v6176_v22 = vpop.f32.mrb[66].mxu0  ;;  %v3565_v1 = vpop.f32.mrb[42].mxu1 }
 0x5d2   : > { %v6186_v63 = vmax.f32 %v6174_v4, 0.0  ;;  %v6177_v18 = vadd.f32 %v9837_v24, %v6176_v22  ;;  %v6178_v19 = vpop.f32.mrb[67].mxu0  ;;  %v3566_v38 = vpop.f32.mrb[43].mxu1 }
 0x5d4   : > { %6194 = vst [vmem:[%s9861_s29 + $0x30] sm:$0xff] %v6186_v63  ;;  %v6187_v0 = vmax.f32 %v6177_v18, 0.0 }
 0x5d6   : > { %6195 = vst [vmem:[%s9861_s29 + $0x38] sm:$0xff] %v6187_v0 }
 0x5d7   : > { %7105 = shalt.err (!%p7102_p3)
}
 0x5d8   : > { %s7106_s21 = scalar_lea.hbm %s9881_s15, 1024  ;;  %s7110_s23 = scalar_lea.hbm %s9937_s7, 2048 }
 0x5d9   : > { %p7107_p4 = scmp.ne.s32.totalorder %s9881_s15, %s7106_s21  ;;  %p7111_p9 = scmp.lt.u32.totalorder %s9881_s15, %s9937_s7 }
 0x5da   : > { %p7112_p10 = scmp.lt.u32.totalorder %s7110_s23, %s7106_s21  ;;  %p7114_p12 = scmp.lt.u32.totalorder %s7106_s21, %s9881_s15 }
 0x5db   : > { %p7108_p7 = pnand %p7107_p4, %p7239_p5 }
 0x5dc   : > { %p7113_p11 = por %p7112_p10, %p7111_p9 }
 0x5dd   : > { %p7109_p8 = pneg %p7108_p7 }
 0x5de   : > { %p7115_p13 = por %p7114_p12, %p7113_p11 }
 0x5e0   : > { %p7116_p0 = pnand %p7115_p13, %p7109_p8 }
 0x5e2   : > { %7119 = shalt.err (!%p7116_p0)
}
 0x5e3   : > { %s7159_s13 = smov 128   ;;  %s7160_s14 = smov 8  }
 0x5e4   : > { %6930 = dma.vmem_to_hbm [thread:$0]  (%p7239_p5), %s9883_s9, 1024, %s9881_s15, %s9889_s28, %s7159_s13, %s7159_s13, %s7160_s14  }
 0x5e5 PF: > { %p6936_p1 = scmp.ge.s32.totalorder %s7154_s27, 2  ;;  %s6225_s16 = sand.u32 1, %s7142_s24  }
 0x5e6   : > { %s6226_s17 = scalar_lea.sflag [#allocation5], %s6225_s16 }
 0x5e7   : > { %p6933_p2 = pnand %p6936_p1, %p7243_p6 }
 0x5e9   : > { %7137 = dma.done.wait (!%p6933_p2), %s6226_s17, 1024  }
 0x5ea   : > { %7139 = vsyncadd (!%p6933_p2), %s6226_s17, 4294966272  ;;  %p17_p3 = scmp.ge.s32.totalorder %s7226_s30, 4   ;;  %s10217_s24 = smov %s7146_s25 }
 0x5eb   : > { %s10218_s25 = smov %s7150_s26  ;;  %s10219_s26 = smov %s7237_s10 }
 0x5ec   : > { %s10220_s27 = smov %s7226_s30  ;;  %19 = sbr.rel (!%p17_p3) target bundleno = 3 (0x3), region = 85 }
 0x5f3   :  { %6231 = vsyncpa [#allocation5], 1 }
 0x5f4   :  { %6233 = vsyncpa [#allocation5 + $0x1], 1 }

</bundles_post_ra>
